<compile_context>
chip_gen: v7x
topology: tpu7x:2x2x1
jax: 0.10.0
libtpu: 0.0.40
codegen_flags: <defaults>
</compile_context>

<pallas_src>
import numpy as np
import jax
import jax.numpy as jnp
from jax.experimental import pallas as pl
from jax.experimental.pallas import tpu as pltpu

EMBED_DIM = 64
C1, C2, C3 = 32, 64, 128


def _r8(n):
    return ((n + 7) // 8) * 8


def _conv_plan(H, W, pooled):
    """Static row-counts for one conv layer operating on the flat padded layout."""
    Wp = W + 2
    if pooled:
        Ho, Wo = H // 2, W // 2                            # MaxPool2d(2) floors, like PyTorch
        Lp = _r8(2 * (Ho - 1) * Wp + 2 * (Wo - 1) + 1)     # pool-candidate rows
        Lc = _r8(Lp + Wp + 1)                              # conv rows (pool reads up to +Wp+1)
    else:
        Ho = Wo = Lp = None
        Lc = _r8((H - 1) * Wp + W)
    # input-buffer rows: conv taps read up to +2*Wp+2; also hold the whole real padded map
    Lin = _r8(max(Lc + 2 * Wp + 2, (H + 2) * Wp))
    return dict(H=H, W=W, Wp=Wp, Ho=Ho, Wo=Wo, Lp=Lp, Lc=Lc, Lin=Lin)


def _pool_scatter(p_in, p_out):
    """0/1 matrix: pooled values of layer p_in -> zero-padded flat input buffer of layer p_out."""
    S = np.zeros((p_out["Lin"], p_in["Lp"]), np.float32)
    for a in range(p_in["Ho"]):
        for b in range(p_in["Wo"]):
            S[(a + 1) * p_out["Wp"] + (b + 1), 2 * a * p_in["Wp"] + 2 * b] = 1.0
    return S


def _valid_mask(p):
    """1.0 at flat positions that are real (non-padding) pixels, 0 elsewhere."""
    m = np.zeros((p["Lc"], 1), np.float32)
    for i in range(p["H"]):
        for j in range(p["W"]):
            m[i * p["Wp"] + j, 0] = 1.0
    return m


def _make_kernel(p1, p2, p3):
    Wp1, Lc1, Lp1 = p1["Wp"], p1["Lc"], p1["Lp"]
    Wp2, Lc2, Lp2 = p2["Wp"], p2["Lc"], p2["Lp"]
    Wp3, Lc3 = p3["Wp"], p3["Lc"]
    inv_hw3 = 1.0 / float(p3["H"] * p3["W"])

    def offs(Wp):
        return [kh * Wp + kw for kh in range(3) for kw in range(3)]

    off1, off2, off3 = offs(Wp1), offs(Wp2), offs(Wp3)

    def kernel(x_ref, w1_ref, b1_ref, w2_ref, b2_ref, w3_ref, b3_ref,
               wf_ref, bf_ref, s1_ref, s2_ref, m3_ref, o_ref):
        f32 = jnp.float32
        bf16 = jnp.bfloat16

        # ---- conv1 + ReLU: Cin=1 -> 9-tap VPU multiply-accumulate (keep off the MXU) ----
        x1 = x_ref[0]                                    # (L1, 1) zero-padded flat image
        w1 = w1_ref[...]                                 # (9, C1)
        acc1 = jnp.zeros((Lc1, C1), f32)
        for t in range(9):
            acc1 = acc1 + x1[off1[t]:off1[t] + Lc1, :] * w1[t:t + 1, :]
        y1 = jnp.maximum(acc1 + b1_ref[...], 0.0)

        # ---- fused 2x2 max-pool + scatter into zero-padded layer-2 layout ---------------
        pc1 = jnp.maximum(jnp.maximum(y1[0:Lp1, :], y1[1:Lp1 + 1, :]),
                          jnp.maximum(y1[Wp1:Wp1 + Lp1, :], y1[Wp1 + 1:Wp1 + Lp1 + 1, :]))
        x2 = jnp.dot(s1_ref[...], pc1, preferred_element_type=f32)       # (L2, C1)

        # ---- conv2 + ReLU: 9 shifted-slice MXU matmuls (bf16 operands, f32 accumulate) --
        acc2 = jnp.zeros((Lc2, C2), f32)
        for t in range(9):
            acc2 = acc2 + jnp.dot(x2[off2[t]:off2[t] + Lc2, :].astype(bf16), w2_ref[t],
                                  preferred_element_type=f32)
        y2 = jnp.maximum(acc2 + b2_ref[...], 0.0)

        pc2 = jnp.maximum(jnp.maximum(y2[0:Lp2, :], y2[1:Lp2 + 1, :]),
                          jnp.maximum(y2[Wp2:Wp2 + Lp2, :], y2[Wp2 + 1:Wp2 + Lp2 + 1, :]))
        x3 = jnp.dot(s2_ref[...], pc2, preferred_element_type=f32)       # (L3, C2)

        # ---- conv3 + ReLU ----------------------------------------------------------------
        acc3 = jnp.zeros((Lc3, C3), f32)
        for t in range(9):
            acc3 = acc3 + jnp.dot(x3[off3[t]:off3[t] + Lc3, :].astype(bf16), w3_ref[t],
                                  preferred_element_type=f32)
        y3 = jnp.maximum(acc3 + b3_ref[...], 0.0)                        # (Lc3, C3)

        # ---- masked global average pool + Linear + L2 normalize (rsqrt on EUP) ----------
        feat = jnp.sum(y3 * m3_ref[...], axis=0, keepdims=True) * inv_hw3    # (1, C3)
        y = jnp.dot(feat, wf_ref[...], preferred_element_type=f32) + bf_ref[...]
        ssq = jnp.sum(y * y, axis=-1, keepdims=True)
        # F.normalize(dim=-1): x / max(||x||, 1e-12) == x * rsqrt(max(||x||^2, 1e-24))
        o_ref[...] = (y * jax.lax.rsqrt(jnp.maximum(ssq, 1e-24)))[None]

    return kernel


def mfcc_embedding_net(x_nchw, params):
    """Forward pass equivalent to the PyTorch MFCCEmbeddingNet (input NCHW, C=1)."""
    N, C, H, W = x_nchw.shape
    assert C == 1 and H >= 4 and W >= 4
    p1 = _conv_plan(H, W, pooled=True)
    p2 = _conv_plan(p1["Ho"], p1["Wo"], pooled=True)
    p3 = _conv_plan(p2["Ho"], p2["Wo"], pooled=False)

    # Tiny XLA-side layout glue on the raw image only (no im2col blow-up in HBM):
    # zero-pad spatially, flatten row-major, pad to the slack length the in-kernel slices need.
    Hp, Wp = H + 2, W + 2
    xf = jnp.pad(x_nchw.reshape(N, H, W).astype(jnp.float32), ((0, 0), (1, 1), (1, 1)))
    xf = xf.reshape(N, Hp * Wp)
    xf = jnp.pad(xf, ((0, 0), (0, p1["Lin"] - Hp * Wp)))[..., None]          # (N, L1, 1)

    # Tap-major weight layouts.  (If loading real PyTorch weights: conv OIHW -> HWIO and
    # Linear (out,in) -> (in,out) transposes are required before this point.)
    w1t = params["w1"].reshape(9, C1).astype(jnp.float32)                    # Cin = 1
    w2t = params["w2"].reshape(9, C1, C2).astype(jnp.bfloat16)
    w3t = params["w3"].reshape(9, C2, C3).astype(jnp.bfloat16)
    b1 = params["b1"].reshape(1, C1).astype(jnp.float32)
    b2 = params["b2"].reshape(1, C2).astype(jnp.float32)
    b3 = params["b3"].reshape(1, C3).astype(jnp.float32)
    wf = params["wf"].astype(jnp.float32)                                    # (C3, EMBED_DIM)
    bf = params["bf"].reshape(1, EMBED_DIM).astype(jnp.float32)

    s1 = jnp.asarray(_pool_scatter(p1, p2))
    s2 = jnp.asarray(_pool_scatter(p2, p3))
    m3 = jnp.asarray(_valid_mask(p3))

    out = pl.pallas_call(
        _make_kernel(p1, p2, p3),
        out_shape=jax.ShapeDtypeStruct((N, 1, EMBED_DIM), jnp.float32),
        grid=(N,),
        in_specs=[
            pl.BlockSpec((1, p1["Lin"], 1), lambda i: (i, 0, 0)),    # per-sample image block
            pl.BlockSpec((9, C1), lambda i: (0, 0)),                 # everything below: constant
            pl.BlockSpec((1, C1), lambda i: (0, 0)),                 # block index -> fetched once,
            pl.BlockSpec((9, C1, C2), lambda i: (0, 0, 0)),          # resident in VMEM
            pl.BlockSpec((1, C2), lambda i: (0, 0)),
            pl.BlockSpec((9, C2, C3), lambda i: (0, 0, 0)),
            pl.BlockSpec((1, C3), lambda i: (0, 0)),
            pl.BlockSpec((C3, EMBED_DIM), lambda i: (0, 0)),
            pl.BlockSpec((1, EMBED_DIM), lambda i: (0, 0)),
            pl.BlockSpec((p2["Lin"], p1["Lp"]), lambda i: (0, 0)),
            pl.BlockSpec((p3["Lin"], p2["Lp"]), lambda i: (0, 0)),
            pl.BlockSpec((p3["Lc"], 1), lambda i: (0, 0)),
        ],
        out_specs=pl.BlockSpec((1, 1, EMBED_DIM), lambda i: (i, 0, 0)),
        compiler_params=pltpu.CompilerParams(
            dimension_semantics=("parallel",),        # megacore: shard the batch across TCs
            vmem_limit_bytes=32 * 1024 * 1024),       # explicit, v7x-safe (usage is ~1 MiB)
    )(xf, w1t, b1, w2t, b2, w3t, b3, wf, bf, s1, s2, m3)
    return out.reshape(N, EMBED_DIM)


# ---------------------------------------------------------------------------
# Deterministic parameter init (synthetic; shapes follow the nn.Module __init__, HWIO / (in,out))
# ---------------------------------------------------------------------------
def init_params(key, embed_dim=EMBED_DIM):
    ks = jax.random.split(key, 8)

    def conv_w(k, cin, cout):
        return 0.1 * jax.random.normal(k, (3, 3, cin, cout), jnp.float32)   # HWIO

    return {
        "w1": conv_w(ks[0], 1, 32),
        "b1": 0.01 * jax.random.normal(ks[1], (32,), jnp.float32),
        "w2": conv_w(ks[2], 32, 64),
        "b2": 0.01 * jax.random.normal(ks[3], (64,), jnp.float32),
        "w3": conv_w(ks[4], 64, 128),
        "b3": 0.01 * jax.random.normal(ks[5], (128,), jnp.float32),
        "wf": 0.1 * jax.random.normal(ks[6], (128, embed_dim), jnp.float32),
        "bf": 0.01 * jax.random.normal(ks[7], (embed_dim,), jnp.float32),
    }


def _reference_forward(x_nchw, params):
    """Pure-XLA f32 reference matching the PyTorch module, for a numerical sanity check."""
    x = jnp.transpose(x_nchw, (0, 2, 3, 1)).astype(jnp.float32)              # NCHW -> NHWC

    def conv(x, w, b):
        y = jax.lax.conv_general_dilated(x, w, (1, 1), "SAME",
                                         dimension_numbers=("NHWC", "HWIO", "NHWC"))
        return jax.nn.relu(y + b)

    def pool(x):
        return jax.lax.reduce_window(x, -jnp.inf, jax.lax.max,
                                     (1, 2, 2, 1), (1, 2, 2, 1), "VALID")

    x = pool(conv(x, params["w1"], params["b1"]))
    x = pool(conv(x, params["w2"], params["b2"]))
    x = conv(x, params["w3"], params["b3"])
    f = jnp.mean(x, axis=(1, 2))
    y = f @ params["wf"] + params["bf"]
    n = jnp.sqrt(jnp.sum(y * y, axis=-1, keepdims=True))
    return y / jnp.maximum(n, 1e-12)


if __name__ == "__main__":
    key = jax.random.PRNGKey(0)
    kp, kx = jax.random.split(key)
    params = init_params(kp)

    # PyTorch-style NCHW input with a single channel (MFCC spectrogram patch).
    x = jax.random.normal(kx, (2, 1, 16, 16), jnp.float32)

    out = jax.jit(mfcc_embedding_net)(x, params)
    out = jax.block_until_ready(out)
    assert out.shape == (2, EMBED_DIM), out.shape
    assert bool(jnp.all(jnp.isfinite(out)))

    # Loose tolerance: conv2/conv3 use bf16 MXU operands (f32 accumulation) inside the kernel.
    ref = _reference_forward(x, params)
    err = float(jnp.max(jnp.abs(out - ref)))
    assert err < 7e-2, f"kernel vs reference mismatch: max|diff|={err}"

    print("KERNEL_OK")
</pallas_src>

<mosaic_0001>
module attributes {stable_mosaic.version = 11 : i64} {
  func.func @kernel(%arg0: i32, %arg1: memref<1x336x1xf32, #tpu.memory_space<vmem>>, %arg2: memref<9x32xf32, #tpu.memory_space<vmem>>, %arg3: memref<1x32xf32, #tpu.memory_space<vmem>>, %arg4: memref<9x32x64xbf16, #tpu.memory_space<vmem>>, %arg5: memref<1x64xf32, #tpu.memory_space<vmem>>, %arg6: memref<9x64x128xbf16, #tpu.memory_space<vmem>>, %arg7: memref<1x128xf32, #tpu.memory_space<vmem>>, %arg8: memref<128x64xf32, #tpu.memory_space<vmem>>, %arg9: memref<1x64xf32, #tpu.memory_space<vmem>>, %arg10: memref<112x272xf32, #tpu.memory_space<vmem>>, %arg11: memref<40x72xf32, #tpu.memory_space<vmem>>, %arg12: memref<24x1xf32, #tpu.memory_space<vmem>>, %arg13: memref<1x1x64xf32, #tpu.memory_space<vmem>>) attributes {dimension_semantics = [#tpu.dimension_semantics<parallel>], iteration_bounds = array<i64: 2>, scalar_prefetch = 0 : i64, scratch_operands = 0 : i64, tpu.core_type = #tpu.core_type<tc>, window_params = [{transform_indices = @transform_0, window_bounds = array<i64: 1, 336, 1>}, {pipeline_mode = #tpu.pipeline_mode<synchronous>, transform_indices = @transform_1, window_bounds = array<i64: 9, 32>}, {pipeline_mode = #tpu.pipeline_mode<synchronous>, transform_indices = @transform_2, window_bounds = array<i64: 1, 32>}, {pipeline_mode = #tpu.pipeline_mode<synchronous>, transform_indices = @transform_3, window_bounds = array<i64: 9, 32, 64>}, {pipeline_mode = #tpu.pipeline_mode<synchronous>, transform_indices = @transform_4, window_bounds = array<i64: 1, 64>}, {pipeline_mode = #tpu.pipeline_mode<synchronous>, transform_indices = @transform_5, window_bounds = array<i64: 9, 64, 128>}, {pipeline_mode = #tpu.pipeline_mode<synchronous>, transform_indices = @transform_6, window_bounds = array<i64: 1, 128>}, {pipeline_mode = #tpu.pipeline_mode<synchronous>, transform_indices = @transform_7, window_bounds = array<i64: 128, 64>}, {pipeline_mode = #tpu.pipeline_mode<synchronous>, transform_indices = @transform_8, window_bounds = array<i64: 1, 64>}, {pipeline_mode = #tpu.pipeline_mode<synchronous>, transform_indices = @transform_9, window_bounds = array<i64: 112, 272>}, {pipeline_mode = #tpu.pipeline_mode<synchronous>, transform_indices = @transform_10, window_bounds = array<i64: 40, 72>}, {pipeline_mode = #tpu.pipeline_mode<synchronous>, transform_indices = @transform_11, window_bounds = array<i64: 24, 1>}, {transform_indices = @transform_12, window_bounds = array<i64: 1, 1, 64>}]} {
    %c0 = arith.constant 0 : index
    %c0_0 = arith.constant 0 : index
    %c0_1 = arith.constant 0 : index
    %0 = vector.load %arg1[%c0, %c0_0, %c0_1] : memref<1x336x1xf32, #tpu.memory_space<vmem>>, vector<1x336x1xf32>
    %1 = vector.shape_cast %0 : vector<1x336x1xf32> to vector<336x1xf32>
    %c0_2 = arith.constant 0 : index
    %c0_3 = arith.constant 0 : index
    %2 = vector.load %arg2[%c0_2, %c0_3] : memref<9x32xf32, #tpu.memory_space<vmem>>, vector<9x32xf32>
    %cst = arith.constant 0.000000e+00 : f32
    %3 = vector.broadcast %cst : f32 to vector<296x32xf32>
    %4 = vector.extract_strided_slice %1 {offsets = [0, 0], sizes = [296, 1], strides = [1, 1]} : vector<336x1xf32> to vector<296x1xf32>
    %5 = vector.extract_strided_slice %2 {offsets = [0, 0], sizes = [1, 32], strides = [1, 1]} : vector<9x32xf32> to vector<1x32xf32>
    %6 = vector.broadcast %4 : vector<296x1xf32> to vector<296x32xf32>
    %7 = vector.broadcast %5 : vector<1x32xf32> to vector<296x32xf32>
    %8 = arith.mulf %6, %7 : vector<296x32xf32>
    %9 = arith.addf %3, %8 : vector<296x32xf32>
    %10 = vector.extract_strided_slice %1 {offsets = [1, 0], sizes = [296, 1], strides = [1, 1]} : vector<336x1xf32> to vector<296x1xf32>
    %11 = vector.extract_strided_slice %2 {offsets = [1, 0], sizes = [1, 32], strides = [1, 1]} : vector<9x32xf32> to vector<1x32xf32>
    %12 = vector.broadcast %10 : vector<296x1xf32> to vector<296x32xf32>
    %13 = vector.broadcast %11 : vector<1x32xf32> to vector<296x32xf32>
    %14 = arith.mulf %12, %13 : vector<296x32xf32>
    %15 = arith.addf %9, %14 : vector<296x32xf32>
    %16 = vector.extract_strided_slice %1 {offsets = [2, 0], sizes = [296, 1], strides = [1, 1]} : vector<336x1xf32> to vector<296x1xf32>
    %17 = vector.extract_strided_slice %2 {offsets = [2, 0], sizes = [1, 32], strides = [1, 1]} : vector<9x32xf32> to vector<1x32xf32>
    %18 = vector.broadcast %16 : vector<296x1xf32> to vector<296x32xf32>
    %19 = vector.broadcast %17 : vector<1x32xf32> to vector<296x32xf32>
    %20 = arith.mulf %18, %19 : vector<296x32xf32>
    %21 = arith.addf %15, %20 : vector<296x32xf32>
    %22 = vector.extract_strided_slice %1 {offsets = [18, 0], sizes = [296, 1], strides = [1, 1]} : vector<336x1xf32> to vector<296x1xf32>
    %23 = vector.extract_strided_slice %2 {offsets = [3, 0], sizes = [1, 32], strides = [1, 1]} : vector<9x32xf32> to vector<1x32xf32>
    %24 = vector.broadcast %22 : vector<296x1xf32> to vector<296x32xf32>
    %25 = vector.broadcast %23 : vector<1x32xf32> to vector<296x32xf32>
    %26 = arith.mulf %24, %25 : vector<296x32xf32>
    %27 = arith.addf %21, %26 : vector<296x32xf32>
    %28 = vector.extract_strided_slice %1 {offsets = [19, 0], sizes = [296, 1], strides = [1, 1]} : vector<336x1xf32> to vector<296x1xf32>
    %29 = vector.extract_strided_slice %2 {offsets = [4, 0], sizes = [1, 32], strides = [1, 1]} : vector<9x32xf32> to vector<1x32xf32>
    %30 = vector.broadcast %28 : vector<296x1xf32> to vector<296x32xf32>
    %31 = vector.broadcast %29 : vector<1x32xf32> to vector<296x32xf32>
    %32 = arith.mulf %30, %31 : vector<296x32xf32>
    %33 = arith.addf %27, %32 : vector<296x32xf32>
    %34 = vector.extract_strided_slice %1 {offsets = [20, 0], sizes = [296, 1], strides = [1, 1]} : vector<336x1xf32> to vector<296x1xf32>
    %35 = vector.extract_strided_slice %2 {offsets = [5, 0], sizes = [1, 32], strides = [1, 1]} : vector<9x32xf32> to vector<1x32xf32>
    %36 = vector.broadcast %34 : vector<296x1xf32> to vector<296x32xf32>
    %37 = vector.broadcast %35 : vector<1x32xf32> to vector<296x32xf32>
    %38 = arith.mulf %36, %37 : vector<296x32xf32>
    %39 = arith.addf %33, %38 : vector<296x32xf32>
    %40 = vector.extract_strided_slice %1 {offsets = [36, 0], sizes = [296, 1], strides = [1, 1]} : vector<336x1xf32> to vector<296x1xf32>
    %41 = vector.extract_strided_slice %2 {offsets = [6, 0], sizes = [1, 32], strides = [1, 1]} : vector<9x32xf32> to vector<1x32xf32>
    %42 = vector.broadcast %40 : vector<296x1xf32> to vector<296x32xf32>
    %43 = vector.broadcast %41 : vector<1x32xf32> to vector<296x32xf32>
    %44 = arith.mulf %42, %43 : vector<296x32xf32>
    %45 = arith.addf %39, %44 : vector<296x32xf32>
    %46 = vector.extract_strided_slice %1 {offsets = [37, 0], sizes = [296, 1], strides = [1, 1]} : vector<336x1xf32> to vector<296x1xf32>
    %47 = vector.extract_strided_slice %2 {offsets = [7, 0], sizes = [1, 32], strides = [1, 1]} : vector<9x32xf32> to vector<1x32xf32>
    %48 = vector.broadcast %46 : vector<296x1xf32> to vector<296x32xf32>
    %49 = vector.broadcast %47 : vector<1x32xf32> to vector<296x32xf32>
    %50 = arith.mulf %48, %49 : vector<296x32xf32>
    %51 = arith.addf %45, %50 : vector<296x32xf32>
    %52 = vector.extract_strided_slice %1 {offsets = [38, 0], sizes = [296, 1], strides = [1, 1]} : vector<336x1xf32> to vector<296x1xf32>
    %53 = vector.extract_strided_slice %2 {offsets = [8, 0], sizes = [1, 32], strides = [1, 1]} : vector<9x32xf32> to vector<1x32xf32>
    %54 = vector.broadcast %52 : vector<296x1xf32> to vector<296x32xf32>
    %55 = vector.broadcast %53 : vector<1x32xf32> to vector<296x32xf32>
    %56 = arith.mulf %54, %55 : vector<296x32xf32>
    %57 = arith.addf %51, %56 : vector<296x32xf32>
    %c0_4 = arith.constant 0 : index
    %c0_5 = arith.constant 0 : index
    %58 = vector.load %arg3[%c0_4, %c0_5] : memref<1x32xf32, #tpu.memory_space<vmem>>, vector<1x32xf32>
    %59 = vector.broadcast %58 : vector<1x32xf32> to vector<296x32xf32>
    %60 = arith.addf %57, %59 : vector<296x32xf32>
    %cst_6 = arith.constant 0.000000e+00 : f32
    %61 = vector.broadcast %cst_6 : f32 to vector<296x32xf32>
    %62 = arith.maximumf %60, %61 : vector<296x32xf32>
    %63 = vector.extract_strided_slice %62 {offsets = [0, 0], sizes = [272, 32], strides = [1, 1]} : vector<296x32xf32> to vector<272x32xf32>
    %64 = vector.extract_strided_slice %62 {offsets = [1, 0], sizes = [272, 32], strides = [1, 1]} : vector<296x32xf32> to vector<272x32xf32>
    %65 = arith.maximumf %63, %64 : vector<272x32xf32>
    %66 = vector.extract_strided_slice %62 {offsets = [18, 0], sizes = [272, 32], strides = [1, 1]} : vector<296x32xf32> to vector<272x32xf32>
    %67 = vector.extract_strided_slice %62 {offsets = [19, 0], sizes = [272, 32], strides = [1, 1]} : vector<296x32xf32> to vector<272x32xf32>
    %68 = arith.maximumf %66, %67 : vector<272x32xf32>
    %69 = arith.maximumf %65, %68 : vector<272x32xf32>
    %c0_7 = arith.constant 0 : index
    %c0_8 = arith.constant 0 : index
    %70 = vector.load %arg10[%c0_7, %c0_8] : memref<112x272xf32, #tpu.memory_space<vmem>>, vector<112x272xf32>
    %cst_9 = arith.constant dense<0.000000e+00> : vector<112x32xf32>
    %71 = tpu.matmul %70, %69, %cst_9 {dimension_numbers = #tpu.dot_dimension_numbers<[1], [0], [0], [1], [0, 0, 1, 1], [], []>} : vector<112x272xf32>, vector<272x32xf32>, vector<112x32xf32> -> vector<112x32xf32>
    %cst_10 = arith.constant 0.000000e+00 : f32
    %72 = vector.broadcast %cst_10 : f32 to vector<88x64xf32>
    %73 = vector.extract_strided_slice %71 {offsets = [0, 0], sizes = [88, 32], strides = [1, 1]} : vector<112x32xf32> to vector<88x32xf32>
    %74 = arith.truncf %73 : vector<88x32xf32> to vector<88x32xbf16>
    %c0_11 = arith.constant 0 : index
    %c0_12 = arith.constant 0 : index
    %c0_13 = arith.constant 0 : index
    %75 = vector.load %arg4[%c0_11, %c0_12, %c0_13] : memref<9x32x64xbf16, #tpu.memory_space<vmem>>, vector<1x32x64xbf16>
    %76 = vector.shape_cast %75 : vector<1x32x64xbf16> to vector<32x64xbf16>
    %cst_14 = arith.constant dense<0.000000e+00> : vector<88x64xf32>
    %77 = tpu.matmul %74, %76, %cst_14 {dimension_numbers = #tpu.dot_dimension_numbers<[1], [0], [0], [1], [0, 0, 1, 1], [], []>} : vector<88x32xbf16>, vector<32x64xbf16>, vector<88x64xf32> -> vector<88x64xf32>
    %78 = arith.addf %72, %77 : vector<88x64xf32>
    %79 = vector.extract_strided_slice %71 {offsets = [1, 0], sizes = [88, 32], strides = [1, 1]} : vector<112x32xf32> to vector<88x32xf32>
    %80 = arith.truncf %79 : vector<88x32xf32> to vector<88x32xbf16>
    %c1 = arith.constant 1 : index
    %c0_15 = arith.constant 0 : index
    %c0_16 = arith.constant 0 : index
    %81 = vector.load %arg4[%c1, %c0_15, %c0_16] : memref<9x32x64xbf16, #tpu.memory_space<vmem>>, vector<1x32x64xbf16>
    %82 = vector.shape_cast %81 : vector<1x32x64xbf16> to vector<32x64xbf16>
    %cst_17 = arith.constant dense<0.000000e+00> : vector<88x64xf32>
    %83 = tpu.matmul %80, %82, %cst_17 {dimension_numbers = #tpu.dot_dimension_numbers<[1], [0], [0], [1], [0, 0, 1, 1], [], []>} : vector<88x32xbf16>, vector<32x64xbf16>, vector<88x64xf32> -> vector<88x64xf32>
    %84 = arith.addf %78, %83 : vector<88x64xf32>
    %85 = vector.extract_strided_slice %71 {offsets = [2, 0], sizes = [88, 32], strides = [1, 1]} : vector<112x32xf32> to vector<88x32xf32>
    %86 = arith.truncf %85 : vector<88x32xf32> to vector<88x32xbf16>
    %c2 = arith.constant 2 : index
    %c0_18 = arith.constant 0 : index
    %c0_19 = arith.constant 0 : index
    %87 = vector.load %arg4[%c2, %c0_18, %c0_19] : memref<9x32x64xbf16, #tpu.memory_space<vmem>>, vector<1x32x64xbf16>
    %88 = vector.shape_cast %87 : vector<1x32x64xbf16> to vector<32x64xbf16>
    %cst_20 = arith.constant dense<0.000000e+00> : vector<88x64xf32>
    %89 = tpu.matmul %86, %88, %cst_20 {dimension_numbers = #tpu.dot_dimension_numbers<[1], [0], [0], [1], [0, 0, 1, 1], [], []>} : vector<88x32xbf16>, vector<32x64xbf16>, vector<88x64xf32> -> vector<88x64xf32>
    %90 = arith.addf %84, %89 : vector<88x64xf32>
    %91 = vector.extract_strided_slice %71 {offsets = [10, 0], sizes = [88, 32], strides = [1, 1]} : vector<112x32xf32> to vector<88x32xf32>
    %92 = arith.truncf %91 : vector<88x32xf32> to vector<88x32xbf16>
    %c3 = arith.constant 3 : index
    %c0_21 = arith.constant 0 : index
    %c0_22 = arith.constant 0 : index
    %93 = vector.load %arg4[%c3, %c0_21, %c0_22] : memref<9x32x64xbf16, #tpu.memory_space<vmem>>, vector<1x32x64xbf16>
    %94 = vector.shape_cast %93 : vector<1x32x64xbf16> to vector<32x64xbf16>
    %cst_23 = arith.constant dense<0.000000e+00> : vector<88x64xf32>
    %95 = tpu.matmul %92, %94, %cst_23 {dimension_numbers = #tpu.dot_dimension_numbers<[1], [0], [0], [1], [0, 0, 1, 1], [], []>} : vector<88x32xbf16>, vector<32x64xbf16>, vector<88x64xf32> -> vector<88x64xf32>
    %96 = arith.addf %90, %95 : vector<88x64xf32>
    %97 = vector.extract_strided_slice %71 {offsets = [11, 0], sizes = [88, 32], strides = [1, 1]} : vector<112x32xf32> to vector<88x32xf32>
    %98 = arith.truncf %97 : vector<88x32xf32> to vector<88x32xbf16>
    %c4 = arith.constant 4 : index
    %c0_24 = arith.constant 0 : index
    %c0_25 = arith.constant 0 : index
    %99 = vector.load %arg4[%c4, %c0_24, %c0_25] : memref<9x32x64xbf16, #tpu.memory_space<vmem>>, vector<1x32x64xbf16>
    %100 = vector.shape_cast %99 : vector<1x32x64xbf16> to vector<32x64xbf16>
    %cst_26 = arith.constant dense<0.000000e+00> : vector<88x64xf32>
    %101 = tpu.matmul %98, %100, %cst_26 {dimension_numbers = #tpu.dot_dimension_numbers<[1], [0], [0], [1], [0, 0, 1, 1], [], []>} : vector<88x32xbf16>, vector<32x64xbf16>, vector<88x64xf32> -> vector<88x64xf32>
    %102 = arith.addf %96, %101 : vector<88x64xf32>
    %103 = vector.extract_strided_slice %71 {offsets = [12, 0], sizes = [88, 32], strides = [1, 1]} : vector<112x32xf32> to vector<88x32xf32>
    %104 = arith.truncf %103 : vector<88x32xf32> to vector<88x32xbf16>
    %c5 = arith.constant 5 : index
    %c0_27 = arith.constant 0 : index
    %c0_28 = arith.constant 0 : index
    %105 = vector.load %arg4[%c5, %c0_27, %c0_28] : memref<9x32x64xbf16, #tpu.memory_space<vmem>>, vector<1x32x64xbf16>
    %106 = vector.shape_cast %105 : vector<1x32x64xbf16> to vector<32x64xbf16>
    %cst_29 = arith.constant dense<0.000000e+00> : vector<88x64xf32>
    %107 = tpu.matmul %104, %106, %cst_29 {dimension_numbers = #tpu.dot_dimension_numbers<[1], [0], [0], [1], [0, 0, 1, 1], [], []>} : vector<88x32xbf16>, vector<32x64xbf16>, vector<88x64xf32> -> vector<88x64xf32>
    %108 = arith.addf %102, %107 : vector<88x64xf32>
    %109 = vector.extract_strided_slice %71 {offsets = [20, 0], sizes = [88, 32], strides = [1, 1]} : vector<112x32xf32> to vector<88x32xf32>
    %110 = arith.truncf %109 : vector<88x32xf32> to vector<88x32xbf16>
    %c6 = arith.constant 6 : index
    %c0_30 = arith.constant 0 : index
    %c0_31 = arith.constant 0 : index
    %111 = vector.load %arg4[%c6, %c0_30, %c0_31] : memref<9x32x64xbf16, #tpu.memory_space<vmem>>, vector<1x32x64xbf16>
    %112 = vector.shape_cast %111 : vector<1x32x64xbf16> to vector<32x64xbf16>
    %cst_32 = arith.constant dense<0.000000e+00> : vector<88x64xf32>
    %113 = tpu.matmul %110, %112, %cst_32 {dimension_numbers = #tpu.dot_dimension_numbers<[1], [0], [0], [1], [0, 0, 1, 1], [], []>} : vector<88x32xbf16>, vector<32x64xbf16>, vector<88x64xf32> -> vector<88x64xf32>
    %114 = arith.addf %108, %113 : vector<88x64xf32>
    %115 = vector.extract_strided_slice %71 {offsets = [21, 0], sizes = [88, 32], strides = [1, 1]} : vector<112x32xf32> to vector<88x32xf32>
    %116 = arith.truncf %115 : vector<88x32xf32> to vector<88x32xbf16>
    %c7 = arith.constant 7 : index
    %c0_33 = arith.constant 0 : index
    %c0_34 = arith.constant 0 : index
    %117 = vector.load %arg4[%c7, %c0_33, %c0_34] : memref<9x32x64xbf16, #tpu.memory_space<vmem>>, vector<1x32x64xbf16>
    %118 = vector.shape_cast %117 : vector<1x32x64xbf16> to vector<32x64xbf16>
    %cst_35 = arith.constant dense<0.000000e+00> : vector<88x64xf32>
    %119 = tpu.matmul %116, %118, %cst_35 {dimension_numbers = #tpu.dot_dimension_numbers<[1], [0], [0], [1], [0, 0, 1, 1], [], []>} : vector<88x32xbf16>, vector<32x64xbf16>, vector<88x64xf32> -> vector<88x64xf32>
    %120 = arith.addf %114, %119 : vector<88x64xf32>
    %121 = vector.extract_strided_slice %71 {offsets = [22, 0], sizes = [88, 32], strides = [1, 1]} : vector<112x32xf32> to vector<88x32xf32>
    %122 = arith.truncf %121 : vector<88x32xf32> to vector<88x32xbf16>
    %c8 = arith.constant 8 : index
    %c0_36 = arith.constant 0 : index
    %c0_37 = arith.constant 0 : index
    %123 = vector.load %arg4[%c8, %c0_36, %c0_37] : memref<9x32x64xbf16, #tpu.memory_space<vmem>>, vector<1x32x64xbf16>
    %124 = vector.shape_cast %123 : vector<1x32x64xbf16> to vector<32x64xbf16>
    %cst_38 = arith.constant dense<0.000000e+00> : vector<88x64xf32>
    %125 = tpu.matmul %122, %124, %cst_38 {dimension_numbers = #tpu.dot_dimension_numbers<[1], [0], [0], [1], [0, 0, 1, 1], [], []>} : vector<88x32xbf16>, vector<32x64xbf16>, vector<88x64xf32> -> vector<88x64xf32>
    %126 = arith.addf %120, %125 : vector<88x64xf32>
    %c0_39 = arith.constant 0 : index
    %c0_40 = arith.constant 0 : index
    %127 = vector.load %arg5[%c0_39, %c0_40] : memref<1x64xf32, #tpu.memory_space<vmem>>, vector<1x64xf32>
    %128 = vector.broadcast %127 : vector<1x64xf32> to vector<88x64xf32>
    %129 = arith.addf %126, %128 : vector<88x64xf32>
    %cst_41 = arith.constant 0.000000e+00 : f32
    %130 = vector.broadcast %cst_41 : f32 to vector<88x64xf32>
    %131 = arith.maximumf %129, %130 : vector<88x64xf32>
    %132 = vector.extract_strided_slice %131 {offsets = [0, 0], sizes = [72, 64], strides = [1, 1]} : vector<88x64xf32> to vector<72x64xf32>
    %133 = vector.extract_strided_slice %131 {offsets = [1, 0], sizes = [72, 64], strides = [1, 1]} : vector<88x64xf32> to vector<72x64xf32>
    %134 = arith.maximumf %132, %133 : vector<72x64xf32>
    %135 = vector.extract_strided_slice %131 {offsets = [10, 0], sizes = [72, 64], strides = [1, 1]} : vector<88x64xf32> to vector<72x64xf32>
    %136 = vector.extract_strided_slice %131 {offsets = [11, 0], sizes = [72, 64], strides = [1, 1]} : vector<88x64xf32> to vector<72x64xf32>
    %137 = arith.maximumf %135, %136 : vector<72x64xf32>
    %138 = arith.maximumf %134, %137 : vector<72x64xf32>
    %c0_42 = arith.constant 0 : index
    %c0_43 = arith.constant 0 : index
    %139 = vector.load %arg11[%c0_42, %c0_43] : memref<40x72xf32, #tpu.memory_space<vmem>>, vector<40x72xf32>
    %cst_44 = arith.constant dense<0.000000e+00> : vector<40x64xf32>
    %140 = tpu.matmul %139, %138, %cst_44 {dimension_numbers = #tpu.dot_dimension_numbers<[1], [0], [0], [1], [0, 0, 1, 1], [], []>} : vector<40x72xf32>, vector<72x64xf32>, vector<40x64xf32> -> vector<40x64xf32>
    %cst_45 = arith.constant 0.000000e+00 : f32
    %141 = vector.broadcast %cst_45 : f32 to vector<24x128xf32>
    %142 = vector.extract_strided_slice %140 {offsets = [0, 0], sizes = [24, 64], strides = [1, 1]} : vector<40x64xf32> to vector<24x64xf32>
    %143 = arith.truncf %142 : vector<24x64xf32> to vector<24x64xbf16>
    %c0_46 = arith.constant 0 : index
    %c0_47 = arith.constant 0 : index
    %c0_48 = arith.constant 0 : index
    %144 = vector.load %arg6[%c0_46, %c0_47, %c0_48] : memref<9x64x128xbf16, #tpu.memory_space<vmem>>, vector<1x64x128xbf16>
    %145 = vector.shape_cast %144 : vector<1x64x128xbf16> to vector<64x128xbf16>
    %cst_49 = arith.constant dense<0.000000e+00> : vector<24x128xf32>
    %146 = tpu.matmul %143, %145, %cst_49 {dimension_numbers = #tpu.dot_dimension_numbers<[1], [0], [0], [1], [0, 0, 1, 1], [], []>} : vector<24x64xbf16>, vector<64x128xbf16>, vector<24x128xf32> -> vector<24x128xf32>
    %147 = arith.addf %141, %146 : vector<24x128xf32>
    %148 = vector.extract_strided_slice %140 {offsets = [1, 0], sizes = [24, 64], strides = [1, 1]} : vector<40x64xf32> to vector<24x64xf32>
    %149 = arith.truncf %148 : vector<24x64xf32> to vector<24x64xbf16>
    %c1_50 = arith.constant 1 : index
    %c0_51 = arith.constant 0 : index
    %c0_52 = arith.constant 0 : index
    %150 = vector.load %arg6[%c1_50, %c0_51, %c0_52] : memref<9x64x128xbf16, #tpu.memory_space<vmem>>, vector<1x64x128xbf16>
    %151 = vector.shape_cast %150 : vector<1x64x128xbf16> to vector<64x128xbf16>
    %cst_53 = arith.constant dense<0.000000e+00> : vector<24x128xf32>
    %152 = tpu.matmul %149, %151, %cst_53 {dimension_numbers = #tpu.dot_dimension_numbers<[1], [0], [0], [1], [0, 0, 1, 1], [], []>} : vector<24x64xbf16>, vector<64x128xbf16>, vector<24x128xf32> -> vector<24x128xf32>
    %153 = arith.addf %147, %152 : vector<24x128xf32>
    %154 = vector.extract_strided_slice %140 {offsets = [2, 0], sizes = [24, 64], strides = [1, 1]} : vector<40x64xf32> to vector<24x64xf32>
    %155 = arith.truncf %154 : vector<24x64xf32> to vector<24x64xbf16>
    %c2_54 = arith.constant 2 : index
    %c0_55 = arith.constant 0 : index
    %c0_56 = arith.constant 0 : index
    %156 = vector.load %arg6[%c2_54, %c0_55, %c0_56] : memref<9x64x128xbf16, #tpu.memory_space<vmem>>, vector<1x64x128xbf16>
    %157 = vector.shape_cast %156 : vector<1x64x128xbf16> to vector<64x128xbf16>
    %cst_57 = arith.constant dense<0.000000e+00> : vector<24x128xf32>
    %158 = tpu.matmul %155, %157, %cst_57 {dimension_numbers = #tpu.dot_dimension_numbers<[1], [0], [0], [1], [0, 0, 1, 1], [], []>} : vector<24x64xbf16>, vector<64x128xbf16>, vector<24x128xf32> -> vector<24x128xf32>
    %159 = arith.addf %153, %158 : vector<24x128xf32>
    %160 = vector.extract_strided_slice %140 {offsets = [6, 0], sizes = [24, 64], strides = [1, 1]} : vector<40x64xf32> to vector<24x64xf32>
    %161 = arith.truncf %160 : vector<24x64xf32> to vector<24x64xbf16>
    %c3_58 = arith.constant 3 : index
    %c0_59 = arith.constant 0 : index
    %c0_60 = arith.constant 0 : index
    %162 = vector.load %arg6[%c3_58, %c0_59, %c0_60] : memref<9x64x128xbf16, #tpu.memory_space<vmem>>, vector<1x64x128xbf16>
    %163 = vector.shape_cast %162 : vector<1x64x128xbf16> to vector<64x128xbf16>
    %cst_61 = arith.constant dense<0.000000e+00> : vector<24x128xf32>
    %164 = tpu.matmul %161, %163, %cst_61 {dimension_numbers = #tpu.dot_dimension_numbers<[1], [0], [0], [1], [0, 0, 1, 1], [], []>} : vector<24x64xbf16>, vector<64x128xbf16>, vector<24x128xf32> -> vector<24x128xf32>
    %165 = arith.addf %159, %164 : vector<24x128xf32>
    %166 = vector.extract_strided_slice %140 {offsets = [7, 0], sizes = [24, 64], strides = [1, 1]} : vector<40x64xf32> to vector<24x64xf32>
    %167 = arith.truncf %166 : vector<24x64xf32> to vector<24x64xbf16>
    %c4_62 = arith.constant 4 : index
    %c0_63 = arith.constant 0 : index
    %c0_64 = arith.constant 0 : index
    %168 = vector.load %arg6[%c4_62, %c0_63, %c0_64] : memref<9x64x128xbf16, #tpu.memory_space<vmem>>, vector<1x64x128xbf16>
    %169 = vector.shape_cast %168 : vector<1x64x128xbf16> to vector<64x128xbf16>
    %cst_65 = arith.constant dense<0.000000e+00> : vector<24x128xf32>
    %170 = tpu.matmul %167, %169, %cst_65 {dimension_numbers = #tpu.dot_dimension_numbers<[1], [0], [0], [1], [0, 0, 1, 1], [], []>} : vector<24x64xbf16>, vector<64x128xbf16>, vector<24x128xf32> -> vector<24x128xf32>
    %171 = arith.addf %165, %170 : vector<24x128xf32>
    %172 = vector.extract_strided_slice %140 {offsets = [8, 0], sizes = [24, 64], strides = [1, 1]} : vector<40x64xf32> to vector<24x64xf32>
    %173 = arith.truncf %172 : vector<24x64xf32> to vector<24x64xbf16>
    %c5_66 = arith.constant 5 : index
    %c0_67 = arith.constant 0 : index
    %c0_68 = arith.constant 0 : index
    %174 = vector.load %arg6[%c5_66, %c0_67, %c0_68] : memref<9x64x128xbf16, #tpu.memory_space<vmem>>, vector<1x64x128xbf16>
    %175 = vector.shape_cast %174 : vector<1x64x128xbf16> to vector<64x128xbf16>
    %cst_69 = arith.constant dense<0.000000e+00> : vector<24x128xf32>
    %176 = tpu.matmul %173, %175, %cst_69 {dimension_numbers = #tpu.dot_dimension_numbers<[1], [0], [0], [1], [0, 0, 1, 1], [], []>} : vector<24x64xbf16>, vector<64x128xbf16>, vector<24x128xf32> -> vector<24x128xf32>
    %177 = arith.addf %171, %176 : vector<24x128xf32>
    %178 = vector.extract_strided_slice %140 {offsets = [12, 0], sizes = [24, 64], strides = [1, 1]} : vector<40x64xf32> to vector<24x64xf32>
    %179 = arith.truncf %178 : vector<24x64xf32> to vector<24x64xbf16>
    %c6_70 = arith.constant 6 : index
    %c0_71 = arith.constant 0 : index
    %c0_72 = arith.constant 0 : index
    %180 = vector.load %arg6[%c6_70, %c0_71, %c0_72] : memref<9x64x128xbf16, #tpu.memory_space<vmem>>, vector<1x64x128xbf16>
    %181 = vector.shape_cast %180 : vector<1x64x128xbf16> to vector<64x128xbf16>
    %cst_73 = arith.constant dense<0.000000e+00> : vector<24x128xf32>
    %182 = tpu.matmul %179, %181, %cst_73 {dimension_numbers = #tpu.dot_dimension_numbers<[1], [0], [0], [1], [0, 0, 1, 1], [], []>} : vector<24x64xbf16>, vector<64x128xbf16>, vector<24x128xf32> -> vector<24x128xf32>
    %183 = arith.addf %177, %182 : vector<24x128xf32>
    %184 = vector.extract_strided_slice %140 {offsets = [13, 0], sizes = [24, 64], strides = [1, 1]} : vector<40x64xf32> to vector<24x64xf32>
    %185 = arith.truncf %184 : vector<24x64xf32> to vector<24x64xbf16>
    %c7_74 = arith.constant 7 : index
    %c0_75 = arith.constant 0 : index
    %c0_76 = arith.constant 0 : index
    %186 = vector.load %arg6[%c7_74, %c0_75, %c0_76] : memref<9x64x128xbf16, #tpu.memory_space<vmem>>, vector<1x64x128xbf16>
    %187 = vector.shape_cast %186 : vector<1x64x128xbf16> to vector<64x128xbf16>
    %cst_77 = arith.constant dense<0.000000e+00> : vector<24x128xf32>
    %188 = tpu.matmul %185, %187, %cst_77 {dimension_numbers = #tpu.dot_dimension_numbers<[1], [0], [0], [1], [0, 0, 1, 1], [], []>} : vector<24x64xbf16>, vector<64x128xbf16>, vector<24x128xf32> -> vector<24x128xf32>
    %189 = arith.addf %183, %188 : vector<24x128xf32>
    %190 = vector.extract_strided_slice %140 {offsets = [14, 0], sizes = [24, 64], strides = [1, 1]} : vector<40x64xf32> to vector<24x64xf32>
    %191 = arith.truncf %190 : vector<24x64xf32> to vector<24x64xbf16>
    %c8_78 = arith.constant 8 : index
    %c0_79 = arith.constant 0 : index
    %c0_80 = arith.constant 0 : index
    %192 = vector.load %arg6[%c8_78, %c0_79, %c0_80] : memref<9x64x128xbf16, #tpu.memory_space<vmem>>, vector<1x64x128xbf16>
    %193 = vector.shape_cast %192 : vector<1x64x128xbf16> to vector<64x128xbf16>
    %cst_81 = arith.constant dense<0.000000e+00> : vector<24x128xf32>
    %194 = tpu.matmul %191, %193, %cst_81 {dimension_numbers = #tpu.dot_dimension_numbers<[1], [0], [0], [1], [0, 0, 1, 1], [], []>} : vector<24x64xbf16>, vector<64x128xbf16>, vector<24x128xf32> -> vector<24x128xf32>
    %195 = arith.addf %189, %194 : vector<24x128xf32>
    %c0_82 = arith.constant 0 : index
    %c0_83 = arith.constant 0 : index
    %196 = vector.load %arg7[%c0_82, %c0_83] : memref<1x128xf32, #tpu.memory_space<vmem>>, vector<1x128xf32>
    %197 = vector.broadcast %196 : vector<1x128xf32> to vector<24x128xf32>
    %198 = arith.addf %195, %197 : vector<24x128xf32>
    %cst_84 = arith.constant 0.000000e+00 : f32
    %199 = vector.broadcast %cst_84 : f32 to vector<24x128xf32>
    %200 = arith.maximumf %198, %199 : vector<24x128xf32>
    %c0_85 = arith.constant 0 : index
    %c0_86 = arith.constant 0 : index
    %201 = vector.load %arg12[%c0_85, %c0_86] : memref<24x1xf32, #tpu.memory_space<vmem>>, vector<24x1xf32>
    %202 = vector.broadcast %201 : vector<24x1xf32> to vector<24x128xf32>
    %203 = arith.mulf %200, %202 : vector<24x128xf32>
    %cst_87 = arith.constant dense<0.000000e+00> : vector<128xf32>
    %204 = vector.multi_reduction <add>, %203, %cst_87 [0] : vector<24x128xf32> to vector<128xf32>
    %205 = vector.shape_cast %204 : vector<128xf32> to vector<1x128xf32>
    %cst_88 = arith.constant 6.250000e-02 : f32
    %206 = vector.broadcast %cst_88 : f32 to vector<1x128xf32>
    %207 = arith.mulf %205, %206 : vector<1x128xf32>
    %c0_89 = arith.constant 0 : index
    %c0_90 = arith.constant 0 : index
    %208 = vector.load %arg8[%c0_89, %c0_90] : memref<128x64xf32, #tpu.memory_space<vmem>>, vector<128x64xf32>
    %cst_91 = arith.constant dense<0.000000e+00> : vector<1x64xf32>
    %209 = tpu.matmul %207, %208, %cst_91 {dimension_numbers = #tpu.dot_dimension_numbers<[1], [0], [0], [1], [0, 0, 1, 1], [], []>} : vector<1x128xf32>, vector<128x64xf32>, vector<1x64xf32> -> vector<1x64xf32>
    %c0_92 = arith.constant 0 : index
    %c0_93 = arith.constant 0 : index
    %210 = vector.load %arg9[%c0_92, %c0_93] : memref<1x64xf32, #tpu.memory_space<vmem>>, vector<1x64xf32>
    %211 = arith.addf %209, %210 : vector<1x64xf32>
    %212 = arith.mulf %211, %211 : vector<1x64xf32>
    %cst_94 = arith.constant dense<0.000000e+00> : vector<1xf32>
    %213 = vector.multi_reduction <add>, %212, %cst_94 [1] : vector<1x64xf32> to vector<1xf32>
    %214 = vector.shape_cast %213 : vector<1xf32> to vector<1x1xf32>
    %cst_95 = arith.constant 1.000000e-24 : f32
    %215 = vector.broadcast %cst_95 : f32 to vector<1x1xf32>
    %216 = arith.maximumf %214, %215 : vector<1x1xf32>
    %217 = math.rsqrt %216 : vector<1x1xf32>
    %218 = vector.broadcast %217 : vector<1x1xf32> to vector<1x64xf32>
    %219 = arith.mulf %211, %218 : vector<1x64xf32>
    %220 = vector.shape_cast %219 : vector<1x64xf32> to vector<1x1x64xf32>
    %c0_96 = arith.constant 0 : index
    %c0_97 = arith.constant 0 : index
    %c0_98 = arith.constant 0 : index
    %221 = vector.load %arg13[%c0_96, %c0_97, %c0_98] : memref<1x1x64xf32, #tpu.memory_space<vmem>>, vector<1x1x64xf32>
    tpu.vector_store %arg13[%c0_96, %c0_97, %c0_98], %220 {strides = array<i32>} : memref<1x1x64xf32, #tpu.memory_space<vmem>>, vector<1x1x64xf32>,
    return
  }
  func.func @transform_0(%arg0: i32) -> (i32, i32, i32) {
    %c0_i32 = arith.constant 0 : i32
    %c0_i32_0 = arith.constant 0 : i32
    %c0_i32_1 = arith.constant 0 : i32
    return %arg0, %c0_i32, %c0_i32_0 : i32, i32, i32
  }
  func.func @transform_1(%arg0: i32) -> (i32, i32) {
    %c0_i32 = arith.constant 0 : i32
    %c0_i32_0 = arith.constant 0 : i32
    %c0_i32_1 = arith.constant 0 : i32
    return %c0_i32, %c0_i32_0 : i32, i32
  }
  func.func @transform_2(%arg0: i32) -> (i32, i32) {
    %c0_i32 = arith.constant 0 : i32
    %c0_i32_0 = arith.constant 0 : i32
    %c0_i32_1 = arith.constant 0 : i32
    return %c0_i32, %c0_i32_0 : i32, i32
  }
  func.func @transform_3(%arg0: i32) -> (i32, i32, i32) {
    %c0_i32 = arith.constant 0 : i32
    %c0_i32_0 = arith.constant 0 : i32
    %c0_i32_1 = arith.constant 0 : i32
    %c0_i32_2 = arith.constant 0 : i32
    return %c0_i32, %c0_i32_0, %c0_i32_1 : i32, i32, i32
  }
  func.func @transform_4(%arg0: i32) -> (i32, i32) {
    %c0_i32 = arith.constant 0 : i32
    %c0_i32_0 = arith.constant 0 : i32
    %c0_i32_1 = arith.constant 0 : i32
    return %c0_i32, %c0_i32_0 : i32, i32
  }
  func.func @transform_5(%arg0: i32) -> (i32, i32, i32) {
    %c0_i32 = arith.constant 0 : i32
    %c0_i32_0 = arith.constant 0 : i32
    %c0_i32_1 = arith.constant 0 : i32
    %c0_i32_2 = arith.constant 0 : i32
    return %c0_i32, %c0_i32_0, %c0_i32_1 : i32, i32, i32
  }
  func.func @transform_6(%arg0: i32) -> (i32, i32) {
    %c0_i32 = arith.constant 0 : i32
    %c0_i32_0 = arith.constant 0 : i32
    %c0_i32_1 = arith.constant 0 : i32
    return %c0_i32, %c0_i32_0 : i32, i32
  }
  func.func @transform_7(%arg0: i32) -> (i32, i32) {
    %c0_i32 = arith.constant 0 : i32
    %c0_i32_0 = arith.constant 0 : i32
    %c0_i32_1 = arith.constant 0 : i32
    return %c0_i32, %c0_i32_0 : i32, i32
  }
  func.func @transform_8(%arg0: i32) -> (i32, i32) {
    %c0_i32 = arith.constant 0 : i32
    %c0_i32_0 = arith.constant 0 : i32
    %c0_i32_1 = arith.constant 0 : i32
    return %c0_i32, %c0_i32_0 : i32, i32
  }
  func.func @transform_9(%arg0: i32) -> (i32, i32) {
    %c0_i32 = arith.constant 0 : i32
    %c0_i32_0 = arith.constant 0 : i32
    %c0_i32_1 = arith.constant 0 : i32
    return %c0_i32, %c0_i32_0 : i32, i32
  }
  func.func @transform_10(%arg0: i32) -> (i32, i32) {
    %c0_i32 = arith.constant 0 : i32
    %c0_i32_0 = arith.constant 0 : i32
    %c0_i32_1 = arith.constant 0 : i32
    return %c0_i32, %c0_i32_0 : i32, i32
  }
  func.func @transform_11(%arg0: i32) -> (i32, i32) {
    %c0_i32 = arith.constant 0 : i32
    %c0_i32_0 = arith.constant 0 : i32
    %c0_i32_1 = arith.constant 0 : i32
    return %c0_i32, %c0_i32_0 : i32, i32
  }
  func.func @transform_12(%arg0: i32) -> (i32, i32, i32) {
    %c0_i32 = arith.constant 0 : i32
    %c0_i32_0 = arith.constant 0 : i32
    %c0_i32_1 = arith.constant 0 : i32
    return %arg0, %c0_i32, %c0_i32_0 : i32, i32, i32
  }
}

</mosaic_0001>

<bundles_post_ra>
// kernel: mfcc_embedding_net.1
= control target key start
LH: loop header
LB: loop body
LE: loop exit
PB: predicated region body
PF: predicated region fallthrough
CT: control target
= control target key end

     0   :  { %s11391_s0 = inlined_call_operand.vmem [shape: f32[2,336,1], index: 0, kind: input, shape index: {}]   ;;  %s11392_s1 = inlined_call_operand.vmem [shape: f32[9,32], index: 1, kind: input, shape index: {}]   ;;  %s11393_s2 = inlined_call_operand.vmem [shape: f32[1,32], index: 2, kind: input, shape index: {}]   ;;  %s11394_s3 = inlined_call_operand.vmem [shape: bf16[9,32,64], index: 3, kind: input, shape index: {}]   ;;  %s11395_s4 = inlined_call_operand.vmem [shape: f32[1,64], index: 4, kind: input, shape index: {}]   ;;  %s11396_s5 = inlined_call_operand.vmem [shape: bf16[9,64,128], index: 5, kind: input, shape index: {}]   ;;  %s11397_s6 = inlined_call_operand.vmem [shape: f32[1,128], index: 6, kind: input, shape index: {}]   ;;  %s11398_s7 = inlined_call_operand.vmem [shape: f32[128,64], index: 7, kind: input, shape index: {}]   ;;  %s11399_s8 = inlined_call_operand.vmem [shape: f32[1,64], index: 8, kind: input, shape index: {}]   ;;  %s11400_s9 = inlined_call_operand.vmem [shape: f32[112,272], index: 9, kind: input, shape index: {}]   ;;  %s11401_s10 = inlined_call_operand.vmem [shape: f32[40,72], index: 10, kind: input, shape index: {}]   ;;  %s11402_s11 = inlined_call_operand.vmem [shape: f32[24,1], index: 11, kind: input, shape index: {}]   ;;  %s11403_s12 = inlined_call_operand.hbm [shape: f32[2,1,64], index: 12, kind: output, shape index: {}]  }
   0x1   :  { %11720 = sst [smem:[#allocation200_spill]] %s11391_s0 }
   0x2   :  { %11721 = sst [smem:[#allocation201_spill]] %s11392_s1 }
   0x3   :  { %17 = vsyncpa [#allocation3], 0 }
   0x4   :  { %19 = vsyncpa [#allocation3 + $0x1], 0  ;;  %s7229_s21 = smov 0   ;;  %s7231_s22 = smov 0  }
   0x5   :  { %s7233_s23 = smov 0   ;;  %s7235_s24 = smov 0  }
   0x6 LB: > { %s7250_s25 = sadd.s32 4294967295, %s7157_s24   ;;  %s6009_s26 = sadd.s32 4294967294, %s7157_s24   ;;  %s7157_s24 = sphi %s7235_s24, %s12630_s24   ;;  %s7153_s23 = sphi %s7233_s23, %s12629_s23   ;;  %s7149_s22 = sphi %s7231_s22, %s12628_s22   ;;  %s7145_s21 = sphi %s7229_s21, %s12627_s21  }
   0x7   : > { %s7254_s27 = sadd.s32 1, %s7157_s24   ;;  %s289_s28 = sadd.s32 1, %s7153_s23 }
   0x8   : > { %s286_s29 = ssub.s32 %s7157_s24, %s7254_s27  ;;  %p299_p0 = scmp.ne.s32.totalorder %s7153_s23, %s7149_s22 }
   0x9   : > { %p287_p1 = scmp.eq.s32.totalorder %s286_s29, 0  ;;  %p300_p2 = scmp.eq.s32.totalorder %s7250_s25, 1 }
   0xa   : > { %p305_p3 = scmp.ne.s32.totalorder %s7149_s22, %s7145_s21  ;;  %p306_p4 = scmp.eq.s32.totalorder %s6009_s26, 1 }
   0xb   : > { %s7265_s30 = scalar_select %p287_p1, %s7153_s23, %s289_s28  }
   0xc   : > { %p7267_p5 = por %p300_p2, %p299_p0  ;;  %p7271_p6 = por %p306_p4, %p305_p3 }
   0xd   : > { %p6012_p7 = scmp.ge.s32.totalorder %s7157_s24, 1  ;;  %p365_p8 = scmp.lt.s32.totalorder %s7157_s24, 3 }
   0xf   : > { %p366_p9 = pnand %p6012_p7, %p365_p8 }
  0x11   : > { %369 = sbr.rel (%p366_p9) target bundleno = 2313 (0x909), region = 68 }
  0x18   : > { %p406_p10 = scmp.lt.s32.totalorder %s7250_s25, 1  ;;  %v7159_v0 = vmov 0   ;;  %s11724_s0 = sld [smem:[#allocation200_spill]]  ;;  %v5816_v43 = vld [vmem:[%s11402_s11 + $0x8] sm:$0xff]  ;;  %v5815_v44 = vld [vmem:[%s11402_s11] sm:$0xff]  ;;  %v5817_v45 = vld [vmem:[%s11402_s11 + $0x10] sm:$0xff]  ;;  %v641_v46 = vlaneseq }
  0x19   : > { %7035 = vset.pattern.permute.xlu1 %v7159_v0  ;;  %7034 = vset.pattern.permute.xlu0 %v7159_v0  ;;  %s11725_s1 = sld [smem:[#allocation201_spill]]  ;;  %vm804_vm0 = vcmask 1046528   ;;  %vm1034_vm1 = vcmask 1045504   ;;  %vm1503_vm2 = vcmask 1044480   ;;  %vm1733_vm3 = vcmask 1043456   ;;  %s6259_s26 = sshll.u32 %s7250_s25, 4 }
  0x1a   : > { %s407_s15 = scalar_select %p406_p10, %s7250_s25, 1  ;;  %v642_v47 = vshrl.u32 %v641_v46, 7  ;;  %vm2202_vm4 = vcmask 1042432   ;;  %vm2432_vm5 = vcmask 1041408   ;;  %vm3061_vm6 = vcmask 130048  }
  0x1b   : > { %vm3390_vm7 = vsmask.f32 7424  ;;  %vm3450_vm8 = vcmask 261120   ;;  %vm3952_vm9 = vsmask.f32 6400  ;;  %vm7161_vm11 = vmmov 0   ;;  %s11349_s17 = scalar_lea.hbm %s11403_s12, %s6259_s26 }
  0x1c   : > { %s6990_s16 = smul.u32 336, %s407_s15  ;;  %v726_v48 = vsub.s32 1, %v642_v47  ;;  %v956_v49 = vsub.s32 2, %v642_v47  ;;  %v1895_v50 = vsub.s32 6, %v642_v47  ;;  %v2124_v52 = vsub.s32 7, %v642_v47  ;;  %s7163_s25 = smov [#allocation2]  }
  0x1d   : > { %v643_v53 = vsub.s32 0, %v642_v47  ;;  %v1196_v54 = vsub.s32 3, %v642_v47  ;;  %v1425_v58 = vsub.s32 4, %v642_v47  ;;  %v1655_v60 = vsub.s32 5, %v642_v47  ;;  %s7099_s20 = sshll.u32 %s7163_s25, 4  ;;  %s7100_s20 = int_to_ptr.vmem [resolvable:$false] %s7099_s20 }
  0x1e   : > { %s7282_s19 = scalar_lea.vmem %s11724_s0, %s6990_s16  ;;  %vm4409_vm10 = vsmask.f32 5376  ;;  %vm4832_vm12 = vcmask 588800   ;;  %vm4997_vm13 = vcmask 523264   ;;  %vm5326_vm14 = vsmask.f32 4352 }
  0x1f   : > { %v432_v1 = vld [vmem:[%s7282_s19 + $0xa0] sm:$0xff]  ;;  %v430_v2 = vld [vmem:[%s7282_s19 + $0x90] sm:$0xff]  ;;  %v433_v3 = vld [vmem:[%s7282_s19 + $0xa8] sm:$0xff]  ;;  %vm5933_vm15 = vcmask 516096   ;;  %s404_s0 = sand.u32 1, %s7149_s22  }
  0x20   : > { %558 = vperm.xlu1 %7035, %v432_v1   ;;  %548 = vperm.xlu0 %7034, %v430_v2   ;;  %v431_v4 = vld [vmem:[%s7282_s19 + $0x98] sm:$0xff]  ;;  %v434_v5 = vld [vmem:[%s7282_s19 + $0xb0] sm:$0xff]  ;;  %v416_v8 = vld [vmem:[%s7282_s19 + $0x20] sm:$0xff]  ;;  %s405_s28 = scalar_lea.vmem [#allocation2], %s404_s0  ;;  %s5942_s18 = scalar_lea.sflag [#allocation3], %s404_s0 }
  0x21   : > { %v414_v6 = vld [vmem:[%s7282_s19 + $0x10] sm:$0xff]  ;;  %v415_v7 = vld [vmem:[%s7282_s19 + $0x18] sm:$0xff]  ;;  %v417_v9 = vld [vmem:[%s7282_s19 + $0x28] sm:$0xff]  ;;  %s5954_s29 = sshll.u32 %s405_s28, 4  ;;  %s11351_s29 = int_to_ptr.vmem [resolvable:$true] %s5954_s29 }
  0x22   : > { %v418_v10 = vld [vmem:[%s7282_s19 + $0x30] sm:$0xff]  ;;  %v428_v11 = vld [vmem:[%s7282_s19 + $0x80] sm:$0xff]  ;;  %v429_v12 = vld [vmem:[%s7282_s19 + $0x88] sm:$0xff]  ;;  %p7102_p0 = scmp.lt.s32.totalorder %s11351_s29, %s7100_s20 }
  0x23   : > { %v413_v13 = vld [vmem:[%s7282_s19 + $0x8] sm:$0xff]  ;;  %v412_v14 = vld [vmem:[%s7282_s19] sm:$0xff]  ;;  %v435_v16 = vld [vmem:[%s7282_s19 + $0xb8] sm:$0xff] }
  0x24   : > { %563 = vperm.xlu1 %7035, %v433_v3   ;;  %553 = vperm.xlu0 %7034, %v431_v4   ;;  %v436_v15 = vld [vmem:[%s7282_s19 + $0xc0] sm:$0xff]  ;;  %v419_v18 = vld [vmem:[%s7282_s19 + $0x38] sm:$0xff]  ;;  %v438_v19 = vld [vmem:[%s7282_s19 + $0xd0] sm:$0xff] }
  0x25   : > { %v420_v17 = vld [vmem:[%s7282_s19 + $0x40] sm:$0xff]  ;;  %v437_v20 = vld [vmem:[%s7282_s19 + $0xc8] sm:$0xff]  ;;  %v422_v21 = vld [vmem:[%s7282_s19 + $0x50] sm:$0xff] }
  0x26   : > { %v421_v22 = vld [vmem:[%s7282_s19 + $0x48] sm:$0xff]  ;;  %v440_v23 = vld [vmem:[%s7282_s19 + $0xe0] sm:$0xff]  ;;  %v439_v24 = vld [vmem:[%s7282_s19 + $0xd8] sm:$0xff] }
  0x27   : > { %v424_v25 = vld [vmem:[%s7282_s19 + $0x60] sm:$0xff]  ;;  %v423_v26 = vld [vmem:[%s7282_s19 + $0x58] sm:$0xff]  ;;  %v442_v27 = vld [vmem:[%s7282_s19 + $0xf0] sm:$0xff] }
  0x28   : > { %568 = vperm.xlu0 %7034, %v434_v5   ;;  %468 = vperm.xlu1 %7035, %v414_v6   ;;  %v441_v28 = vld [vmem:[%s7282_s19 + $0xe8] sm:$0xff]  ;;  %v426_v29 = vld [vmem:[%s7282_s19 + $0x70] sm:$0xff]  ;;  %v444_v31 = vld [vmem:[%s7282_s19 + $0x100] sm:$0xff] }
  0x29   : > { %v425_v30 = vld [vmem:[%s7282_s19 + $0x68] sm:$0xff]  ;;  %v443_v32 = vld [vmem:[%s7282_s19 + $0xf8] sm:$0xff]  ;;  %v446_v36 = vld [vmem:[%s7282_s19 + $0x110] sm:$0xff] }
  0x2a   : > { %v445_v33 = vld [vmem:[%s7282_s19 + $0x108] sm:$0xff]  ;;  %v427_v34 = vld [vmem:[%s7282_s19 + $0x78] sm:$0xff]  ;;  %v448_v38 = vld [vmem:[%s7282_s19 + $0x120] sm:$0xff] }
  0x2b   : > { %v447_v35 = vld [vmem:[%s7282_s19 + $0x118] sm:$0xff]  ;;  %v449_v37 = vld [vmem:[%s7282_s19 + $0x128] sm:$0xff]  ;;  %v450_v40 = vld [vmem:[%s7282_s19 + $0x130] sm:$0xff] }
  0x2c   : > { %473 = vperm.xlu0 %7034, %v415_v7   ;;  %478 = vperm.xlu1 %7035, %v416_v8   ;;  %v451_v39 = vld [vmem:[%s7282_s19 + $0x138] sm:$0xff]  ;;  %v453_v41 = vld [vmem:[%s7282_s19 + $0x148] sm:$0xff]  ;;  %v452_v42 = vld [vmem:[%s7282_s19 + $0x140] sm:$0xff]  ;;  %s7095_s19 = scalar_lea.vmem %s11351_s29, 16 }
  0x2d   : > { %v454_v51 = vld [vmem:[%s11725_s1] sm:$0xff]  ;;  %v7353_v63 = vld [vmem:[%s11725_s1 + $0x8] ss:$0 sm:$0xff]  ;;  %p7096_p11 = scmp.ne.s32.totalorder %s11351_s29, %s7095_s19 }
  0x2e   : > { %v7338_v55 = vrot.slane %v454_v51, %v726_v48  ;;  %v7340_v56 = vrot.slane %v454_v51, %v956_v49  ;;  %v7342_v57 = vrot.slane %v454_v51, %v1895_v50  ;;  %v7344_v59 = vrot.slane %v454_v51, %v2124_v52 }
  0x2f   : > { %v7346_v61 = vrot.slane %v454_v51, %v643_v53  ;;  %v7365_v3 = vrot.slane %v454_v51, %v1196_v54  ;;  %v7379_v7 = vrot.slane %v454_v51, %v1425_v58  ;;  %p7097_p12 = pnand %p7096_p11, %p7267_p5 }
  0x30   : > { %483 = vperm.xlu0 %7034, %v417_v9   ;;  %488 = vperm.xlu1 %7035, %v418_v10   ;;  %v7389_v10 = vrot.slane %v454_v51, %v1655_v60 }
  0x31   : > { %p7098_p13 = pneg %p7097_p12 }
  0x34   : > { %538 = vperm.xlu0 %7034, %v428_v11   ;;  %543 = vperm.xlu1 %7035, %v429_v12  }
  0x38   : > { %463 = vperm.xlu1 %7035, %v413_v13   ;;  %458 = vperm.xlu0 %7034, %v412_v14  }
  0x3c   : > { %578 = vperm.xlu1 %7035, %v436_v15   ;;  %573 = vperm.xlu0 %7034, %v435_v16  }
  0x40   : > { %498 = vperm.xlu1 %7035, %v420_v17   ;;  %493 = vperm.xlu0 %7034, %v419_v18  }
  0x44   : > { %588 = vperm.xlu1 %7035, %v438_v19   ;;  %583 = vperm.xlu0 %7034, %v437_v20  }
  0x48   : > { %508 = vperm.xlu1 %7035, %v422_v21   ;;  %503 = vperm.xlu0 %7034, %v421_v22  }
  0x4c   : > { %598 = vperm.xlu1 %7035, %v440_v23   ;;  %593 = vperm.xlu0 %7034, %v439_v24  }
  0x50   : > { %518 = vperm.xlu1 %7035, %v424_v25   ;;  %513 = vperm.xlu0 %7034, %v423_v26  }
  0x54   : > { %608 = vperm.xlu1 %7035, %v442_v27   ;;  %603 = vperm.xlu0 %7034, %v441_v28  }
  0x58   : > { %528 = vperm.xlu1 %7035, %v426_v29   ;;  %523 = vperm.xlu0 %7034, %v425_v30  }
  0x5c   : > { %618 = vperm.xlu1 %7035, %v444_v31   ;;  %613 = vperm.xlu0 %7034, %v443_v32  }
  0x60   : > { %623 = vperm.xlu1 %7035, %v445_v33   ;;  %533 = vperm.xlu0 %7034, %v427_v34  }
  0x64   : > { %633 = vperm.xlu1 %7035, %v447_v35   ;;  %628 = vperm.xlu0 %7034, %v446_v36  }
  0x68   : > { %721 = vperm.xlu1 %7035, %v449_v37   ;;  %638 = vperm.xlu0 %7034, %v448_v38  }
  0x6c   : > { %1191 = vperm.xlu1 %7035, %v451_v39   ;;  %1186 = vperm.xlu0 %7034, %v450_v40  }
  0x70   : > { %1890 = vperm.xlu1 %7035, %v453_v41   ;;  %1885 = vperm.xlu0 %7034, %v452_v42  }
  0x74   : > { %5825 = vperm.xlu1 %7035, %v5816_v43   ;;  %5820 = vperm.xlu0 %7034, %v5815_v44  }
  0x78   : > { %5830 = vperm.xlu0 %7034, %v5817_v45  }
  0x9f   : > { %v7348_v62 = vpop.permute.xlu1 %558  ;;  %v7355_v0 = vpop.permute.xlu0 %548 }
  0xa0   : > { %11726 = vst [vmem:[#allocation5_spill] sm:$0xff] %v7348_v62  ;;  %11727 = vst [vmem:[#allocation6_spill] sm:$0xff] %v7355_v0  ;;  %v7359_v1 = vmul.f32 %v7338_v55, %v7348_v62  ;;  %v7363_v2 = vmul.f32 %v7340_v56, %v7348_v62  ;;  %v7369_v4 = vmul.f32 %v7338_v55, %v7355_v0 }
  0xa1   : > { %v7373_v5 = vmul.f32 %v7340_v56, %v7355_v0  ;;  %v7377_v6 = vmul.f32 %v7342_v57, %v7355_v0  ;;  %v7383_v8 = vmul.f32 %v7344_v59, %v7355_v0  ;;  %v7387_v9 = vmul.f32 %v7353_v63, %v7355_v0 }
  0xa2   : > { %v7393_v11 = vmul.f32 %v7346_v61, %v7348_v62  ;;  %v11405_v12 = vrot.slane %v7359_v1, 1  ;;  %v7399_v14 = vmul.f32 %v7346_v61, %v7355_v0 }
  0xa3   : > { %11728 = vst [vmem:[#allocation7_spill] sm:$0xff] %v7373_v5  ;;  %11729 = vst [vmem:[#allocation8_spill] sm:$0xff] %v7377_v6  ;;  %v7401_v15 = vpop.permute.xlu1 %563  ;;  %v7403_v16 = vpop.permute.xlu0 %553 }
  0xa4   : > { %11730 = vst [vmem:[#allocation9_spill] sm:$0xff] %v7383_v8  ;;  %11731 = vst [vmem:[#allocation10_spill] sm:$0xff] %v7387_v9  ;;  %v7409_v19 = vmul.f32 %v7338_v55, %v7401_v15  ;;  %v7413_v20 = vmul.f32 %v7340_v56, %v7401_v15  ;;  %v7418_v22 = vmul.f32 %v7365_v3, %v7401_v15 }
  0xa5   : > { %11732 = vst [vmem:[#allocation11_spill] sm:$0xff] %v7401_v15  ;;  %11733 = vst [vmem:[#allocation12_spill] sm:$0xff] %v7403_v16  ;;  %v7422_v23 = vmul.f32 %v7379_v7, %v7401_v15  ;;  %v7426_v24 = vmul.f32 %v7389_v10, %v7401_v15  ;;  %v7432_v27 = vmul.f32 %v7338_v55, %v7403_v16 }
  0xa6   : > { %11734 = vst [vmem:[#allocation13_spill] sm:$0xff] %v7413_v20  ;;  %11735 = vst [vmem:[#allocation14_spill] sm:$0xff] %v7418_v22  ;;  %v7436_v28 = vmul.f32 %v7340_v56, %v7403_v16  ;;  %v666_v29 = vmul.f32 %v7346_v61, %v7401_v15  ;;  %v11406_v30 = vrot.slane %v7409_v19, 1  ;;  %v11404_v31 = vrot.slane %v7413_v20, 2 }
  0xa7   : > { %11736 = vst [vmem:[#allocation15_spill] sm:$0xff] %v7422_v23  ;;  %11737 = vst [vmem:[#allocation16_spill] sm:$0xff] %v7426_v24  ;;  %v664_v32 = vmul.f32 %v7346_v61, %v7403_v16  ;;  %v7444_v33 = vpop.permute.xlu0 %568  ;;  %v7446_v34 = vpop.permute.xlu1 %468  ;;  %v11407_v37 = vrot.slane %v7432_v27, 1  ;;  %v7453_v38 = vmul.f32 %v7342_v57, %v7403_v16  ;;  %v7484_v47 = vmul.f32 %v7344_v59, %v7403_v16 }
  0xa8   : > { %11738 = vst [vmem:[#allocation17_spill] sm:$0xff] %v7444_v33  ;;  %v7458_v40 = vmul.f32 %v7338_v55, %v7444_v33  ;;  %v7462_v41 = vmul.f32 %v7340_v56, %v7444_v33  ;;  %v7466_v42 = vmul.f32 %v7365_v3, %v7444_v33  ;;  %v7476_v45 = vmul.f32 %v7379_v7, %v7444_v33 }
  0xa9   : > { %11739 = vst [vmem:[#allocation18_spill] sm:$0xff] %v7453_v38  ;;  %v845_v43 = vsel %vm804_vm0, %v11407_v37, %v11405_v12  ;;  %v7480_v46 = vmul.f32 %v7389_v10, %v7444_v33  ;;  %11743 = vst [vmem:[#allocation22_spill] sm:$0xff] %v7484_v47  ;;  %v7488_v48 = vmul.f32 %v7346_v61, %v7444_v33 }
  0xaa   : > { %11740 = vst [vmem:[#allocation19_spill] sm:$0xff] %v7466_v42  ;;  %11741 = vst [vmem:[#allocation20_spill] sm:$0xff] %v7476_v45  ;;  %v11409_v49 = vrot.slane %v7458_v40, 1  ;;  %v11408_v50 = vrot.slane %v7462_v41, 2  ;;  %v7495_v53 = vmul.f32 %v7346_v61, %v7446_v34  ;;  %v7499_v54 = vmul.f32 %v7340_v56, %v7446_v34 }
  0xab   : > { %11742 = vst [vmem:[#allocation21_spill] sm:$0xff] %v7480_v46  ;;  %v474_v51 = vpop.permute.xlu0 %473  ;;  %v7503_v58 = vmul.f32 %v7365_v3, %v7446_v34  ;;  %v7505_v60 = vpop.permute.xlu1 %478  ;;  %v7507_v26 = vadd.f32 %v845_v43, %v664_v32  ;;  %v7517_v52 = vmul.f32 %v7379_v7, %v7446_v34  ;;  %v7523_v32 = vmul.f32 %v7389_v10, %v7446_v34 }
  0xac   : > { %11744 = vst [vmem:[#allocation23_spill] sm:$0xff] %v7505_v60  ;;  %v849_v25 = vsel %vm804_vm0, %v11406_v30, %v11409_v49  ;;  %v1079_v43 = vsel %vm1034_vm1, %v11404_v31, %v11408_v50  ;;  %v7532_v18 = vmul.f32 %v7338_v55, %v474_v51  ;;  %v7539_v35 = vmul.f32 %v7365_v3, %v474_v51 }
  0xad   : > { %11745 = vst [vmem:[#allocation24_spill] sm:$0xff] %v7507_v26  ;;  %v938_v39 = vadd.f32 %v849_v25, %v666_v29  ;;  %v7535_v25 = vmul.f32 %v7340_v56, %v474_v51  ;;  %v7542_v36 = vmul.f32 %v7379_v7, %v474_v51  ;;  %v7545_v44 = vmul.f32 %v7389_v10, %v474_v51 }
  0xae   : > { %v7551_v12 = vmul.f32 %v7346_v61, %v474_v51  ;;  %v732_v37 = vmul.f32 %v7338_v55, %v7505_v60  ;;  %v7562_v29 = vmul.f32 %v7340_v56, %v7505_v60  ;;  %v7569_v13 = vmul.f32 %v7346_v61, %v7505_v60 }
  0xaf   : > { %11746 = vst [vmem:[#allocation25_spill] sm:$0xff] %v7535_v25  ;;  %v7547_v31 = vpop.permute.xlu0 %483  ;;  %v7556_v17 = vadd.f32 %v1079_v43, %v938_v39  ;;  %v7564_v21 = vpop.permute.xlu1 %488  ;;  %v11755_v51 = vrot.slane %v7535_v25, 2  ;;  %v11756_v8 = vrot.slane %v7499_v54, 2 }
  0xb0   : > { %11747 = vst [vmem:[#allocation26_spill] sm:$0xff] %v7547_v31  ;;  %11748 = vst [vmem:[#allocation27_spill] sm:$0xff] %v7551_v12  ;;  %v812_v30 = vrot.slane %v732_v37, 1  ;;  %v733_v39 = vmul.f32 %v7338_v55, %v7547_v31  ;;  %v7577_v49 = vmul.f32 %v7340_v56, %v7547_v31  ;;  %v7581_v9 = vmul.f32 %v7379_v7, %v7547_v31 }
  0xb1   : > { %11749 = vst [vmem:[#allocation28_spill] sm:$0xff] %v7556_v17  ;;  %11750 = vst [vmem:[#allocation29_spill] sm:$0xff] %v7562_v29  ;;  %v7588_v37 = vsel %vm1034_vm1, %v11756_v8, %v11755_v51  ;;  %v650_v43 = vmul.f32 %v7346_v61, %v7547_v31  ;;  %v7594_v50 = vmul.f32 %v7338_v55, %v7564_v21 }
  0xb2   : > { %11751 = vst [vmem:[#allocation30_spill] sm:$0xff] %v7564_v21  ;;  %11752 = vst [vmem:[#allocation31_spill] sm:$0xff] %v7569_v13  ;;  %v814_v6 = vrot.slane %v733_v39, 1  ;;  %v11757_v13 = vrot.slane %v7532_v18, 1  ;;  %v7604_v38 = vmul.f32 %v7389_v10, %v7547_v31  ;;  %v7608_v8 = vmul.f32 %v7340_v56, %v7564_v21 }
  0xb3   : > { %11753 = vst [vmem:[#allocation32_spill] sm:$0xff] %v7577_v49  ;;  %11754 = vst [vmem:[#allocation33_spill] sm:$0xff] %v7581_v9  ;;  %v7610_v51 = vpop.permute.xlu0 %538  ;;  %v11434_v47 = vrot.slane %v7594_v50, 1  ;;  %v7620_v25 = vmul.f32 %v7379_v7, %v7564_v21  ;;  %v7630_v39 = vmul.f32 %v7389_v10, %v7564_v21  ;;  %v7652_v45 = vpop.permute.xlu1 %543  ;;  %v11767_v22 = vrot.slane %v7577_v49, 2 }
  0xb4   : > { %v7599_v12 = vsel %vm804_vm0, %v11757_v13, %v812_v30  ;;  %11759 = vst [vmem:[#allocation35_spill] sm:$0xff] %v7604_v38  ;;  %v7616_v13 = vmul.f32 %v7365_v3, %v7564_v21  ;;  %v7637_v24 = vmul.f32 %v7338_v55, %v7610_v51  ;;  %v7641_v29 = vmul.f32 %v7340_v56, %v7610_v51 }
  0xb5   : > { %11758 = vst [vmem:[#allocation34_spill] sm:$0xff] %v7599_v12  ;;  %11761 = vst [vmem:[#allocation37_spill] sm:$0xff] %v7620_v25  ;;  %v7625_v12 = vmul.f32 %v7346_v61, %v7564_v21  ;;  %v817_v15 = vsel %vm804_vm0, %v814_v6, %v11434_v47  ;;  %v7645_v46 = vmul.f32 %v7365_v3, %v7610_v51  ;;  %v11766_v17 = vrot.slane %v7608_v8, 2 }
  0xb6   : > { %11760 = vst [vmem:[#allocation36_spill] sm:$0xff] %v7616_v13  ;;  %11762 = vst [vmem:[#allocation38_spill] sm:$0xff] %v7630_v39  ;;  %v7648_v33 = vsel %vm804_vm0, %v812_v30, %v814_v6  ;;  %v922_v23 = vadd.f32 %v817_v15, %v650_v43  ;;  %v7662_v16 = vmul.f32 %v7379_v7, %v7610_v51 }
  0xb7   : > { %11763 = vst [vmem:[#allocation39_spill] sm:$0xff] %v7645_v46  ;;  %11764 = vst [vmem:[#allocation40_spill] sm:$0xff] %v7648_v33  ;;  %v1047_v42 = vsel %vm1034_vm1, %v11767_v22, %v11766_v17  ;;  %v7666_v6 = vmul.f32 %v7389_v10, %v7610_v51  ;;  %v7671_v30 = vmul.f32 %v7342_v57, %v7610_v51  ;;  %v11783_v33 = vrot.slane %v7503_v58, 2 }
  0xb8   : > { %11765 = vst [vmem:[#allocation41_spill] sm:$0xff] %v7652_v45  ;;  %11768 = vst [vmem:[#allocation42_spill] sm:$0xff] %v7662_v16  ;;  %v7675_v43 = vmul.f32 %v7344_v59, %v7610_v51  ;;  %v7679_v17 = vmul.f32 %v7353_v63, %v7610_v51  ;;  %v7686_v15 = vmul.f32 %v7338_v55, %v7652_v45 }
  0xb9   : > { %11769 = vst [vmem:[#allocation43_spill] sm:$0xff] %v7666_v6  ;;  %11770 = vst [vmem:[#allocation44_spill] sm:$0xff] %v7671_v30  ;;  %v7688_v47 = vadd.f32 %v1047_v42, %v922_v23  ;;  %v7693_v38 = vmul.f32 %v7340_v56, %v7652_v45  ;;  %v7697_v25 = vmul.f32 %v7365_v3, %v7652_v45 }
  0xba   : > { %11771 = vst [vmem:[#allocation45_spill] sm:$0xff] %v7675_v43  ;;  %11772 = vst [vmem:[#allocation46_spill] sm:$0xff] %v7679_v17  ;;  %v7704_v23 = vmul.f32 %v7379_v7, %v7652_v45  ;;  %v7710_v13 = vmul.f32 %v7389_v10, %v7652_v45  ;;  %v730_v21 = vmul.f32 %v7338_v55, %v7446_v34  ;;  %v464_v17 = vpop.permute.xlu1 %463 }
  0xbb   : > { %11773 = vst [vmem:[#allocation47_spill] sm:$0xff] %v7697_v25  ;;  %v7716_v62 = vmul.f32 %v7342_v57, %v7652_v45  ;;  %v7720_v22 = vmul.f32 %v7344_v59, %v7652_v45  ;;  %v1200_v42 = vmul.f32 %v7365_v3, %v7505_v60  ;;  %v7726_v39 = vmul.f32 %v7365_v3, %v7547_v31 }
  0xbc   : > { %11774 = vst [vmem:[#allocation48_spill] sm:$0xff] %v7704_v23  ;;  %11775 = vst [vmem:[#allocation49_spill] sm:$0xff] %v7710_v13  ;;  %v808_v30 = vrot.slane %v730_v21, 1  ;;  %v1429_v49 = vmul.f32 %v7379_v7, %v7505_v60  ;;  %v7736_v46 = vmul.f32 %v7389_v10, %v7505_v60  ;;  %v11780_v31 = vrot.slane %v7532_v18, 1  ;;  %v459_v23 = vpop.permute.xlu0 %458 }
  0xbd   : > { %11776 = vst [vmem:[#allocation50_spill] sm:$0xff] %v7716_v62  ;;  %11777 = vst [vmem:[#allocation51_spill] sm:$0xff] %v7720_v22  ;;  %v1277_v6 = vrot.slane %v1200_v42, 2  ;;  %v729_v34 = vmul.f32 %v7338_v55, %v464_v17  ;;  %v959_v21 = vmul.f32 %v7340_v56, %v464_v17  ;;  %v11781_v60 = vrot.slane %v7726_v39, 2 }
  0xbe   : > { %11778 = vst [vmem:[#allocation52_spill] sm:$0xff] %v7726_v39  ;;  %11779 = vst [vmem:[#allocation53_spill] sm:$0xff] %v7736_v46  ;;  %v811_v0 = vsel %vm804_vm0, %v808_v30, %v11780_v31  ;;  %v1507_v43 = vrot.slane %v1429_v49, 3  ;;  %v646_v31 = vmul.f32 %v7346_v61, %v464_v17  ;;  %v11481_v5 = vrot.slane %v7736_v46, 4  ;;  %v7763_v22 = vpop.permute.xlu1 %578 }
  0xbf   : > { %v919_v16 = vadd.f32 %v811_v0, %v7495_v53  ;;  %v1280_v18 = vsel %vm1034_vm1, %v1277_v6, %v11781_v60  ;;  %v806_v49 = vrot.slane %v729_v34, 1  ;;  %v1036_v26 = vrot.slane %v959_v21, 2  ;;  %11786 = vst [vmem:[#allocation54_spill] sm:$0xff] %v7763_v22 }
  0xc0   : > { %v11782_v25 = vrot.slane %v7539_v35, 2  ;;  %v11784_v0 = vrot.slane %v7542_v36, 3  ;;  %v11785_v53 = vrot.slane %v7517_v52, 3  ;;  %v958_v35 = vmul.f32 %v7340_v56, %v459_v23 }
  0xc1   : > { %v1149_v20 = vadd.f32 %v7588_v37, %v919_v16  ;;  %v809_v58 = vsel %vm804_vm0, %v806_v49, %v808_v30 }
  0xc2   : > { %v1276_v42 = vsel %vm1034_vm1, %v11783_v33, %v11782_v25  ;;  %v1506_v60 = vsel %vm1503_vm2, %v11785_v53, %v11784_v0  ;;  %v11787_v17 = vmov %v11782_v25  ;;  %v11788_v37 = vmov %v11784_v0 }
  0xc3   : > { %v1278_v16 = vsel %vm1034_vm1, %v11787_v17, %v1277_v6  ;;  %v1508_v34 = vsel %vm1503_vm2, %v11788_v37, %v1507_v43  ;;  %v11789_v33 = vrot.slane %v7545_v44, 4  ;;  %v11790_v25 = vrot.slane %v7523_v32, 4 }
  0xc4   : > { %v1388_v21 = vadd.f32 %v1280_v18, %v1149_v20  ;;  %v918_v0 = vadd.f32 %v809_v58, %v646_v31  ;;  %v728_v53 = vmul.f32 %v7338_v55, %v459_v23  ;;  %v11791_v6 = vrot.slane %v7581_v9, 3 }
  0xc5   : > { %v1736_v52 = vsel %vm1733_vm3, %v11790_v25, %v11789_v33  ;;  %v11792_v17 = vrot.slane %v7499_v54, 2  ;;  %v7787_v37 = vmul.f32 %v7338_v55, %v7763_v22  ;;  %v7791_v20 = vmul.f32 %v7340_v56, %v7763_v22  ;;  %v7798_v54 = vpop.permute.xlu0 %573 }
  0xc6   : > { %v1510_v36 = vsel %vm1503_vm2, %v1507_v43, %v11791_v6  ;;  %v11793_v32 = vmov %v11789_v33  ;;  %v805_v43 = vrot.slane %v728_v53, 1  ;;  %v1035_v58 = vrot.slane %v958_v35, 2  ;;  %11794 = vst [vmem:[#allocation55_spill] sm:$0xff] %v7798_v54 }
  0xc7   : > { %v1039_v30 = vsel %vm1034_vm1, %v1036_v26, %v11792_v17  ;;  %v1738_v18 = vsel %vm1733_vm3, %v11793_v32, %v11481_v5  ;;  %v7800_v33 = vadd.f32 %v1510_v36, %v1388_v21  ;;  %v645_v25 = vmul.f32 %v7346_v61, %v459_v23 }
  0xc8   : > { %v1148_v31 = vadd.f32 %v1039_v30, %v918_v0  ;;  %v7805_v6 = vmul.f32 %v7346_v61, %v7763_v22  ;;  %v7809_v17 = vmul.f32 %v7365_v3, %v7763_v22  ;;  %v807_v32 = vsel %vm804_vm0, %v805_v43, %v806_v49 }
  0xc9   : > { %11795 = vst [vmem:[#allocation56_spill] sm:$0xff] %v7800_v33  ;;  %v11485_v0 = vrot.slane %v7787_v37, 1  ;;  %v7815_v53 = vmul.f32 %v7379_v7, %v7763_v22  ;;  %v917_v21 = vadd.f32 %v807_v32, %v645_v25  ;;  %v1037_v23 = vsel %vm1034_vm1, %v1035_v58, %v1036_v26 }
  0xca   : > { %11796 = vst [vmem:[#allocation57_spill] sm:$0xff] %v7809_v17  ;;  %v1387_v44 = vadd.f32 %v1278_v16, %v1148_v31  ;;  %v751_v36 = vmul.f32 %v7338_v55, %v7798_v54  ;;  %v7823_v16 = vmul.f32 %v7389_v10, %v7763_v22  ;;  %v981_v49 = vmul.f32 %v7340_v56, %v7798_v54 }
  0xcb   : > { %v7829_v31 = vmul.f32 %v7365_v3, %v7798_v54  ;;  %v1147_v43 = vadd.f32 %v1037_v23, %v917_v21  ;;  %v7834_v25 = vmul.f32 %v7379_v7, %v7798_v54  ;;  %v668_v32 = vmul.f32 %v7346_v61, %v7798_v54 }
  0xcc   : > { %v1617_v30 = vadd.f32 %v1508_v34, %v1387_v44  ;;  %11797 = vst [vmem:[#allocation58_spill] sm:$0xff] %v7823_v16  ;;  %v850_v58 = vrot.slane %v751_v36, 1  ;;  %v7836_v34 = vpop.permute.xlu1 %498  ;;  %v1080_v5 = vrot.slane %v981_v49, 2  ;;  %v7843_v35 = vmul.f32 %v7389_v10, %v7798_v54 }
  0xcd   : > { %11798 = vst [vmem:[#allocation59_spill] sm:$0xff] %v7836_v34  ;;  %v1386_v21 = vadd.f32 %v1276_v42, %v1147_v43  ;;  %v11799_v23 = vrot.slane %v7458_v40, 1  ;;  %v11486_v62 = vrot.slane %v7829_v31, 2  ;;  %v7857_v46 = vmul.f32 %v7346_v61, %v7836_v34 }
  0xce   : > { %v853_v26 = vsel %vm804_vm0, %v850_v58, %v11485_v0  ;;  %v7852_v44 = vadd.f32 %v1738_v18, %v1617_v30  ;;  %v11802_v18 = vrot.slane %v7462_v41, 2  ;;  %v11808_v41 = vrot.slane %v7791_v20, 2 }
  0xcf   : > { %v851_v36 = vsel %vm804_vm0, %v11799_v23, %v850_v58  ;;  %v940_v49 = vadd.f32 %v853_v26, %v668_v32  ;;  %v1616_v42 = vadd.f32 %v1506_v60, %v1386_v21  ;;  %v7865_v58 = vmul.f32 %v7338_v55, %v7836_v34  ;;  %v7884_v32 = vpop.permute.xlu0 %493 }
  0xd0   : > { %11800 = vst [vmem:[#allocation60_spill] sm:$0xff] %v7852_v44  ;;  %v7860_v40 = vadd.f32 %v851_v36, %v7488_v48  ;;  %v7870_v30 = vsel %vm1034_vm1, %v11802_v18, %v1080_v5  ;;  %v7874_v26 = vmul.f32 %v7340_v56, %v7836_v34  ;;  %v7878_v60 = vmul.f32 %v7365_v3, %v7836_v34 }
  0xd1   : > { %11803 = vst [vmem:[#allocation62_spill] sm:$0xff] %v7870_v30  ;;  %v7882_v48 = vmul.f32 %v7379_v7, %v7836_v34  ;;  %11806 = vst [vmem:[#allocation65_spill] sm:$0xff] %v7884_v32  ;;  %v7886_v21 = vadd.f32 %v1736_v52, %v1616_v42  ;;  %v1083_v23 = vsel %vm1034_vm1, %v1080_v5, %v11808_v41  ;;  %v11809_v36 = vrot.slane %v7809_v17, 2 }
  0xd2   : > { %11801 = vst [vmem:[#allocation61_spill] sm:$0xff] %v7860_v40  ;;  %11804 = vst [vmem:[#allocation63_spill] sm:$0xff] %v7878_v60  ;;  %v7899_v43 = vadd.f32 %v1083_v23, %v940_v49  ;;  %v7904_v52 = vmul.f32 %v7389_v10, %v7836_v34  ;;  %v7908_v5 = vmul.f32 %v7342_v57, %v7836_v34  ;;  %v589_v23 = vpop.permute.xlu1 %588 }
  0xd3   : > { %11805 = vst [vmem:[#allocation64_spill] sm:$0xff] %v7882_v48  ;;  %11807 = vst [vmem:[#allocation66_spill] sm:$0xff] %v7886_v21  ;;  %v7896_v18 = vsel %vm1034_vm1, %v11486_v62, %v11809_v36  ;;  %v735_v41 = vmul.f32 %v7338_v55, %v7884_v32  ;;  %v965_v36 = vmul.f32 %v7340_v56, %v7884_v32  ;;  %v7962_v39 = vpop.permute.xlu0 %583 }
  0xd4   : > { %11810 = vst [vmem:[#allocation67_spill] sm:$0xff] %v7904_v52  ;;  %11811 = vst [vmem:[#allocation68_spill] sm:$0xff] %v7908_v5  ;;  %v7917_v49 = vmul.f32 %v7365_v3, %v7884_v32  ;;  %v7923_v0 = vmul.f32 %v7379_v7, %v7884_v32  ;;  %v7927_v42 = vmul.f32 %v7389_v10, %v7884_v32  ;;  %v11816_v5 = vrot.slane %v7594_v50, 1 }
  0xd5   : > { %v652_v17 = vmul.f32 %v7346_v61, %v7884_v32  ;;  %v818_v30 = vrot.slane %v735_v41, 1  ;;  %v1048_v40 = vrot.slane %v965_v36, 2  ;;  %v7936_v62 = vmul.f32 %v7342_v57, %v7884_v32  ;;  %11821 = vst [vmem:[#allocation74_spill] sm:$0xff] %v7962_v39 }
  0xd6   : > { %11812 = vst [vmem:[#allocation69_spill] sm:$0xff] %v7917_v49  ;;  %11813 = vst [vmem:[#allocation70_spill] sm:$0xff] %v7923_v0  ;;  %v7939_v21 = vmul.f32 %v7338_v55, %v589_v23  ;;  %v11817_v41 = vrot.slane %v7865_v58, 1  ;;  %v7948_v34 = vmul.f32 %v7340_v56, %v589_v23  ;;  %v7951_v44 = vmul.f32 %v7365_v3, %v589_v23 }
  0xd7   : > { %11814 = vst [vmem:[#allocation71_spill] sm:$0xff] %v7927_v42  ;;  %11815 = vst [vmem:[#allocation72_spill] sm:$0xff] %v7936_v62  ;;  %v819_v9 = vsel %vm804_vm0, %v11816_v5, %v818_v30  ;;  %v11819_v32 = vrot.slane %v7878_v60, 2  ;;  %v11820_v62 = vrot.slane %v7917_v49, 2  ;;  %v7960_v5 = vmul.f32 %v7346_v61, %v589_v23 }
  0xd8   : > { %v821_v36 = vsel %vm804_vm0, %v818_v30, %v11817_v41  ;;  %11818 = vst [vmem:[#allocation73_spill] sm:$0xff] %v7951_v44  ;;  %v7965_v30 = vadd.f32 %v819_v9, %v7625_v12  ;;  %v11823_v41 = vrot.slane %v7608_v8, 2  ;;  %v7987_v12 = vmul.f32 %v7379_v7, %v589_v23 }
  0xd9   : > { %v924_v33 = vadd.f32 %v821_v36, %v652_v17  ;;  %v1286_v52 = vsel %vm1034_vm1, %v11820_v62, %v11819_v32  ;;  %v11825_v36 = vrot.slane %v7874_v26, 2  ;;  %v11826_v62 = vrot.slane %v7882_v48, 3  ;;  %v509_v48 = vpop.permute.xlu1 %508 }
  0xda   : > { %11822 = vst [vmem:[#allocation75_spill] sm:$0xff] %v7965_v30  ;;  %v7970_v17 = vsel %vm1034_vm1, %v11823_v41, %v1048_v40  ;;  %v11827_v32 = vrot.slane %v7923_v0, 3  ;;  %v7983_v42 = vadd.f32 %v1286_v52, %v7688_v47  ;;  %11830 = vst [vmem:[#allocation79_spill] sm:$0xff] %v7987_v12  ;;  %v7990_v8 = vmul.f32 %v7389_v10, %v589_v23 }
  0xdb   : > { %11824 = vst [vmem:[#allocation76_spill] sm:$0xff] %v7970_v17  ;;  %v1051_v60 = vsel %vm1034_vm1, %v1048_v40, %v11825_v36  ;;  %v7999_v47 = vmul.f32 %v7342_v57, %v589_v23  ;;  %v8002_v52 = vmul.f32 %v7344_v59, %v589_v23  ;;  %v8013_v36 = vmul.f32 %v7365_v3, %v7962_v39 }
  0xdc   : > { %v7980_v50 = vsel %vm1503_vm2, %v11827_v32, %v11826_v62  ;;  %11829 = vst [vmem:[#allocation78_spill] sm:$0xff] %v7983_v42  ;;  %11831 = vst [vmem:[#allocation80_spill] sm:$0xff] %v7990_v8  ;;  %v7992_v41 = vadd.f32 %v1051_v60, %v924_v33  ;;  %v753_v62 = vmul.f32 %v7338_v55, %v7962_v39  ;;  %v11839_v0 = vrot.slane %v7939_v21, 1 }
  0xdd   : > { %11828 = vst [vmem:[#allocation77_spill] sm:$0xff] %v7980_v50  ;;  %11832 = vst [vmem:[#allocation81_spill] sm:$0xff] %v7999_v47  ;;  %v8005_v32 = vmul.f32 %v7353_v63, %v589_v23  ;;  %v983_v33 = vmul.f32 %v7340_v56, %v7962_v39  ;;  %v670_v60 = vmul.f32 %v7346_v61, %v7962_v39  ;;  %v11846_v17 = vrot.slane %v7987_v12, 3 }
  0xde   : > { %11833 = vst [vmem:[#allocation82_spill] sm:$0xff] %v8002_v52  ;;  %v854_v40 = vrot.slane %v753_v62, 1  ;;  %11835 = vst [vmem:[#allocation84_spill] sm:$0xff] %v8013_v36  ;;  %v8017_v9 = vmul.f32 %v7379_v7, %v7962_v39  ;;  %v8023_v50 = vmul.f32 %v7389_v10, %v7962_v39  ;;  %v11838_v62 = vrot.slane %v7787_v37, 1 }
  0xdf   : > { %11834 = vst [vmem:[#allocation83_spill] sm:$0xff] %v8005_v32  ;;  %v1084_v30 = vrot.slane %v983_v33, 2  ;;  %v11507_v32 = vrot.slane %v8013_v36, 2  ;;  %v8036_v39 = vmul.f32 %v7338_v55, %v509_v48  ;;  %v8048_v22 = vmul.f32 %v7346_v61, %v509_v48 }
  0xe0   : > { %11836 = vst [vmem:[#allocation85_spill] sm:$0xff] %v8017_v9  ;;  %11837 = vst [vmem:[#allocation86_spill] sm:$0xff] %v8023_v50  ;;  %v855_v42 = vsel %vm804_vm0, %v11838_v62, %v854_v40  ;;  %v857_v49 = vsel %vm804_vm0, %v854_v40, %v11839_v0  ;;  %v11841_v62 = vrot.slane %v7951_v44, 2  ;;  %v11842_v33 = vrot.slane %v7791_v20, 2 }
  0xe1   : > { %v942_v23 = vadd.f32 %v857_v49, %v670_v60  ;;  %v8039_v37 = vadd.f32 %v855_v42, %v7805_v6  ;;  %v8057_v6 = vmul.f32 %v7340_v56, %v509_v48  ;;  %v8060_v42 = vmul.f32 %v7365_v3, %v509_v48 }
  0xe2   : > { %v1322_v0 = vsel %vm1034_vm1, %v11507_v32, %v11841_v62  ;;  %v8053_v49 = vsel %vm1034_vm1, %v11842_v33, %v1084_v30  ;;  %v11845_v62 = vrot.slane %v7948_v34, 2  ;;  %v11847_v40 = vrot.slane %v8017_v9, 3  ;;  %v599_v9 = vpop.permute.xlu1 %598 }
  0xe3   : > { %11840 = vst [vmem:[#allocation87_spill] sm:$0xff] %v8039_v37  ;;  %11843 = vst [vmem:[#allocation88_spill] sm:$0xff] %v8053_v49  ;;  %v1409_v60 = vadd.f32 %v1322_v0, %v7899_v43  ;;  %v8071_v33 = vmul.f32 %v7379_v7, %v509_v48  ;;  %v8074_v43 = vmul.f32 %v7389_v10, %v509_v48  ;;  %v8076_v0 = vpop.permute.xlu0 %503  ;;  %v11861_v47 = vrot.slane %v7865_v58, 1 }
  0xe4   : > { %11844 = vst [vmem:[#allocation89_spill] sm:$0xff] %v8060_v42  ;;  %v1087_v32 = vsel %vm1034_vm1, %v1084_v30, %v11845_v62  ;;  %v1552_v20 = vsel %vm1503_vm2, %v11847_v40, %v11846_v17  ;;  %11850 = vst [vmem:[#allocation92_spill] sm:$0xff] %v8076_v0  ;;  %v8082_v30 = vmul.f32 %v7342_v57, %v509_v48  ;;  %v11854_v17 = vrot.slane %v7990_v8, 4 }
  0xe5   : > { %11848 = vst [vmem:[#allocation90_spill] sm:$0xff] %v8071_v33  ;;  %11849 = vst [vmem:[#allocation91_spill] sm:$0xff] %v8074_v43  ;;  %v8078_v44 = vadd.f32 %v1087_v32, %v942_v23  ;;  %v8085_v62 = vmul.f32 %v7344_v59, %v509_v48  ;;  %v8087_v12 = vadd.f32 %v1552_v20, %v1409_v60  ;;  %v11855_v40 = vrot.slane %v8023_v50, 4 }
  0xe6   : > { %11851 = vst [vmem:[#allocation93_spill] sm:$0xff] %v8082_v30  ;;  %v8098_v23 = vmul.f32 %v7353_v63, %v509_v48  ;;  %v737_v60 = vmul.f32 %v7338_v55, %v8076_v0  ;;  %v967_v20 = vmul.f32 %v7340_v56, %v8076_v0  ;;  %v8113_v48 = vmul.f32 %v7379_v7, %v8076_v0 }
  0xe7   : > { %11852 = vst [vmem:[#allocation94_spill] sm:$0xff] %v8085_v62  ;;  %11853 = vst [vmem:[#allocation95_spill] sm:$0xff] %v8087_v12  ;;  %v8094_v37 = vsel %vm1733_vm3, %v11855_v40, %v11854_v17  ;;  %v8109_v17 = vmul.f32 %v7365_v3, %v8076_v0  ;;  %v8117_v40 = vmul.f32 %v7389_v10, %v8076_v0  ;;  %v11862_v13 = vrot.slane %v8036_v39, 1 }
  0xe8   : > { %11856 = vst [vmem:[#allocation96_spill] sm:$0xff] %v8094_v37  ;;  %11857 = vst [vmem:[#allocation97_spill] sm:$0xff] %v8098_v23  ;;  %v822_v50 = vrot.slane %v737_v60, 1  ;;  %v1052_v37 = vrot.slane %v967_v20, 2  ;;  %v654_v12 = vmul.f32 %v7346_v61, %v8076_v0  ;;  %v8134_v20 = vmul.f32 %v7338_v55, %v599_v9 }
  0xe9   : > { %11858 = vst [vmem:[#allocation98_spill] sm:$0xff] %v8109_v17  ;;  %11859 = vst [vmem:[#allocation99_spill] sm:$0xff] %v8113_v48  ;;  %v11522_v36 = vrot.slane %v8109_v17, 2  ;;  %v11863_v49 = vrot.slane %v8060_v42, 2  ;;  %v8143_v58 = vmul.f32 %v7342_v57, %v8076_v0  ;;  %v8164_v42 = vmul.f32 %v7365_v3, %v599_v9 }
  0xea   : > { %11860 = vst [vmem:[#allocation100_spill] sm:$0xff] %v8117_v40  ;;  %v823_v54 = vsel %vm804_vm0, %v11861_v47, %v822_v50  ;;  %v825_v32 = vsel %vm804_vm0, %v822_v50, %v11862_v13  ;;  %v8146_v47 = vmul.f32 %v7346_v61, %v599_v9  ;;  %v11865_v13 = vrot.slane %v7874_v26, 2 }
  0xeb   : > { %v926_v8 = vadd.f32 %v825_v32, %v654_v12  ;;  %v1290_v52 = vsel %vm1034_vm1, %v11522_v36, %v11863_v49  ;;  %11864 = vst [vmem:[#allocation101_spill] sm:$0xff] %v8143_v58  ;;  %v11867_v12 = vrot.slane %v8057_v6, 2  ;;  %v8158_v49 = vmul.f32 %v7340_v56, %v599_v9  ;;  %11869 = vst [vmem:[#allocation104_spill] sm:$0xff] %v8164_v42 }
  0xec   : > { %v8151_v50 = vsel %vm1034_vm1, %v11865_v13, %v1052_v37  ;;  %v1393_v60 = vadd.f32 %v1290_v52, %v7992_v41  ;;  %v8161_v36 = vadd.f32 %v823_v54, %v7857_v46  ;;  %v8167_v26 = vmul.f32 %v7379_v7, %v599_v9 }
  0xed   : > { %11866 = vst [vmem:[#allocation102_spill] sm:$0xff] %v8151_v50  ;;  %v1055_v32 = vsel %vm1034_vm1, %v1052_v37, %v11867_v12  ;;  %v8170_v13 = vmul.f32 %v7389_v10, %v599_v9  ;;  %v8172_v50 = vpop.permute.xlu0 %593  ;;  %v11873_v37 = vrot.slane %v8071_v33, 3  ;;  %v11874_v41 = vrot.slane %v8113_v48, 3  ;;  %v519_v33 = vpop.permute.xlu1 %518 }
  0xee   : > { %11868 = vst [vmem:[#allocation103_spill] sm:$0xff] %v8161_v36  ;;  %11870 = vst [vmem:[#allocation105_spill] sm:$0xff] %v8167_v26  ;;  %v11875_v46 = vrot.slane %v8074_v43, 4  ;;  %v11876_v54 = vrot.slane %v8117_v40, 4  ;;  %v8188_v17 = vmul.f32 %v7342_v57, %v599_v9  ;;  %v8190_v23 = vadd.f32 %v1055_v32, %v926_v8 }
  0xef   : > { %11871 = vst [vmem:[#allocation106_spill] sm:$0xff] %v8170_v13  ;;  %11872 = vst [vmem:[#allocation107_spill] sm:$0xff] %v8172_v50  ;;  %v1520_v52 = vsel %vm1503_vm2, %v11874_v41, %v11873_v37  ;;  %v8196_v37 = vmul.f32 %v7344_v59, %v599_v9  ;;  %v8204_v36 = vmul.f32 %v7353_v63, %v599_v9  ;;  %v11894_v30 = vrot.slane %v8158_v49, 2 }
  0xf0   : > { %v8184_v12 = vsel %vm1733_vm3, %v11876_v54, %v11875_v46  ;;  %11878 = vst [vmem:[#allocation109_spill] sm:$0xff] %v8188_v17  ;;  %v8192_v62 = vadd.f32 %v1520_v52, %v1393_v60  ;;  %v755_v54 = vmul.f32 %v7338_v55, %v8172_v50  ;;  %v985_v8 = vmul.f32 %v7340_v56, %v8172_v50 }
  0xf1   : > { %11877 = vst [vmem:[#allocation108_spill] sm:$0xff] %v8184_v12  ;;  %11880 = vst [vmem:[#allocation111_spill] sm:$0xff] %v8196_v37  ;;  %v8210_v60 = vmul.f32 %v7365_v3, %v8172_v50  ;;  %v8214_v32 = vmul.f32 %v7379_v7, %v8172_v50  ;;  %v8219_v43 = vmul.f32 %v7389_v10, %v8172_v50  ;;  %v11886_v52 = vrot.slane %v7939_v21, 1  ;;  %v609_v16 = vpop.permute.xlu1 %608 }
  0xf2   : > { %11879 = vst [vmem:[#allocation110_spill] sm:$0xff] %v8192_v62  ;;  %11881 = vst [vmem:[#allocation112_spill] sm:$0xff] %v8204_v36  ;;  %v858_v46 = vrot.slane %v755_v54, 1  ;;  %v8223_v9 = vmul.f32 %v7342_v57, %v8172_v50  ;;  %v672_v40 = vmul.f32 %v7346_v61, %v8172_v50  ;;  %v1088_v48 = vrot.slane %v985_v8, 2 }
  0xf3   : > { %11882 = vst [vmem:[#allocation113_spill] sm:$0xff] %v8210_v60  ;;  %11883 = vst [vmem:[#allocation114_spill] sm:$0xff] %v8214_v32  ;;  %v11887_v62 = vrot.slane %v8134_v20, 1  ;;  %v8240_v8 = vmul.f32 %v7344_v59, %v8172_v50  ;;  %v8243_v12 = vmul.f32 %v7346_v61, %v519_v33  ;;  %v11893_v41 = vrot.slane %v8210_v60, 2 }
  0xf4   : > { %11884 = vst [vmem:[#allocation115_spill] sm:$0xff] %v8219_v43  ;;  %11885 = vst [vmem:[#allocation116_spill] sm:$0xff] %v8223_v9  ;;  %v859_v54 = vsel %vm804_vm0, %v11886_v52, %v858_v46  ;;  %v11890_v52 = vrot.slane %v7948_v34, 2  ;;  %v1091_v0 = vsel %vm1034_vm1, %v1088_v48, %v11894_v30  ;;  %v8267_v34 = vmul.f32 %v7340_v56, %v519_v33 }
  0xf5   : > { %v861_v17 = vsel %vm804_vm0, %v858_v46, %v11887_v62  ;;  %11888 = vst [vmem:[#allocation117_spill] sm:$0xff] %v8240_v8  ;;  %v8246_v21 = vadd.f32 %v859_v54, %v7960_v5  ;;  %v11892_v46 = vrot.slane %v8164_v42, 2  ;;  %v8264_v54 = vmul.f32 %v7338_v55, %v519_v33 }
  0xf6   : > { %v944_v37 = vadd.f32 %v861_v17, %v672_v40  ;;  %v8251_v62 = vsel %vm1034_vm1, %v11890_v52, %v1088_v48  ;;  %v11895_v52 = vrot.slane %v8167_v26, 3  ;;  %v11896_v42 = vrot.slane %v8214_v32, 3 }
  0xf7   : > { %11889 = vst [vmem:[#allocation118_spill] sm:$0xff] %v8246_v21  ;;  %11891 = vst [vmem:[#allocation119_spill] sm:$0xff] %v8251_v62  ;;  %v1326_v17 = vsel %vm1034_vm1, %v11893_v41, %v11892_v46  ;;  %v11897_v46 = vrot.slane %v8170_v13, 4  ;;  %v11898_v40 = vrot.slane %v8219_v43, 4  ;;  %v8285_v48 = vmul.f32 %v7379_v7, %v519_v33 }
  0xf8   : > { %v1411_v5 = vadd.f32 %v1326_v17, %v8078_v44  ;;  %v1556_v41 = vsel %vm1503_vm2, %v11896_v42, %v11895_v52  ;;  %v8282_v44 = vmul.f32 %v7365_v3, %v519_v33  ;;  %v8287_v17 = vpop.permute.xlu0 %513  ;;  %v8289_v26 = vadd.f32 %v1091_v0, %v944_v37 }
  0xf9   : > { %v8279_v30 = vsel %vm1733_vm3, %v11898_v40, %v11897_v46  ;;  %11901 = vst [vmem:[#allocation122_spill] sm:$0xff] %v8285_v48  ;;  %11902 = vst [vmem:[#allocation123_spill] sm:$0xff] %v8287_v17  ;;  %v8293_v42 = vmul.f32 %v7389_v10, %v519_v33  ;;  %v8296_v52 = vmul.f32 %v7342_v57, %v519_v33  ;;  %v11913_v8 = vrot.slane %v8036_v39, 1 }
  0xfa   : > { %11899 = vst [vmem:[#allocation120_spill] sm:$0xff] %v8279_v30  ;;  %11900 = vst [vmem:[#allocation121_spill] sm:$0xff] %v8282_v44  ;;  %v8298_v40 = vadd.f32 %v1556_v41, %v1411_v5  ;;  %v8303_v21 = vmul.f32 %v7344_v59, %v519_v33  ;;  %v8308_v62 = vmul.f32 %v7353_v63, %v519_v33  ;;  %v11914_v33 = vrot.slane %v8264_v54, 1 }
  0xfb   : > { %11903 = vst [vmem:[#allocation124_spill] sm:$0xff] %v8293_v42  ;;  %11904 = vst [vmem:[#allocation125_spill] sm:$0xff] %v8296_v52  ;;  %v739_v30 = vmul.f32 %v7338_v55, %v8287_v17  ;;  %v969_v5 = vmul.f32 %v7340_v56, %v8287_v17  ;;  %v8316_v41 = vmul.f32 %v7365_v3, %v8287_v17 }
  0xfc   : > { %11905 = vst [vmem:[#allocation126_spill] sm:$0xff] %v8298_v40  ;;  %11906 = vst [vmem:[#allocation127_spill] sm:$0xff] %v8303_v21  ;;  %v8320_v13 = vmul.f32 %v7379_v7, %v8287_v17  ;;  %v8324_v37 = vmul.f32 %v7389_v10, %v8287_v17  ;;  %v8329_v46 = vmul.f32 %v7342_v57, %v8287_v17 }
  0xfd   : > { %11907 = vst [vmem:[#allocation128_spill] sm:$0xff] %v8308_v62  ;;  %11908 = vst [vmem:[#allocation129_spill] sm:$0xff] %v8316_v41  ;;  %v826_v0 = vrot.slane %v739_v30, 1  ;;  %v8333_v40 = vmul.f32 %v7344_v59, %v8287_v17  ;;  %v656_v32 = vmul.f32 %v7346_v61, %v8287_v17  ;;  %v1056_v60 = vrot.slane %v969_v5, 2 }
  0xfe   : > { %11909 = vst [vmem:[#allocation130_spill] sm:$0xff] %v8320_v13  ;;  %11910 = vst [vmem:[#allocation131_spill] sm:$0xff] %v8324_v37  ;;  %v11559_v9 = vrot.slane %v8320_v13, 3  ;;  %v11923_v17 = vrot.slane %v8324_v37, 4  ;;  %v8397_v36 = vmul.f32 %v7346_v61, %v609_v16 }
  0xff   : > { %11911 = vst [vmem:[#allocation132_spill] sm:$0xff] %v8329_v46  ;;  %11912 = vst [vmem:[#allocation133_spill] sm:$0xff] %v8333_v40  ;;  %v827_v30 = vsel %vm804_vm0, %v11913_v8, %v826_v0  ;;  %v829_v50 = vsel %vm804_vm0, %v826_v0, %v11914_v33  ;;  %v11916_v8 = vrot.slane %v8057_v6, 2  ;;  %v11918_v0 = vrot.slane %v8282_v44, 2  ;;  %v529_v46 = vpop.permute.xlu1 %528 }
 0x100   : > { %v928_v5 = vadd.f32 %v829_v50, %v656_v32  ;;  %v8351_v39 = vadd.f32 %v827_v30, %v8048_v22  ;;  %v11919_v33 = vrot.slane %v8316_v41, 2  ;;  %v11920_v50 = vrot.slane %v8267_v34, 2 }
 0x101   : > { %v8356_v52 = vsel %vm1034_vm1, %v11916_v8, %v1056_v60  ;;  %v8369_v30 = vmul.f32 %v7338_v55, %v609_v16  ;;  %v8372_v6 = vmul.f32 %v7340_v56, %v609_v16  ;;  %v11921_v8 = vrot.slane %v8285_v48, 3 }
 0x102   : > { %11915 = vst [vmem:[#allocation134_spill] sm:$0xff] %v8351_v39  ;;  %11917 = vst [vmem:[#allocation135_spill] sm:$0xff] %v8356_v52  ;;  %v1294_v58 = vsel %vm1034_vm1, %v11919_v33, %v11918_v0  ;;  %v1059_v32 = vsel %vm1034_vm1, %v1056_v60, %v11920_v50  ;;  %v11922_v33 = vrot.slane %v8293_v42, 4  ;;  %v8392_v50 = vpop.permute.xlu0 %603  ;;  %v8410_v48 = vmul.f32 %v7344_v59, %v609_v16 }
 0x103   : > { %v1395_v22 = vadd.f32 %v1294_v58, %v8190_v23  ;;  %v1524_v0 = vsel %vm1503_vm2, %v11559_v9, %v11921_v8  ;;  %v8387_v23 = vmul.f32 %v7365_v3, %v609_v16  ;;  %v8390_v58 = vmul.f32 %v7379_v7, %v609_v16  ;;  %11927 = vst [vmem:[#allocation139_spill] sm:$0xff] %v8392_v50 }
 0x104   : > { %v8384_v60 = vsel %vm1733_vm3, %v11923_v17, %v11922_v33  ;;  %v8394_v43 = vadd.f32 %v1059_v32, %v928_v5  ;;  %v8400_v8 = vmul.f32 %v7389_v10, %v609_v16  ;;  %v8403_v9 = vmul.f32 %v7342_v57, %v609_v16  ;;  %11931 = vst [vmem:[#allocation143_spill] sm:$0xff] %v8410_v48 }
 0x105   : > { %11924 = vst [vmem:[#allocation136_spill] sm:$0xff] %v8384_v60  ;;  %11925 = vst [vmem:[#allocation137_spill] sm:$0xff] %v8387_v23  ;;  %v8405_v17 = vadd.f32 %v1524_v0, %v1395_v22  ;;  %v8415_v44 = vmul.f32 %v7353_v63, %v609_v16  ;;  %v757_v52 = vmul.f32 %v7338_v55, %v8392_v50  ;;  %v11938_v41 = vrot.slane %v8134_v20, 1 }
 0x106   : > { %11926 = vst [vmem:[#allocation138_spill] sm:$0xff] %v8390_v58  ;;  %11928 = vst [vmem:[#allocation140_spill] sm:$0xff] %v8400_v8  ;;  %v987_v22 = vmul.f32 %v7340_v56, %v8392_v50  ;;  %v8423_v0 = vmul.f32 %v7365_v3, %v8392_v50  ;;  %v8427_v42 = vmul.f32 %v7379_v7, %v8392_v50  ;;  %v11939_v16 = vrot.slane %v8369_v30, 1 }
 0x107   : > { %11929 = vst [vmem:[#allocation141_spill] sm:$0xff] %v8403_v9  ;;  %11930 = vst [vmem:[#allocation142_spill] sm:$0xff] %v8405_v17  ;;  %v8431_v32 = vmul.f32 %v7389_v10, %v8392_v50  ;;  %v862_v5 = vrot.slane %v757_v52, 1  ;;  %v8436_v33 = vmul.f32 %v7342_v57, %v8392_v50  ;;  %v8440_v39 = vmul.f32 %v7344_v59, %v8392_v50 }
 0x108   : > { %11932 = vst [vmem:[#allocation144_spill] sm:$0xff] %v8415_v44  ;;  %11933 = vst [vmem:[#allocation145_spill] sm:$0xff] %v8423_v0  ;;  %v674_v17 = vmul.f32 %v7346_v61, %v8392_v50  ;;  %v1092_v37 = vrot.slane %v987_v22, 2  ;;  %v11577_v40 = vrot.slane %v8427_v42, 3  ;;  %v8504_v13 = vmul.f32 %v7346_v61, %v529_v46 }
 0x109   : > { %11934 = vst [vmem:[#allocation146_spill] sm:$0xff] %v8427_v42  ;;  %11935 = vst [vmem:[#allocation147_spill] sm:$0xff] %v8431_v32  ;;  %v863_v52 = vsel %vm804_vm0, %v11938_v41, %v862_v5  ;;  %v865_v62 = vsel %vm804_vm0, %v862_v5, %v11939_v16  ;;  %v11941_v41 = vrot.slane %v8158_v49, 2  ;;  %v11943_v5 = vrot.slane %v8387_v23, 2 }
 0x10a   : > { %11936 = vst [vmem:[#allocation148_spill] sm:$0xff] %v8436_v33  ;;  %11937 = vst [vmem:[#allocation149_spill] sm:$0xff] %v8440_v39  ;;  %v946_v22 = vadd.f32 %v865_v62, %v674_v17  ;;  %v8458_v20 = vadd.f32 %v863_v52, %v8146_v47  ;;  %v11944_v16 = vrot.slane %v8423_v0, 2  ;;  %v11945_v62 = vrot.slane %v8372_v6, 2  ;;  %v619_v39 = vpop.permute.xlu1 %618 }
 0x10b   : > { %v8463_v9 = vsel %vm1034_vm1, %v11941_v41, %v1092_v37  ;;  %v8476_v52 = vmul.f32 %v7338_v55, %v529_v46  ;;  %v8479_v49 = vmul.f32 %v7340_v56, %v529_v46  ;;  %v11946_v41 = vrot.slane %v8390_v58, 3 }
 0x10c   : > { %11940 = vst [vmem:[#allocation150_spill] sm:$0xff] %v8458_v20  ;;  %11942 = vst [vmem:[#allocation151_spill] sm:$0xff] %v8463_v9  ;;  %v1330_v21 = vsel %vm1034_vm1, %v11944_v16, %v11943_v5  ;;  %v1095_v17 = vsel %vm1034_vm1, %v1092_v37, %v11945_v62  ;;  %v11947_v16 = vrot.slane %v8400_v8, 4  ;;  %v11948_v50 = vrot.slane %v8431_v32, 4  ;;  %v8499_v62 = vpop.permute.xlu0 %523 }
 0x10d   : > { %v1413_v47 = vadd.f32 %v1330_v21, %v8289_v26  ;;  %v1560_v5 = vsel %vm1503_vm2, %v11577_v40, %v11946_v41  ;;  %v8494_v26 = vmul.f32 %v7365_v3, %v529_v46  ;;  %v8497_v21 = vmul.f32 %v7379_v7, %v529_v46  ;;  %11952 = vst [vmem:[#allocation155_spill] sm:$0xff] %v8499_v62 }
 0x10e   : > { %v8491_v37 = vsel %vm1733_vm3, %v11948_v50, %v11947_v16  ;;  %v8501_v60 = vadd.f32 %v1095_v17, %v946_v22  ;;  %v8507_v41 = vmul.f32 %v7389_v10, %v529_v46  ;;  %v8510_v40 = vmul.f32 %v7342_v57, %v529_v46 }
 0x10f   : > { %11949 = vst [vmem:[#allocation152_spill] sm:$0xff] %v8491_v37  ;;  %11950 = vst [vmem:[#allocation153_spill] sm:$0xff] %v8494_v26  ;;  %v8512_v50 = vadd.f32 %v1560_v5, %v1413_v47  ;;  %v8517_v58 = vmul.f32 %v7344_v59, %v529_v46  ;;  %v8522_v23 = vmul.f32 %v7353_v63, %v529_v46  ;;  %v11963_v42 = vrot.slane %v8264_v54, 1 }
 0x110   : > { %11951 = vst [vmem:[#allocation154_spill] sm:$0xff] %v8497_v21  ;;  %11953 = vst [vmem:[#allocation156_spill] sm:$0xff] %v8507_v41  ;;  %v741_v9 = vmul.f32 %v7338_v55, %v8499_v62  ;;  %v971_v47 = vmul.f32 %v7340_v56, %v8499_v62  ;;  %v8530_v5 = vmul.f32 %v7365_v3, %v8499_v62  ;;  %v11964_v63 = vrot.slane %v8476_v52, 1 }
 0x111   : > { %11954 = vst [vmem:[#allocation157_spill] sm:$0xff] %v8510_v40  ;;  %11955 = vst [vmem:[#allocation158_spill] sm:$0xff] %v8512_v50  ;;  %v8534_v8 = vmul.f32 %v7379_v7, %v8499_v62  ;;  %v8538_v17 = vmul.f32 %v7389_v10, %v8499_v62  ;;  %v8543_v22 = vmul.f32 %v7342_v57, %v8499_v62 }
 0x112   : > { %11956 = vst [vmem:[#allocation159_spill] sm:$0xff] %v8517_v58  ;;  %11957 = vst [vmem:[#allocation160_spill] sm:$0xff] %v8522_v23  ;;  %v830_v46 = vrot.slane %v741_v9, 1  ;;  %v8547_v16 = vmul.f32 %v7344_v59, %v8499_v62  ;;  %v658_v37 = vmul.f32 %v7346_v61, %v8499_v62  ;;  %v1060_v50 = vrot.slane %v971_v47, 2 }
 0x113   : > { %11958 = vst [vmem:[#allocation161_spill] sm:$0xff] %v8530_v5  ;;  %11959 = vst [vmem:[#allocation162_spill] sm:$0xff] %v8534_v8  ;;  %v11593_v44 = vrot.slane %v8534_v8, 3  ;;  %v11973_v62 = vrot.slane %v8538_v17, 4  ;;  %v8611_v32 = vmul.f32 %v7346_v61, %v619_v39 }
 0x114   : > { %11960 = vst [vmem:[#allocation163_spill] sm:$0xff] %v8538_v17  ;;  %11961 = vst [vmem:[#allocation164_spill] sm:$0xff] %v8543_v22  ;;  %v831_v9 = vsel %vm804_vm0, %v11963_v42, %v830_v46  ;;  %v833_v0 = vsel %vm804_vm0, %v830_v46, %v11964_v63  ;;  %v11966_v42 = vrot.slane %v8267_v34, 2  ;;  %v11968_v63 = vrot.slane %v8494_v26, 2  ;;  %v8631_v26 = vld [vmem:[%s11725_s1 + $0x8] ss:$0 sm:$0xff]  ;;  %v8671_v22 = vpop.permute.xlu1 %623 }
 0x115   : > { %11962 = vst [vmem:[#allocation165_spill] sm:$0xff] %v8547_v16  ;;  %v930_v47 = vadd.f32 %v833_v0, %v658_v37  ;;  %v8565_v54 = vadd.f32 %v831_v9, %v8243_v12  ;;  %v11969_v46 = vrot.slane %v8530_v5, 2  ;;  %v11970_v0 = vrot.slane %v8479_v49, 2  ;;  %11989 = vst [vmem:[#allocation182_spill] sm:$0xff] %v8671_v22 }
 0x116   : > { %v8570_v40 = vsel %vm1034_vm1, %v11966_v42, %v1060_v50  ;;  %v8583_v9 = vmul.f32 %v7338_v55, %v619_v39  ;;  %v8586_v34 = vmul.f32 %v7340_v56, %v619_v39  ;;  %v11971_v42 = vrot.slane %v8497_v21, 3 }
 0x117   : > { %11965 = vst [vmem:[#allocation166_spill] sm:$0xff] %v8565_v54  ;;  %11967 = vst [vmem:[#allocation167_spill] sm:$0xff] %v8570_v40  ;;  %v1298_v48 = vsel %vm1034_vm1, %v11969_v46, %v11968_v63  ;;  %v1063_v37 = vsel %vm1034_vm1, %v1060_v50, %v11970_v0  ;;  %v11972_v46 = vrot.slane %v8507_v41, 4  ;;  %v8606_v0 = vpop.permute.xlu0 %613  ;;  %v8624_v21 = vmul.f32 %v7344_v59, %v619_v39 }
 0x118   : > { %v1397_v12 = vadd.f32 %v1298_v48, %v8394_v43  ;;  %v1528_v63 = vsel %vm1503_vm2, %v11593_v44, %v11971_v42  ;;  %v8601_v43 = vmul.f32 %v7365_v3, %v619_v39  ;;  %v8604_v48 = vmul.f32 %v7379_v7, %v619_v39  ;;  %11977 = vst [vmem:[#allocation171_spill] sm:$0xff] %v8606_v0 }
 0x119   : > { %v8598_v50 = vsel %vm1733_vm3, %v11973_v62, %v11972_v46  ;;  %v8608_v20 = vadd.f32 %v1063_v37, %v930_v47  ;;  %v8614_v42 = vmul.f32 %v7389_v10, %v619_v39  ;;  %v8617_v44 = vmul.f32 %v7342_v57, %v619_v39  ;;  %11981 = vst [vmem:[#allocation175_spill] sm:$0xff] %v8624_v21 }
 0x11a   : > { %11974 = vst [vmem:[#allocation168_spill] sm:$0xff] %v8598_v50  ;;  %11975 = vst [vmem:[#allocation169_spill] sm:$0xff] %v8601_v43  ;;  %v8619_v62 = vadd.f32 %v1528_v63, %v1397_v12  ;;  %v868_v46 = vrot.slane %v8583_v9, 1  ;;  %v1098_v41 = vrot.slane %v8586_v34, 2  ;;  %v8634_v40 = vmul.f32 %v8631_v26, %v619_v39 }
 0x11b   : > { %11976 = vst [vmem:[#allocation170_spill] sm:$0xff] %v8604_v48  ;;  %11978 = vst [vmem:[#allocation172_spill] sm:$0xff] %v8614_v42  ;;  %v759_v12 = vmul.f32 %v7338_v55, %v8606_v0  ;;  %v989_v9 = vmul.f32 %v7340_v56, %v8606_v0  ;;  %v8642_v34 = vmul.f32 %v7365_v3, %v8606_v0  ;;  %v11993_v16 = vrot.slane %v8601_v43, 2 }
 0x11c   : > { %11979 = vst [vmem:[#allocation173_spill] sm:$0xff] %v8617_v44  ;;  %11980 = vst [vmem:[#allocation174_spill] sm:$0xff] %v8619_v62  ;;  %v8646_v63 = vmul.f32 %v7379_v7, %v8606_v0  ;;  %v8650_v37 = vmul.f32 %v7389_v10, %v8606_v0  ;;  %v8655_v54 = vmul.f32 %v7342_v57, %v8606_v0 }
 0x11d   : > { %11982 = vst [vmem:[#allocation176_spill] sm:$0xff] %v8634_v40  ;;  %11983 = vst [vmem:[#allocation177_spill] sm:$0xff] %v8642_v34  ;;  %v866_v47 = vrot.slane %v759_v12, 1  ;;  %v8659_v50 = vmul.f32 %v7344_v59, %v8606_v0  ;;  %v1096_v8 = vrot.slane %v989_v9, 2  ;;  %v676_v23 = vmul.f32 %v7346_v61, %v8606_v0 }
 0x11e   : > { %11984 = vst [vmem:[#allocation178_spill] sm:$0xff] %v8646_v63  ;;  %11985 = vst [vmem:[#allocation179_spill] sm:$0xff] %v8650_v37  ;;  %v11988_v12 = vrot.slane %v8369_v30, 1  ;;  %v11994_v21 = vrot.slane %v8642_v34, 2  ;;  %v8728_v5 = vmul.f32 %v7342_v57, %v8671_v22 }
 0x11f   : > { %11986 = vst [vmem:[#allocation180_spill] sm:$0xff] %v8655_v54  ;;  %11987 = vst [vmem:[#allocation181_spill] sm:$0xff] %v8659_v50  ;;  %v869_v58 = vsel %vm804_vm0, %v866_v47, %v868_v46  ;;  %v1099_v17 = vsel %vm1034_vm1, %v1096_v8, %v1098_v41 }
 0x120   : > { %v867_v39 = vsel %vm804_vm0, %v11988_v12, %v866_v47  ;;  %v948_v30 = vadd.f32 %v869_v58, %v676_v23  ;;  %v11991_v12 = vrot.slane %v8372_v6, 2  ;;  %v1334_v62 = vsel %vm1034_vm1, %v11994_v21, %v11993_v16  ;;  %12003 = vst [vmem:[#allocation189_spill] sm:$0xff] %v8728_v5 }
 0x121   : > { %v8678_v0 = vadd.f32 %v867_v39, %v8397_v36  ;;  %v1415_v9 = vadd.f32 %v1334_v62, %v8501_v60  ;;  %v8694_v36 = vmul.f32 %v7338_v55, %v8671_v22  ;;  %v8698_v6 = vmul.f32 %v7340_v56, %v8671_v22 }
 0x122   : > { %v8683_v47 = vsel %vm1034_vm1, %v11991_v12, %v1096_v8  ;;  %v11995_v23 = vrot.slane %v8604_v48, 3  ;;  %v11996_v58 = vrot.slane %v8646_v63, 3  ;;  %v8707_v21 = vmul.f32 %v7365_v3, %v8671_v22 }
 0x123   : > { %11990 = vst [vmem:[#allocation183_spill] sm:$0xff] %v8678_v0  ;;  %11992 = vst [vmem:[#allocation184_spill] sm:$0xff] %v8683_v47  ;;  %v8711_v60 = vmul.f32 %v7379_v7, %v8671_v22  ;;  %v8715_v8 = vmul.f32 %v7389_v10, %v8671_v22  ;;  %v12000_v16 = vrot.slane %v8614_v42, 4  ;;  %v12001_v62 = vrot.slane %v8650_v37, 4 }
 0x124   : > { %v1564_v39 = vsel %vm1503_vm2, %v11996_v58, %v11995_v23  ;;  %11997 = vst [vmem:[#allocation185_spill] sm:$0xff] %v8707_v21  ;;  %v11615_v23 = vrot.slane %v8694_v36, 1  ;;  %v8730_v48 = vadd.f32 %v1099_v17, %v948_v30  ;;  %v8736_v42 = vmul.f32 %v7346_v61, %v8671_v22 }
 0x125   : > { %11998 = vst [vmem:[#allocation186_spill] sm:$0xff] %v8711_v60  ;;  %11999 = vst [vmem:[#allocation187_spill] sm:$0xff] %v8715_v8  ;;  %v8722_v12 = vsel %vm1733_vm3, %v12001_v62, %v12000_v16  ;;  %v8732_v43 = vadd.f32 %v1564_v39, %v1415_v9  ;;  %v8740_v16 = vmul.f32 %v7344_v59, %v8671_v22  ;;  %v12006_v39 = vrot.slane %v7686_v15, 1 }
 0x126   : > { %12002 = vst [vmem:[#allocation188_spill] sm:$0xff] %v8722_v12  ;;  %v871_v62 = vsel %vm804_vm0, %v868_v46, %v11615_v23  ;;  %v661_v9 = vmul.f32 %v7346_v61, %v7610_v51  ;;  %v662_v30 = vmul.f32 %v7346_v61, %v7652_v45  ;;  %v12007_v0 = vrot.slane %v7637_v24, 1 }
 0x127   : > { %12004 = vst [vmem:[#allocation190_spill] sm:$0xff] %v8732_v43  ;;  %12005 = vst [vmem:[#allocation191_spill] sm:$0xff] %v8740_v16  ;;  %v12008_v46 = vrot.slane %v7369_v4, 1  ;;  %v12009_v23 = vmov %v12006_v39  ;;  %v12010_v17 = vrot.slane %v8698_v6, 2  ;;  %v12012_v45 = vrot.slane %v7432_v27, 1 }
 0x128   : > { %v839_v22 = vsel %vm804_vm0, %v12007_v0, %v12006_v39  ;;  %v12014_v0 = vrot.slane %v7409_v19, 1  ;;  %v12015_v39 = vrot.slane %v7359_v1, 1  ;;  %v12017_v4 = vrot.slane %v7693_v38, 2  ;;  %v12031_v38 = vld [vmem:[#allocation12_spill] sm:$0xff] }
 0x129   : > { %v841_v47 = vsel %vm804_vm0, %v12009_v23, %v12008_v46  ;;  %v8765_v58 = vsel %vm1034_vm1, %v1098_v41, %v12010_v17  ;;  %v12013_v12 = vmov %v12008_v46  ;;  %v8779_v23 = vadd.f32 %v871_v62, %v8611_v32  ;;  %v12021_v62 = vld [vmem:[#allocation7_spill] sm:$0xff] }
 0x12a   : > { %12011 = vst [vmem:[#allocation192_spill] sm:$0xff] %v8765_v58  ;;  %v843_v43 = vsel %vm804_vm0, %v12013_v12, %v12012_v45  ;;  %v847_v15 = vsel %vm804_vm0, %v12015_v39, %v12014_v0  ;;  %v933_v17 = vadd.f32 %v839_v22, %v661_v9  ;;  %v934_v46 = vadd.f32 %v841_v47, %v662_v30  ;;  %v12026_v9 = vld [vmem:[#allocation13_spill] sm:$0xff] }
 0x12b   : > { %12016 = vst [vmem:[#allocation193_spill] sm:$0xff] %v8779_v23  ;;  %v935_v51 = vadd.f32 %v843_v43, %v7399_v14  ;;  %v937_v27 = vadd.f32 %v847_v15, %v7393_v11  ;;  %v12018_v45 = vrot.slane %v7641_v29, 2  ;;  %v12019_v1 = vrot.slane %v7363_v2, 2 }
 0x12c   : > { %v12020_v12 = vrot.slane %v7436_v28, 2  ;;  %v12022_v0 = vrot.slane %v12021_v62, 2  ;;  %v12023_v22 = vmov %v12017_v4  ;;  %v12027_v30 = vrot.slane %v12026_v9, 2  ;;  %v12033_v62 = vld [vmem:[#allocation19_spill] sm:$0xff] }
 0x12d   : > { %v1069_v19 = vsel %vm1034_vm1, %v12018_v45, %v12017_v4  ;;  %v12028_v39 = vmov %v12019_v1  ;;  %v12029_v4 = vld [vmem:[#allocation24_spill] sm:$0xff]  ;;  %v12034_v41 = vrot.slane %v12033_v62, 2 }
 0x12e   : > { %v1075_v32 = vsel %vm1034_vm1, %v12020_v12, %v12019_v1  ;;  %v1071_v14 = vsel %vm1034_vm1, %v12023_v22, %v12022_v0  ;;  %v12024_v11 = vmov %v12020_v12  ;;  %v12025_v43 = vmov %v12022_v0  ;;  %v12030_v1 = vld [vmem:[#allocation6_spill] sm:$0xff]  ;;  %v12032_v22 = vld [vmem:[#allocation5_spill] sm:$0xff]  ;;  %v12040_v62 = vld [vmem:[#allocation20_spill] sm:$0xff] }
 0x12f   : > { %v1073_v47 = vsel %vm1034_vm1, %v12025_v43, %v12024_v11  ;;  %v1077_v15 = vsel %vm1034_vm1, %v12028_v39, %v12027_v30  ;;  %v1166_v45 = vadd.f32 %v1075_v32, %v12029_v4  ;;  %v1214_v12 = vmul.f32 %v7365_v3, %v12030_v1  ;;  %v12035_v11 = vld [vmem:[#allocation14_spill] sm:$0xff] }
 0x130   : > { %v1215_v0 = vmul.f32 %v7365_v3, %v12031_v38  ;;  %v1216_v28 = vmul.f32 %v7365_v3, %v12032_v22  ;;  %v12036_v43 = vrot.slane %v12035_v11, 2  ;;  %v1163_v2 = vadd.f32 %v1069_v19, %v933_v17 }
 0x131   : > { %v1164_v58 = vadd.f32 %v1071_v14, %v934_v46  ;;  %v12037_v30 = vrot.slane %v7829_v31, 2  ;;  %v12038_v32 = vmov %v12034_v41  ;;  %v1443_v4 = vmul.f32 %v7379_v7, %v12030_v1  ;;  %v12039_v46 = vld [vmem:[#allocation28_spill] sm:$0xff] }
 0x132   : > { %v1314_v9 = vsel %vm1034_vm1, %v12036_v43, %v12034_v41  ;;  %v1165_v23 = vadd.f32 %v1073_v47, %v935_v51  ;;  %v1167_v16 = vadd.f32 %v1077_v15, %v937_v27  ;;  %v1307_v5 = vrot.slane %v1215_v0, 2  ;;  %v12044_v47 = vld [vmem:[#allocation47_spill] sm:$0xff] }
 0x133   : > { %v1316_v39 = vsel %vm1034_vm1, %v12038_v32, %v12037_v30  ;;  %v1309_v37 = vrot.slane %v1216_v28, 2  ;;  %v1305_v63 = vrot.slane %v1214_v12, 2  ;;  %v1405_v34 = vadd.f32 %v1314_v9, %v1166_v45  ;;  %v12042_v30 = vld [vmem:[#allocation15_spill] sm:$0xff] }
 0x134   : > { %v1444_v41 = vmul.f32 %v7379_v7, %v12031_v38  ;;  %v1445_v17 = vmul.f32 %v7379_v7, %v12032_v22  ;;  %v1406_v31 = vadd.f32 %v1316_v39, %v1167_v16  ;;  %v1407_v19 = vadd.f32 %v7896_v18, %v12039_v46  ;;  %v12047_v46 = vld [vmem:[#allocation48_spill] sm:$0xff] }
 0x135   : > { %v1535_v14 = vrot.slane %v1443_v4, 3  ;;  %v12041_v43 = vrot.slane %v12040_v62, 3  ;;  %v12043_v51 = vrot.slane %v12042_v30, 3  ;;  %v12045_v15 = vrot.slane %v12044_v47, 2 }
 0x136   : > { %v1308_v12 = vsel %vm1034_vm1, %v1305_v63, %v1307_v5  ;;  %v1310_v0 = vsel %vm1034_vm1, %v1307_v5, %v1309_v37  ;;  %v12046_v16 = vrot.slane %v12035_v11, 2  ;;  %v1537_v32 = vrot.slane %v1444_v41, 3 }
 0x137   : > { %v1544_v27 = vsel %vm1503_vm2, %v12043_v51, %v12041_v43  ;;  %v8842_v45 = vsel %vm1034_vm1, %v12045_v15, %v1305_v63  ;;  %v1402_v28 = vadd.f32 %v1308_v12, %v1163_v2  ;;  %v1403_v9 = vadd.f32 %v1310_v0, %v1164_v58 }
 0x138   : > { %v1312_v18 = vsel %vm1034_vm1, %v1309_v37, %v12046_v16  ;;  %v1539_v39 = vrot.slane %v1445_v17, 3  ;;  %v12048_v43 = vrot.slane %v12047_v46, 3  ;;  %v12050_v15 = vrot.slane %v7834_v25, 3 }
 0x139   : > { %v1404_v4 = vadd.f32 %v1312_v18, %v1165_v23  ;;  %v12051_v63 = vrot.slane %v12040_v62, 3  ;;  %v1673_v11 = vmul.f32 %v7389_v10, %v12030_v1  ;;  %v12052_v37 = vrot.slane %v7815_v53, 3 }
 0x13a   : > { %v8852_v51 = vsel %vm1503_vm2, %v12048_v43, %v1535_v14  ;;  %v12053_v58 = vmov %v12050_v15  ;;  %v1635_v2 = vadd.f32 %v1544_v27, %v1405_v34  ;;  %v1674_v17 = vmul.f32 %v7389_v10, %v12031_v38 }
 0x13b   : > { %12049 = vst [vmem:[#allocation7_spill] sm:$0xff] %v8852_v51  ;;  %v1546_v5 = vsel %vm1503_vm2, %v12051_v63, %v12050_v15  ;;  %v1548_v23 = vsel %vm1503_vm2, %v12053_v58, %v12052_v37  ;;  %v1538_v12 = vsel %vm1503_vm2, %v1535_v14, %v1537_v32  ;;  %v1540_v62 = vsel %vm1503_vm2, %v1537_v32, %v1539_v39  ;;  %v12055_v63 = vld [vmem:[#allocation21_spill] sm:$0xff]  ;;  %v12057_v37 = vld [vmem:[#allocation16_spill] sm:$0xff] }
 0x13c   : > { %v1636_v41 = vadd.f32 %v1546_v5, %v1406_v31  ;;  %v1637_v0 = vadd.f32 %v1548_v23, %v1407_v19  ;;  %v1675_v16 = vmul.f32 %v7389_v10, %v12032_v22  ;;  %v12054_v1 = vrot.slane %v12042_v30, 3  ;;  %v12061_v23 = vld [vmem:[#allocation58_spill] sm:$0xff] }
 0x13d   : > { %v1632_v25 = vadd.f32 %v1538_v12, %v1402_v28  ;;  %v1633_v43 = vadd.f32 %v1540_v62, %v1403_v9  ;;  %v1767_v15 = vrot.slane %v1674_v17, 4  ;;  %v1765_v31 = vrot.slane %v1673_v11, 4  ;;  %v12064_v17 = vld [vmem:[#allocation49_spill] sm:$0xff] }
 0x13e   : > { %v1542_v18 = vsel %vm1503_vm2, %v1539_v39, %v12054_v1  ;;  %v1769_v27 = vrot.slane %v1675_v16, 4  ;;  %v12056_v5 = vrot.slane %v12055_v63, 4  ;;  %v12058_v14 = vrot.slane %v12057_v37, 4 }
 0x13f   : > { %v1634_v34 = vadd.f32 %v1542_v18, %v1404_v4  ;;  %v12059_v19 = vrot.slane %v7843_v35, 4  ;;  %v12062_v39 = vrot.slane %v12061_v23, 4  ;;  %v8892_v11 = vmul.f32 %v7342_v57, %v12032_v22  ;;  %v12067_v18 = vld [vmem:[#allocation11_spill] sm:$0xff] }
 0x140   : > { %v1774_v32 = vsel %vm1733_vm3, %v12058_v14, %v12056_v5  ;;  %v12060_v58 = vmov %v12056_v5  ;;  %v12065_v12 = vrot.slane %v12064_v17, 4  ;;  %v1768_v16 = vsel %vm1733_vm3, %v1765_v31, %v1767_v15  ;;  %v12068_v14 = vld [vmem:[#allocation17_spill] sm:$0xff] }
 0x141   : > { %v1776_v30 = vsel %vm1733_vm3, %v12060_v58, %v12059_v19  ;;  %v12063_v28 = vmov %v12059_v19  ;;  %v1865_v4 = vadd.f32 %v1774_v32, %v1635_v2  ;;  %v1914_v63 = vmul.f32 %v7342_v57, %v12067_v18  ;;  %v12069_v32 = vld [vmem:[#allocation55_spill] sm:$0xff]  ;;  %v12070_v58 = vld [vmem:[#allocation54_spill] sm:$0xff] }
 0x142   : > { %v1778_v9 = vsel %vm1733_vm3, %v12063_v28, %v12062_v39  ;;  %v8897_v62 = vsel %vm1733_vm3, %v12065_v12, %v1765_v31  ;;  %v1866_v1 = vadd.f32 %v1776_v30, %v1636_v41  ;;  %v1770_v35 = vsel %vm1733_vm3, %v1767_v15, %v1769_v27  ;;  %v12071_v28 = vld [vmem:[#allocation74_spill] sm:$0xff] }
 0x143   : > { %12066 = vst [vmem:[#allocation13_spill] sm:$0xff] %v8897_v62  ;;  %v1862_v5 = vadd.f32 %v1768_v16, %v1632_v25  ;;  %v1915_v2 = vmul.f32 %v7342_v57, %v12068_v14  ;;  %v1916_v19 = vmul.f32 %v7342_v57, %v12069_v32  ;;  %v1917_v39 = vmul.f32 %v7342_v57, %v12070_v58 }
 0x144   : > { %v1918_v12 = vmul.f32 %v7342_v57, %v12071_v28  ;;  %v11626_v41 = vrot.slane %v8892_v11, 4  ;;  %v2006_v31 = vrot.slane %v1914_v63, 4  ;;  %v12072_v30 = vrot.slane %v12057_v37, 4 }
 0x145   : > { %v1863_v25 = vadd.f32 %v1770_v35, %v1633_v43  ;;  %v2008_v16 = vrot.slane %v1915_v2, 4  ;;  %v2010_v62 = vrot.slane %v1916_v19, 4  ;;  %v2012_v51 = vrot.slane %v1917_v39, 4  ;;  %v12073_v39 = vld [vmem:[#allocation81_spill] sm:$0xff] }
 0x146   : > { %v1772_v15 = vsel %vm1733_vm3, %v1769_v27, %v12072_v30  ;;  %v2014_v46 = vrot.slane %v1918_v12, 4  ;;  %v8917_v47 = vmul.f32 %v7344_v59, %v12032_v22  ;;  %v2007_v40 = vsel %vm1733_vm3, %v11626_v41, %v2006_v31 }
 0x147   : > { %v1864_v17 = vadd.f32 %v1772_v15, %v1634_v34  ;;  %v2011_v63 = vsel %vm1733_vm3, %v2008_v16, %v2010_v62  ;;  %v2143_v37 = vmul.f32 %v7344_v59, %v12067_v18  ;;  %v2144_v43 = vmul.f32 %v7344_v59, %v12068_v14 }
 0x148   : > { %v1867_v27 = vadd.f32 %v1778_v9, %v1637_v0  ;;  %v2009_v34 = vsel %vm1733_vm3, %v2006_v31, %v2008_v16  ;;  %v2013_v35 = vsel %vm1733_vm3, %v2010_v62, %v2012_v51  ;;  %v2101_v2 = vadd.f32 %v2007_v40, %v1862_v5 }
 0x149   : > { %v2015_v19 = vsel %vm1733_vm3, %v2012_v51, %v2014_v46  ;;  %v12074_v12 = vrot.slane %v12073_v39, 4  ;;  %v2102_v15 = vadd.f32 %v2009_v34, %v1863_v25  ;;  %v2103_v41 = vadd.f32 %v2011_v63, %v1864_v17 }
 0x14a   : > { %v2145_v50 = vmul.f32 %v7344_v59, %v12069_v32  ;;  %v2146_v54 = vmul.f32 %v7344_v59, %v12070_v58  ;;  %v2147_v0 = vmul.f32 %v7344_v59, %v12071_v28  ;;  %v2104_v9 = vadd.f32 %v2013_v35, %v1865_v4 }
 0x14b   : > { %v2017_v30 = vsel %vm1733_vm3, %v2014_v46, %v12074_v12  ;;  %v2234_v40 = vrot.slane %v8917_v47, 5  ;;  %v2236_v51 = vrot.slane %v2143_v37, 5  ;;  %v2238_v62 = vrot.slane %v2144_v43, 5 }
 0x14c   : > { %v2105_v5 = vadd.f32 %v2015_v19, %v1866_v1  ;;  %v2240_v31 = vrot.slane %v2145_v50, 5  ;;  %v2242_v46 = vrot.slane %v2146_v54, 5  ;;  %v2244_v25 = vrot.slane %v2147_v0, 5  ;;  %v12076_v50 = vld [vmem:[#allocation82_spill] sm:$0xff] }
 0x14d   : > { %v2106_v17 = vadd.f32 %v2017_v30, %v1867_v27  ;;  %v2237_v16 = vsel %vm2202_vm4, %v2234_v40, %v2236_v51  ;;  %v2239_v63 = vsel %vm2202_vm4, %v2236_v51, %v2238_v62  ;;  %v8946_v34 = vmul.f32 %v8631_v26, %v12031_v38 }
 0x14e   : > { %v2241_v4 = vsel %vm2202_vm4, %v2238_v62, %v2240_v31  ;;  %v2243_v37 = vsel %vm2202_vm4, %v2240_v31, %v2242_v46  ;;  %v2245_v1 = vsel %vm2202_vm4, %v2242_v46, %v2244_v25  ;;  %v8953_v54 = vmul.f32 %v8631_v26, %v12032_v22 }
 0x14f   : > { %12075 = vst [vmem:[#allocation24_spill] sm:$0xff] %v8946_v34  ;;  %v12077_v43 = vrot.slane %v12076_v50, 5  ;;  %v2331_v35 = vadd.f32 %v2237_v16, %v2101_v2  ;;  %v2332_v19 = vadd.f32 %v2239_v63, %v2102_v15  ;;  %v2333_v12 = vadd.f32 %v2241_v4, %v2103_v41  ;;  %v12079_v16 = vld [vmem:[#allocation22_spill] sm:$0xff] }
 0x150   : > { %v2334_v30 = vadd.f32 %v2243_v37, %v2104_v9  ;;  %v2335_v38 = vadd.f32 %v2245_v1, %v2105_v5  ;;  %v2373_v0 = vmul.f32 %v8631_v26, %v12067_v18  ;;  %v2374_v51 = vmul.f32 %v8631_v26, %v12068_v14 }
 0x151   : > { %v2247_v27 = vsel %vm2202_vm4, %v2244_v25, %v12077_v43  ;;  %v2375_v62 = vmul.f32 %v8631_v26, %v12069_v32  ;;  %v2376_v22 = vmul.f32 %v8631_v26, %v12070_v58  ;;  %v2377_v31 = vmul.f32 %v8631_v26, %v12071_v28  ;;  %v12078_v25 = vld [vmem:[#allocation83_spill] sm:$0xff]  ;;  %v8974_v28 = vpop.permute.xlu0 %533  ;;  %v8985_v43 = vld [vmem:[%s11393_s2] ss:$0 sm:$0xff] }
 0x152   : > { %v2336_v2 = vadd.f32 %v2247_v27, %v2106_v17  ;;  %v2464_v41 = vrot.slane %v8953_v54, 6  ;;  %v2466_v15 = vrot.slane %v2373_v0, 6  ;;  %v2468_v9 = vrot.slane %v2374_v51, 6  ;;  %12080 = vst [vmem:[#allocation6_spill] sm:$0xff] %v8974_v28 }
 0x153   : > { %v2470_v5 = vrot.slane %v2375_v62, 6  ;;  %v2472_v18 = vrot.slane %v2376_v22, 6  ;;  %v2474_v46 = vrot.slane %v2377_v31, 6  ;;  %v11631_v14 = vrot.slane %v12078_v25, 6 }
 0x154   : > { %v11632_v63 = vrot.slane %v12079_v16, 5  ;;  %v11633_v32 = vrot.slane %v8946_v34, 6  ;;  %v2467_v58 = vsel %vm2432_vm5, %v2464_v41, %v2466_v15  ;;  %v2469_v4 = vsel %vm2432_vm5, %v2466_v15, %v2468_v9  ;;  %v12133_v16 = vld [vmem:[#allocation36_spill] sm:$0xff] }
 0x155   : > { %v2471_v17 = vsel %vm2432_vm5, %v2468_v9, %v2470_v5  ;;  %v2473_v37 = vsel %vm2432_vm5, %v2470_v5, %v2472_v18  ;;  %v2475_v1 = vsel %vm2432_vm5, %v2472_v18, %v2474_v46  ;;  %v2477_v54 = vsel %vm2432_vm5, %v2474_v46, %v11631_v14 }
 0x156   : > { %v2561_v27 = vadd.f32 %v2467_v58, %v2331_v35  ;;  %v2562_v0 = vadd.f32 %v2469_v4, %v2332_v19  ;;  %v2563_v51 = vadd.f32 %v2471_v17, %v2333_v12  ;;  %v2564_v62 = vadd.f32 %v2473_v37, %v2334_v30 }
 0x157   : > { %v2565_v22 = vadd.f32 %v2475_v1, %v2335_v38  ;;  %v2566_v31 = vadd.f32 %v2477_v54, %v2336_v2  ;;  %v743_v15 = vmul.f32 %v7338_v55, %v8974_v28  ;;  %v973_v9 = vmul.f32 %v7340_v56, %v8974_v28 }
 0x158   : > { %v2605_v5 = vadd.f32 %v8985_v43, %v2561_v27  ;;  %v2606_v18 = vadd.f32 %v8985_v43, %v2562_v0  ;;  %v2607_v46 = vadd.f32 %v8985_v43, %v2563_v51  ;;  %v2608_v14 = vadd.f32 %v8985_v43, %v2564_v62 }
 0x159   : > { %v2609_v35 = vadd.f32 %v8985_v43, %v2565_v22  ;;  %v8997_v19 = vadd.f32 %v8985_v43, %v2566_v31  ;;  %v660_v12 = vmul.f32 %v7346_v61, %v8974_v28  ;;  %v834_v30 = vrot.slane %v743_v15, 1  ;;  %v12085_v15 = vld [vmem:[#allocation18_spill] sm:$0xff] }
 0x15a   : > { %v2642_v38 = vmax.f32 %v2605_v5, 0.0  ;;  %v2643_v2 = vmax.f32 %v2606_v18, 0.0  ;;  %v2644_v58 = vmax.f32 %v2607_v46, 0.0  ;;  %v2645_v4 = vmax.f32 %v2608_v14, 0.0 }
 0x15b   : > { %12081 = vst [vmem:[#allocation12_spill] sm:$0xff] %v8997_v19  ;;  %v2646_v17 = vmax.f32 %v2609_v35, 0.0  ;;  %v11634_v37 = vmax.f32 %v8997_v19, 0.0  ;;  %v12082_v1 = vrot.slane %v7637_v24, 1  ;;  %v1064_v27 = vrot.slane %v973_v9, 2 }
 0x15c   : > { %v9005_v0 = vrot.slane %v2642_v38, 1  ;;  %v2731_v51 = vrot.slane %v2643_v2, 1  ;;  %v2733_v62 = vrot.slane %v2644_v58, 1  ;;  %v2735_v22 = vrot.slane %v2645_v4, 1 }
 0x15d   : > { %v837_v54 = vsel %vm804_vm0, %v834_v30, %v12082_v1  ;;  %v12084_v31 = vrot.slane %v8892_v11, 4  ;;  %v12086_v5 = vrot.slane %v12085_v15, 4  ;;  %v2737_v14 = vrot.slane %v2646_v17, 1 }
 0x15e   : > { %12083 = vst [vmem:[#allocation5_spill] sm:$0xff] %v9005_v0  ;;  %v9016_v46 = vrot.slane %v11634_v37, 1  ;;  %v932_v24 = vadd.f32 %v837_v54, %v660_v12  ;;  %v9023_v9 = vsel %vm2202_vm4, %v11632_v63, %v2234_v40  ;;  %v2732_v11 = vsel %vm804_vm0, %v9005_v0, %v2731_v51 }
 0x15f   : > { %v9012_v18 = vsel %vm1733_vm3, %v12086_v5, %v12084_v31  ;;  %12088 = vst [vmem:[#allocation14_spill] sm:$0xff] %v9023_v9  ;;  %v2734_v35 = vsel %vm804_vm0, %v2731_v51, %v2733_v62  ;;  %v2736_v1 = vsel %vm804_vm0, %v2733_v62, %v2735_v22  ;;  %v9032_v31 = vsel %vm2432_vm5, %v11633_v32, %v2464_v41 }
 0x160   : > { %12087 = vst [vmem:[#allocation19_spill] sm:$0xff] %v9012_v18  ;;  %12089 = vst [vmem:[#allocation28_spill] sm:$0xff] %v9032_v31  ;;  %v2738_v12 = vsel %vm804_vm0, %v2735_v22, %v2737_v14  ;;  %v2740_v47 = vsel %vm804_vm0, %v2737_v14, %v9016_v46  ;;  %v12090_v40 = vrot.slane %v8476_v52, 1  ;;  %v9040_v5 = vmax.f32 %v2644_v58, %v2736_v1  ;;  %v12109_v31 = vld [vmem:[#allocation42_spill] sm:$0xff] }
 0x161   : > { %v9042_v63 = vmax.f32 %v2645_v4, %v2738_v12  ;;  %v9044_v51 = vmax.f32 %v2646_v17, %v2740_v47  ;;  %v12094_v62 = vrot.slane %v7641_v29, 2  ;;  %v9049_v32 = vmax.f32 %v2642_v38, %v2732_v11  ;;  %v12104_v47 = vld [vmem:[#allocation39_spill] sm:$0xff] }
 0x162   : > { %v835_v54 = vsel %vm804_vm0, %v12090_v40, %v834_v30  ;;  %12091 = vst [vmem:[#allocation20_spill] sm:$0xff] %v9040_v5  ;;  %v9051_v22 = vmax.f32 %v2643_v2, %v2734_v35  ;;  %v9055_v52 = vmul.f32 %v7365_v3, %v8974_v28  ;;  %v11635_v30 = vrot.slane %v9040_v5, 2 }
 0x163   : > { %12092 = vst [vmem:[#allocation15_spill] sm:$0xff] %v9042_v63  ;;  %12093 = vst [vmem:[#allocation21_spill] sm:$0xff] %v9044_v51  ;;  %v1067_v41 = vsel %vm1034_vm1, %v1064_v27, %v12094_v62  ;;  %v2915_v58 = vrot.slane %v9042_v63, 2  ;;  %v11636_v4 = vrot.slane %v9044_v51, 2  ;;  %v9062_v29 = vmul.f32 %v7379_v7, %v8974_v28 }
 0x164   : > { %12095 = vst [vmem:[#allocation16_spill] sm:$0xff] %v9049_v32  ;;  %12096 = vst [vmem:[#allocation58_spill] sm:$0xff] %v9051_v22  ;;  %v1162_v37 = vadd.f32 %v1067_v41, %v932_v24  ;;  %v11638_v38 = vrot.slane %v9055_v52, 2  ;;  %v9070_v17 = vmul.f32 %v7389_v10, %v8974_v28  ;;  %v9074_v14 = vmul.f32 %v7342_v57, %v8974_v28 }
 0x165   : > { %12097 = vst [vmem:[#allocation11_spill] sm:$0xff] %v9055_v52  ;;  %12098 = vst [vmem:[#allocation17_spill] sm:$0xff] %v9062_v29  ;;  %v2916_v24 = vsel %vm1034_vm1, %v11635_v30, %v2915_v58  ;;  %v2918_v11 = vsel %vm1034_vm1, %v2915_v58, %v11636_v4  ;;  %v12105_v40 = vrot.slane %v12104_v47, 2  ;;  %v9099_v30 = vadd.f32 %v835_v54, %v8504_v13  ;;  %v12113_v54 = vld [vmem:[#allocation43_spill] sm:$0xff]  ;;  %v12165_v52 = vld [vmem:[#allocation30_spill] sm:$0xff] }
 0x166   : > { %v9066_v2 = vadd.f32 %v8842_v45, %v1162_v37  ;;  %12100 = vst [vmem:[#allocation54_spill] sm:$0xff] %v9070_v17  ;;  %12101 = vst [vmem:[#allocation74_spill] sm:$0xff] %v9074_v14  ;;  %v9085_v45 = vmul.f32 %v7344_v59, %v8974_v28  ;;  %v9087_v37 = vpop.permute.xlu1 %633  ;;  %v3001_v1 = vmax.f32 %v9049_v32, %v2916_v24  ;;  %v11639_v41 = vrot.slane %v9070_v17, 4  ;;  %v12127_v32 = vld [vmem:[#allocation25_spill] sm:$0xff]  ;;  %v12167_v28 = vld [vmem:[#allocation68_spill] sm:$0xff] }
 0x167   : > { %12103 = vst [vmem:[#allocation82_spill] sm:$0xff] %v9087_v37  ;;  %v3002_v12 = vmax.f32 %v9051_v22, %v2918_v11  ;;  %v1302_v62 = vsel %vm1034_vm1, %v11638_v38, %v12105_v40  ;;  %12106 = vst [vmem:[#allocation83_spill] sm:$0xff] %v9099_v30  ;;  %v12107_v4 = vrot.slane %v8479_v49, 2  ;;  %v12110_v9 = vrot.slane %v12109_v31, 3  ;;  %v12122_v11 = vld [vmem:[#allocation40_spill] sm:$0xff]  ;;  %v12140_v30 = vld [vmem:[#allocation37_spill] sm:$0xff] }
 0x168   : > { %12099 = vst [vmem:[#allocation55_spill] sm:$0xff] %v9066_v2  ;;  %12102 = vst [vmem:[#allocation81_spill] sm:$0xff] %v9085_v45  ;;  %v1399_v24 = vadd.f32 %v1302_v62, %v8608_v20  ;;  %v12111_v40 = vrot.slane %v9062_v29, 3  ;;  %v9115_v13 = vmul.f32 %v7365_v3, %v9087_v37  ;;  %v12114_v49 = vrot.slane %v12113_v54, 4  ;;  %v12119_v62 = vld [vmem:[#allocation27_spill] sm:$0xff]  ;;  %v12135_v54 = vld [vmem:[#allocation52_spill] sm:$0xff] }
 0x169   : > { %v9104_v35 = vsel %vm1034_vm1, %v12107_v4, %v1064_v27  ;;  %v6854_v0 = vpack.c.bf16 %v3002_v12, %v3001_v1  ;;  %v9128_v1 = vmul.f32 %v7379_v7, %v9087_v37  ;;  %v9134_v12 = vmul.f32 %v7338_v55, %v9087_v37 }
 0x16a   : > { %12108 = vst [vmem:[#allocation194_spill] sm:$0xff] %v9104_v35  ;;  %v1532_v38 = vsel %vm1503_vm2, %v12111_v40, %v12110_v9  ;;  %12112 = vst [vmem:[#allocation195_spill] sm:$0xff] %v9115_v13  ;;  %v9122_v27 = vsel %vm1733_vm3, %v11639_v41, %v12114_v49  ;;  %v12120_v40 = vld [vmem:[#allocation34_spill] sm:$0xff]  ;;  %v12121_v49 = vld [vmem:[#allocation31_spill] sm:$0xff]  ;;  %v9143_v4 = vmul.f32 %v7389_v10, %v9087_v37  ;;  %v12128_v22 = vrot.slane %v12127_v32, 2 }
 0x16b   : > { %12115 = vst [vmem:[#allocation196_spill] sm:$0xff] %v9122_v27  ;;  %12116 = vst [vmem:[#allocation197_spill] sm:$0xff] %v9128_v1  ;;  %6855 = vmatprep.subr.bf16.mxu0 %v6854_v0  ;;  %v9130_v9 = vadd.f32 %v1532_v38, %v1399_v24  ;;  %v920_v58 = vadd.f32 %v12120_v40, %v12119_v62  ;;  %v921_v41 = vadd.f32 %v12122_v11, %v12121_v49  ;;  %v12125_v38 = vld [vmem:[#allocation29_spill] sm:$0xff]  ;;  %v12130_v11 = vld [vmem:[#allocation32_spill] sm:$0xff] }
 0x16c   : > { %12118 = vst [vmem:[#allocation199_spill] sm:$0xff] %v9134_v12  ;;  %12123 = vst [vmem:[#allocation27_spill] sm:$0xff] %v9143_v4  ;;  %v9147_v0 = vmul.f32 %v7342_v57, %v9087_v37  ;;  %v12126_v24 = vrot.slane %v12125_v38, 2  ;;  %v9156_v62 = vmul.f32 %v7344_v59, %v9087_v37  ;;  %v12131_v40 = vrot.slane %v12130_v11, 2  ;;  %v12142_v27 = vld [vmem:[#allocation33_spill] sm:$0xff]  ;;  %v12149_v32 = vld [vmem:[#allocation35_spill] sm:$0xff] }
 0x16d   : > { %12117 = vst [vmem:[#allocation198_spill] sm:$0xff] %v9130_v9  ;;  %v12134_v15 = vrot.slane %v12133_v16, 2  ;;  %v12136_v2 = vrot.slane %v12135_v54, 2  ;;  %v12141_v38 = vrot.slane %v12140_v30, 3  ;;  %v12150_v16 = vrot.slane %v12149_v32, 4  ;;  %v12151_v9 = vld [vmem:[#allocation53_spill] sm:$0xff] }
 0x16e   : > { %12124 = vst [vmem:[#allocation34_spill] sm:$0xff] %v9147_v0  ;;  %v1043_v34 = vsel %vm1034_vm1, %v12128_v22, %v12126_v24  ;;  %12129 = vst [vmem:[#allocation31_spill] sm:$0xff] %v9156_v62  ;;  %v12132_v49 = vmov %v12126_v24  ;;  %v12137_v24 = vld [vmem:[#allocation69_spill] sm:$0xff]  ;;  %v1980_v45 = vrot.slane %v12167_v28, 4  ;;  %v2358_v33 = vmul.f32 %v8631_v26, %v12165_v52 }
 0x16f   : > { %v1045_v20 = vsel %vm1034_vm1, %v12132_v49, %v12131_v40  ;;  %v1150_v18 = vadd.f32 %v1043_v34, %v920_v58  ;;  %v1282_v31 = vsel %vm1034_vm1, %v12136_v2, %v12134_v15  ;;  %v12138_v47 = vrot.slane %v12137_v24, 2  ;;  %v12144_v49 = vld [vmem:[#allocation70_spill] sm:$0xff] }
 0x170   : > { %v1151_v22 = vadd.f32 %v1045_v20, %v921_v41  ;;  %v12139_v35 = vmov %v12134_v15  ;;  %v12143_v40 = vrot.slane %v12142_v27, 3  ;;  %v12145_v54 = vrot.slane %v12144_v49, 3  ;;  %v12147_v41 = vld [vmem:[#allocation78_spill] sm:$0xff]  ;;  %v12148_v20 = vld [vmem:[#allocation77_spill] sm:$0xff] }
 0x171   : > { %v1284_v11 = vsel %vm1034_vm1, %v12139_v35, %v12138_v47  ;;  %v1389_v58 = vadd.f32 %v1282_v31, %v1150_v18  ;;  %v12146_v15 = vmov %v12141_v38  ;;  %v1621_v24 = vadd.f32 %v12148_v20, %v12147_v41  ;;  %v12153_v27 = vld [vmem:[#allocation38_spill] sm:$0xff] }
 0x172   : > { %v1512_v34 = vsel %vm1503_vm2, %v12143_v40, %v12141_v38  ;;  %v1514_v2 = vsel %vm1503_vm2, %v12146_v15, %v12145_v54  ;;  %v12152_v35 = vrot.slane %v12151_v9, 4  ;;  %v1390_v17 = vadd.f32 %v1284_v11, %v1151_v22  ;;  %v12156_v38 = vld [vmem:[#allocation71_spill] sm:$0xff]  ;;  %v12162_v22 = vld [vmem:[#allocation56_spill] sm:$0xff] }
 0x173   : > { %v12154_v29 = vrot.slane %v12153_v27, 4  ;;  %v12155_v18 = vmov %v12150_v16  ;;  %v12157_v30 = vrot.slane %v12156_v38, 4  ;;  %v12159_v54 = vld [vmem:[#allocation67_spill] sm:$0xff]  ;;  %v1619_v20 = vadd.f32 %v1512_v34, %v1389_v58  ;;  %v12168_v34 = vld [vmem:[#allocation101_spill] sm:$0xff] }
 0x174   : > { %v1740_v47 = vsel %vm1733_vm3, %v12152_v35, %v12150_v16  ;;  %v12160_v15 = vrot.slane %v12159_v54, 4  ;;  %v12163_v16 = vld [vmem:[#allocation23_spill] sm:$0xff]  ;;  %v12164_v35 = vld [vmem:[#allocation26_spill] sm:$0xff]  ;;  %v1899_v27 = vmul.f32 %v7342_v57, %v12165_v52  ;;  %v1982_v58 = vrot.slane %v12168_v34, 4 }
 0x175   : > { %v1742_v31 = vsel %vm1733_vm3, %v12155_v18, %v12154_v29  ;;  %v12158_v40 = vmov %v12154_v29  ;;  %v12161_v41 = vmov %v12157_v30  ;;  %v1848_v11 = vadd.f32 %v1740_v47, %v12162_v22 }
 0x176   : > { %v1744_v49 = vsel %vm1733_vm3, %v12158_v40, %v12157_v30  ;;  %v1746_v9 = vsel %vm1733_vm3, %v12161_v41, %v12160_v15  ;;  %v1897_v32 = vmul.f32 %v7342_v57, %v12163_v16  ;;  %v1898_v29 = vmul.f32 %v7342_v57, %v12164_v35  ;;  %v12166_v30 = vld [vmem:[#allocation72_spill] sm:$0xff] }
 0x177   : > { %v1620_v18 = vadd.f32 %v1514_v2, %v1390_v17  ;;  %v1978_v40 = vrot.slane %v12166_v30, 4  ;;  %v1851_v38 = vadd.f32 %v1746_v9, %v1621_v24  ;;  %v1849_v47 = vadd.f32 %v1742_v31, %v1619_v20  ;;  %v12169_v2 = vld [vmem:[#allocation93_spill] sm:$0xff]  ;;  %v12171_v31 = vld [vmem:[#allocation66_spill] sm:$0xff] }
 0x178   : > { %v1973_v14 = vrot.slane %v1897_v32, 4  ;;  %v1974_v15 = vrot.slane %v1898_v29, 4  ;;  %v1976_v22 = vrot.slane %v1899_v27, 4  ;;  %v1983_v17 = vsel %vm1733_vm3, %v1980_v45, %v1982_v58  ;;  %v12172_v32 = vld [vmem:[#allocation60_spill] sm:$0xff]  ;;  %v12173_v27 = vld [vmem:[#allocation65_spill] sm:$0xff] }
 0x179   : > { %v1850_v41 = vadd.f32 %v1744_v49, %v1620_v18  ;;  %v1981_v44 = vsel %vm1733_vm3, %v1978_v40, %v1980_v45  ;;  %v12170_v37 = vrot.slane %v12169_v2, 4  ;;  %v2126_v28 = vmul.f32 %v7344_v59, %v12163_v16 }
 0x17a   : > { %v1975_v12 = vsel %vm1733_vm3, %v1973_v14, %v1974_v15  ;;  %v1977_v24 = vsel %vm1733_vm3, %v1974_v15, %v1976_v22  ;;  %v1979_v9 = vsel %vm1733_vm3, %v1976_v22, %v1978_v40  ;;  %v2088_v20 = vadd.f32 %v1981_v44, %v1849_v47  ;;  %v12175_v40 = vld [vmem:[#allocation92_spill] sm:$0xff] }
 0x17b   : > { %v1985_v30 = vsel %vm1733_vm3, %v1982_v58, %v12170_v37  ;;  %v2085_v49 = vadd.f32 %v1975_v12, %v12171_v31  ;;  %v2086_v29 = vadd.f32 %v1977_v24, %v12172_v32  ;;  %v2087_v18 = vadd.f32 %v1979_v9, %v1848_v11  ;;  %v12174_v58 = vld [vmem:[#allocation59_spill] sm:$0xff] }
 0x17c   : > { %v2089_v14 = vadd.f32 %v1983_v17, %v1850_v41  ;;  %v2127_v45 = vmul.f32 %v7344_v59, %v12164_v35  ;;  %v2128_v37 = vmul.f32 %v7344_v59, %v12165_v52  ;;  %v2129_v34 = vmul.f32 %v7344_v59, %v12173_v27 }
 0x17d   : > { %v2130_v15 = vmul.f32 %v7344_v59, %v12174_v58  ;;  %v2131_v12 = vmul.f32 %v7344_v59, %v12175_v40  ;;  %v2090_v44 = vadd.f32 %v1985_v30, %v1851_v38  ;;  %v2203_v47 = vrot.slane %v2126_v28, 5 }
 0x17e   : > { %v2204_v22 = vrot.slane %v2127_v45, 5  ;;  %v2356_v11 = vmul.f32 %v8631_v26, %v12163_v16  ;;  %v2206_v41 = vrot.slane %v2128_v37, 5  ;;  %v2208_v17 = vrot.slane %v2129_v34, 5  ;;  %v12176_v34 = vld [vmem:[#allocation94_spill] sm:$0xff] }
 0x17f   : > { %v2210_v24 = vrot.slane %v2130_v15, 5  ;;  %v2212_v9 = vrot.slane %v2131_v12, 5  ;;  %v2357_v32 = vmul.f32 %v8631_v26, %v12164_v35  ;;  %v2359_v38 = vmul.f32 %v8631_v26, %v12173_v27 }
 0x180   : > { %v2205_v31 = vsel %vm2202_vm4, %v2203_v47, %v2204_v22  ;;  %v2207_v30 = vsel %vm2202_vm4, %v2204_v22, %v2206_v41  ;;  %v2209_v28 = vsel %vm2202_vm4, %v2206_v41, %v2208_v17  ;;  %v2360_v45 = vmul.f32 %v8631_v26, %v12174_v58  ;;  %v12199_v58 = vld [vmem:[#allocation84_spill] sm:$0xff] }
 0x181   : > { %v2211_v16 = vsel %vm2202_vm4, %v2208_v17, %v2210_v24  ;;  %v2213_v37 = vsel %vm2202_vm4, %v2210_v24, %v2212_v9  ;;  %v12177_v15 = vrot.slane %v12176_v34, 5  ;;  %v2315_v12 = vadd.f32 %v2205_v31, %v2085_v49 }
 0x182   : > { %v2316_v52 = vadd.f32 %v2207_v30, %v2086_v29  ;;  %v2317_v47 = vadd.f32 %v2209_v28, %v2087_v18  ;;  %v2318_v63 = vadd.f32 %v2211_v16, %v2088_v20  ;;  %v2319_v27 = vadd.f32 %v2213_v37, %v2089_v14  ;;  %v629_v18 = vpop.permute.xlu0 %628 }
 0x183   : > { %v2215_v35 = vsel %vm2202_vm4, %v2212_v9, %v12177_v15  ;;  %v2361_v22 = vmul.f32 %v8631_v26, %v12175_v40  ;;  %v2433_v41 = vrot.slane %v2356_v11, 6  ;;  %v2434_v5 = vrot.slane %v2357_v32, 6 }
 0x184   : > { %v2436_v17 = vrot.slane %v2358_v33, 6  ;;  %v2438_v51 = vrot.slane %v2359_v38, 6  ;;  %v2320_v1 = vadd.f32 %v2215_v35, %v2090_v44  ;;  %v2440_v24 = vrot.slane %v2360_v45, 6  ;;  %v12178_v33 = vld [vmem:[#allocation97_spill] sm:$0xff] }
 0x185   : > { %v2442_v19 = vrot.slane %v2361_v22, 6  ;;  %v2435_v49 = vsel %vm2432_vm5, %v2433_v41, %v2434_v5  ;;  %v12179_v11 = vrot.slane %v12178_v33, 6  ;;  %v9271_v45 = vmul.f32 %v7338_v55, %v629_v18 }
 0x186   : > { %v2437_v29 = vsel %vm2432_vm5, %v2434_v5, %v2436_v17  ;;  %v2439_v20 = vsel %vm2432_vm5, %v2436_v17, %v2438_v51  ;;  %v2441_v14 = vsel %vm2432_vm5, %v2438_v51, %v2440_v24  ;;  %v2545_v44 = vadd.f32 %v2435_v49, %v2315_v12 }
 0x187   : > { %v2443_v40 = vsel %vm2432_vm5, %v2440_v24, %v2442_v19  ;;  %v2445_v9 = vsel %vm2432_vm5, %v2442_v19, %v12179_v11  ;;  %v2546_v31 = vadd.f32 %v2437_v29, %v2316_v52  ;;  %v2547_v32 = vadd.f32 %v2439_v20, %v2317_v47 }
 0x188   : > { %v2548_v38 = vadd.f32 %v2441_v14, %v2318_v63  ;;  %v2549_v30 = vadd.f32 %v2443_v40, %v2319_v27  ;;  %v2550_v16 = vadd.f32 %v2445_v9, %v2320_v1  ;;  %v2589_v5 = vadd.f32 %v8985_v43, %v2545_v44 }
 0x189   : > { %v2590_v51 = vadd.f32 %v8985_v43, %v2546_v31  ;;  %v2591_v37 = vadd.f32 %v8985_v43, %v2547_v32  ;;  %v9281_v12 = vmul.f32 %v7365_v3, %v629_v18  ;;  %v9284_v1 = vmul.f32 %v7379_v7, %v629_v18 }
 0x18a   : > { %v2592_v15 = vadd.f32 %v8985_v43, %v2548_v38  ;;  %v2593_v19 = vadd.f32 %v8985_v43, %v2549_v30  ;;  %v9278_v35 = vadd.f32 %v8985_v43, %v2550_v16  ;;  %v2626_v63 = vmax.f32 %v2589_v5, 0.0 }
 0x18b   : > { %12180 = vst [vmem:[#allocation40_spill] sm:$0xff] %v9281_v12  ;;  %12181 = vst [vmem:[#allocation29_spill] sm:$0xff] %v9284_v1  ;;  %v2627_v52 = vmax.f32 %v2590_v51, 0.0  ;;  %v2628_v47 = vmax.f32 %v2591_v37, 0.0  ;;  %v9288_v24 = vmul.f32 %v7340_v56, %v629_v18  ;;  %v11670_v49 = vrot.slane %v9281_v12, 2 }
 0x18c   : > { %v2629_v27 = vmax.f32 %v2592_v15, 0.0  ;;  %v2630_v22 = vmax.f32 %v2593_v19, 0.0  ;;  %v11673_v41 = vmax.f32 %v9278_v35, 0.0  ;;  %v2698_v17 = vrot.slane %v2626_v63, 1 }
 0x18d   : > { %v2699_v29 = vrot.slane %v2627_v52, 1  ;;  %v2701_v20 = vrot.slane %v2628_v47, 1  ;;  %v12182_v9 = vrot.slane %v8707_v21, 2  ;;  %v11671_v31 = vrot.slane %v9284_v1, 3  ;;  %v12209_v1 = vld [vmem:[#allocation85_spill] sm:$0xff] }
 0x18e   : > { %v2703_v14 = vrot.slane %v2629_v27, 1  ;;  %v2705_v40 = vrot.slane %v2630_v22, 1  ;;  %v9293_v11 = vrot.slane %v11673_v41, 1  ;;  %v9302_v32 = vmul.f32 %v7389_v10, %v629_v18 }
 0x18f   : > { %v1338_v44 = vsel %vm1034_vm1, %v12182_v9, %v11670_v49  ;;  %v2700_v38 = vsel %vm804_vm0, %v2698_v17, %v2699_v29  ;;  %v2702_v30 = vsel %vm804_vm0, %v2699_v29, %v2701_v20  ;;  %v9317_v28 = vmul.f32 %v7346_v61, %v629_v18  ;;  %v9320_v29 = vpop.permute.xlu1 %721 }
 0x190   : > { %12183 = vst [vmem:[#allocation25_spill] sm:$0xff] %v9302_v32  ;;  %v2704_v16 = vsel %vm804_vm0, %v2701_v20, %v2703_v14  ;;  %v2706_v5 = vsel %vm804_vm0, %v2703_v14, %v2705_v40  ;;  %v2708_v51 = vsel %vm804_vm0, %v2705_v40, %v9293_v11  ;;  %v2801_v37 = vmax.f32 %v2626_v63, %v2700_v38  ;;  %v12201_v14 = vld [vmem:[#allocation57_spill] sm:$0xff] }
 0x191   : > { %v2802_v15 = vmax.f32 %v2627_v52, %v2702_v30  ;;  %v9310_v19 = vmax.f32 %v2628_v47, %v2704_v16  ;;  %v9312_v9 = vmax.f32 %v2629_v27, %v2706_v5  ;;  %v9314_v49 = vmax.f32 %v2630_v22, %v2708_v51  ;;  %12185 = vst [vmem:[#allocation36_spill] sm:$0xff] %v9317_v28 }
 0x192   : > { %v1417_v17 = vadd.f32 %v1338_v44, %v8730_v48  ;;  %v12186_v63 = vrot.slane %v8711_v60, 3  ;;  %v11674_v47 = vrot.slane %v9302_v32, 4  ;;  %v9333_v48 = vmul.f32 %v7342_v57, %v629_v18 }
 0x193   : > { %12184 = vst [vmem:[#allocation32_spill] sm:$0xff] %v9314_v49  ;;  %v2882_v20 = vrot.slane %v9310_v19, 2  ;;  %v2883_v27 = vrot.slane %v9312_v9, 2  ;;  %v11672_v22 = vrot.slane %v9314_v49, 2  ;;  %v9336_v40 = vmul.f32 %v7344_v59, %v629_v18 }
 0x194   : > { %v1568_v52 = vsel %vm1503_vm2, %v12186_v63, %v11671_v31  ;;  %12187 = vst [vmem:[#allocation52_spill] sm:$0xff] %v9333_v48  ;;  %v9342_v30 = vmul.f32 %v8631_v26, %v629_v18  ;;  %v9346_v16 = vmul.f32 %v7338_v55, %v9320_v29  ;;  %v9354_v63 = vmul.f32 %v7340_v56, %v9320_v29  ;;  %v12234_v48 = vld [vmem:[#allocation76_spill] sm:$0xff] }
 0x195   : > { %12188 = vst [vmem:[#allocation69_spill] sm:$0xff] %v9336_v40  ;;  %v9339_v38 = vadd.f32 %v1568_v52, %v1417_v17  ;;  %v2884_v5 = vsel %vm1034_vm1, %v2882_v20, %v2883_v27  ;;  %v2886_v51 = vsel %vm1034_vm1, %v2883_v27, %v11672_v22  ;;  %v9358_v17 = vmul.f32 %v7365_v3, %v9320_v29 }
 0x196   : > { %12190 = vst [vmem:[#allocation33_spill] sm:$0xff] %v9342_v30  ;;  %12191 = vst [vmem:[#allocation70_spill] sm:$0xff] %v9354_v63  ;;  %v2985_v18 = vmax.f32 %v2801_v37, %v2884_v5  ;;  %v2986_v52 = vmax.f32 %v2802_v15, %v2886_v51  ;;  %v12192_v31 = vrot.slane %v8715_v8, 4  ;;  %v9369_v27 = vmul.f32 %v7342_v57, %v9320_v29  ;;  %v12197_v5 = vld [vmem:[#allocation61_spill] sm:$0xff]  ;;  %v12198_v51 = vld [vmem:[#allocation62_spill] sm:$0xff] }
 0x197   : > { %12189 = vst [vmem:[#allocation37_spill] sm:$0xff] %v9339_v38  ;;  %v9375_v41 = vmul.f32 %v7344_v59, %v9320_v29  ;;  %v9379_v37 = vmul.f32 %v8631_v26, %v9320_v29  ;;  %v12200_v44 = vrot.slane %v12199_v58, 2  ;;  %v12202_v13 = vrot.slane %v12201_v14, 2  ;;  %v12204_v58 = vld [vmem:[#allocation96_spill] sm:$0xff]  ;;  %v12205_v14 = vld [vmem:[#allocation109_spill] sm:$0xff]  ;;  %v12235_v63 = vld [vmem:[#allocation98_spill] sm:$0xff] }
 0x198   : > { %v9365_v20 = vsel %vm1733_vm3, %v12192_v31, %v11674_v47  ;;  %12194 = vst [vmem:[#allocation77_spill] sm:$0xff] %v9369_v27  ;;  %v6856_v15 = vpack.c.bf16 %v2986_v52, %v2985_v18  ;;  %v1169_v47 = vadd.f32 %v12198_v51, %v12197_v5  ;;  %v9393_v18 = vpop.permute.xlu0 %638  ;;  %v12203_v51 = vld [vmem:[#allocation95_spill] sm:$0xff]  ;;  %v12206_v62 = vrot.slane %v12205_v14, 4 }
 0x199   : > { %12193 = vst [vmem:[#allocation78_spill] sm:$0xff] %v9365_v20  ;;  %12195 = vst [vmem:[#allocation35_spill] sm:$0xff] %v9375_v41  ;;  %v1320_v22 = vsel %vm1034_vm1, %v12202_v13, %v12200_v44  ;;  %v1869_v31 = vadd.f32 %v12204_v58, %v12203_v51  ;;  %v12207_v13 = vld [vmem:[#allocation116_spill] sm:$0xff]  ;;  %v12210_v0 = vrot.slane %v12209_v1, 3  ;;  %v12211_v12 = vrot.slane %v7815_v53, 3  ;;  %v12212_v20 = vld [vmem:[#allocation86_spill] sm:$0xff] }
 0x19a   : > { %12196 = vst [vmem:[#allocation53_spill] sm:$0xff] %v9379_v37  ;;  %6857 = vmatpush3.bf16.msra.mxu0 %v6856_v15  ;;  %v1408_v5 = vadd.f32 %v1320_v22, %v1169_v47  ;;  %v12208_v44 = vrot.slane %v12207_v13, 4  ;;  %v12213_v52 = vrot.slane %v12212_v20, 4  ;;  %v12214_v47 = vrot.slane %v12061_v23, 4  ;;  %v12215_v51 = vld [vmem:[#allocation107_spill] sm:$0xff]  ;;  %v12219_v1 = vld [vmem:[#allocation117_spill] sm:$0xff] }
 0x19b   : > { %v1550_v15 = vsel %vm1503_vm2, %v12211_v12, %v12210_v0  ;;  %v2379_v58 = vmul.f32 %v8631_v26, %v12215_v51  ;;  %v9422_v53 = vmul.f32 %v7379_v7, %v9393_v18  ;;  %v12218_v12 = vrot.slane %v12073_v39, 4 }
 0x19c   : > { %v2021_v28 = vsel %vm1733_vm3, %v12208_v44, %v12206_v62  ;;  %v1780_v22 = vsel %vm1733_vm3, %v12214_v47, %v12213_v52  ;;  %v1638_v38 = vadd.f32 %v1550_v15, %v1408_v5  ;;  %v9418_v62 = vmul.f32 %v7365_v3, %v9393_v18 }
 0x19d   : > { %v2108_v8 = vadd.f32 %v2021_v28, %v1869_v31  ;;  %v12217_v0 = vmov %v12208_v44  ;;  %v12220_v20 = vrot.slane %v12219_v1, 5  ;;  %v12221_v52 = vrot.slane %v12076_v50, 5  ;;  %v12222_v31 = vld [vmem:[#allocation111_spill] sm:$0xff]  ;;  %v1192_v50 = vpop.permute.xlu1 %1191 }
 0x19e   : > { %12216 = vst [vmem:[#allocation38_spill] sm:$0xff] %v9418_v62  ;;  %v2019_v23 = vsel %vm1733_vm3, %v12218_v12, %v12217_v0  ;;  %v12223_v5 = vrot.slane %v12222_v31, 5  ;;  %v2478_v47 = vrot.slane %v2379_v58, 6  ;;  %v1868_v51 = vadd.f32 %v1780_v22, %v1638_v38  ;;  %v12225_v0 = vld [vmem:[#allocation112_spill] sm:$0xff] }
 0x19f   : > { %v2249_v28 = vsel %vm2202_vm4, %v12221_v52, %v12220_v20  ;;  %v12224_v44 = vmov %v12220_v20  ;;  %v9441_v39 = vmul.f32 %v7338_v55, %v9393_v18  ;;  %v9445_v13 = vmul.f32 %v7389_v10, %v9393_v18 }
 0x1a0   : > { %v2251_v15 = vsel %vm2202_vm4, %v12224_v44, %v12223_v5  ;;  %v12226_v12 = vrot.slane %v12225_v0, 6  ;;  %v9453_v58 = vmul.f32 %v7342_v57, %v9393_v18  ;;  %v2107_v55 = vadd.f32 %v2019_v23, %v1868_v51 }
 0x1a1   : > { %v2338_v32 = vadd.f32 %v2251_v15, %v2108_v8  ;;  %v9457_v8 = vmul.f32 %v7344_v59, %v9393_v18  ;;  %v9462_v52 = vmul.f32 %v8631_v26, %v9393_v18  ;;  %v9465_v5 = vmul.f32 %v7365_v3, %v1192_v50 }
 0x1a2   : > { %v2481_v20 = vsel %vm2432_vm5, %v2478_v47, %v12226_v12  ;;  %12227 = vst [vmem:[#allocation71_spill] sm:$0xff] %v9453_v58  ;;  %v9468_v44 = vmul.f32 %v7379_v7, %v1192_v50  ;;  %v9471_v15 = vmul.f32 %v7389_v10, %v1192_v50  ;;  %v9474_v12 = vmul.f32 %v7342_v57, %v1192_v50  ;;  %v12237_v58 = vld [vmem:[#allocation63_spill] sm:$0xff] }
 0x1a3   : > { %12228 = vst [vmem:[#allocation67_spill] sm:$0xff] %v9457_v8  ;;  %v2568_v38 = vadd.f32 %v2481_v20, %v2338_v32  ;;  %12229 = vst [vmem:[#allocation56_spill] sm:$0xff] %v9462_v52  ;;  %v2337_v23 = vadd.f32 %v2249_v28, %v2107_v55  ;;  %v12231_v32 = vrot.slane %v12078_v25, 6  ;;  %v9483_v22 = vmul.f32 %v7344_v59, %v1192_v50  ;;  %v12241_v55 = vld [vmem:[#allocation108_spill] sm:$0xff]  ;;  %v12242_v52 = vld [vmem:[#allocation99_spill] sm:$0xff] }
 0x1a4   : > { %12230 = vst [vmem:[#allocation23_spill] sm:$0xff] %v9474_v12  ;;  %v12236_v60 = vrot.slane %v12235_v63, 2  ;;  %v12238_v21 = vrot.slane %v12237_v58, 2  ;;  %v9504_v25 = vmul.f32 %v8631_v26, %v1192_v50  ;;  %v12243_v8 = vrot.slane %v12242_v52, 3  ;;  %v12246_v58 = vld [vmem:[#allocation100_spill] sm:$0xff] }
 0x1a5   : > { %v2479_v51 = vsel %vm2432_vm5, %v12231_v32, %v2478_v47  ;;  %v9480_v20 = vadd.f32 %v8985_v43, %v2568_v38  ;;  %12232 = vst [vmem:[#allocation26_spill] sm:$0xff] %v9483_v22  ;;  %v12233_v32 = vld [vmem:[#allocation75_spill] sm:$0xff]  ;;  %v12240_v47 = vld [vmem:[#allocation110_spill] sm:$0xff]  ;;  %v12247_v12 = vrot.slane %v12246_v58, 4  ;;  %v12251_v26 = vld [vmem:[#allocation132_spill] sm:$0xff] }
 0x1a6   : > { %v2567_v40 = vadd.f32 %v2479_v51, %v2337_v23  ;;  %v1153_v1 = vadd.f32 %v12234_v48, %v12233_v32  ;;  %v1288_v30 = vsel %vm1034_vm1, %v12238_v21, %v12236_v60  ;;  %12239 = vst [vmem:[#allocation30_spill] sm:$0xff] %v9504_v25  ;;  %v1853_v28 = vadd.f32 %v12241_v55, %v12240_v47  ;;  %v12244_v48 = vld [vmem:[#allocation64_spill] sm:$0xff] }
 0x1a7   : > { %v12245_v32 = vrot.slane %v12244_v48, 3  ;;  %v12248_v21 = vrot.slane %v12159_v54, 4  ;;  %v12252_v50 = vrot.slane %v12251_v26, 4  ;;  %v12254_v54 = vld [vmem:[#allocation123_spill] sm:$0xff] }
 0x1a8   : > { %v2611_v23 = vadd.f32 %v8985_v43, %v2567_v40  ;;  %v1392_v38 = vadd.f32 %v1288_v30, %v1153_v1  ;;  %v12249_v40 = vld [vmem:[#allocation125_spill] sm:$0xff]  ;;  %v12253_v30 = vmax.f32 %v9480_v20, 0.0 }
 0x1a9   : > { %v1518_v63 = vsel %vm1503_vm2, %v12245_v32, %v12243_v8  ;;  %v1748_v60 = vsel %vm1733_vm3, %v12248_v21, %v12247_v12  ;;  %v12250_v51 = vrot.slane %v12249_v40, 4  ;;  %v9530_v8 = vld [vmem:[%s11725_s1 + $0x8] ss:$0 sm:$0xff]  ;;  %v12255_v48 = vmov %v12252_v50  ;;  %s7101_s1 = scalar_lea.vmem %s7100_s20, 32 }
 0x1aa   : > { %v2648_v47 = vmax.f32 %v2611_v23, 0.0  ;;  %v9525_v1 = vrot.slane %v12253_v30, 1  ;;  %v2363_v12 = vmul.f32 %v9530_v8, %v12254_v54  ;;  %v1622_v55 = vadd.f32 %v1518_v63, %v1392_v38  ;;  %v12259_v21 = vld [vmem:[#allocation133_spill] sm:$0xff]  ;;  %p7103_p1 = scmp.lt.s32.totalorder %s7101_s1, %s7095_s19 }
 0x1ab   : > { %v1989_v22 = vsel %vm1733_vm3, %v12252_v50, %v12250_v51  ;;  %v12256_v32 = vrot.slane %v12169_v2, 4  ;;  %v12257_v51 = vld [vmem:[#allocation127_spill] sm:$0xff]  ;;  %v12260_v50 = vrot.slane %v12259_v21, 5  ;;  %v12262_v30 = vrot.slane %v8694_v36, 1 }
 0x1ac   : > { %v2092_v52 = vadd.f32 %v1989_v22, %v1853_v28  ;;  %v12258_v58 = vrot.slane %v12257_v51, 5  ;;  %v12261_v28 = vrot.slane %v9271_v45, 1  ;;  %v2741_v54 = vrot.slane %v2648_v47, 1  ;;  %p7104_p2 = por %p7103_p1, %p7102_p0 }
 0x1ad   : > { %v1987_v23 = vsel %vm1733_vm3, %v12256_v32, %v12255_v48  ;;  %v2446_v63 = vrot.slane %v2363_v12, 6  ;;  %v1852_v48 = vadd.f32 %v1748_v60, %v1622_v55  ;;  %v12263_v32 = vmov %v12260_v50  ;;  %v12267_v60 = vld [vmem:[#allocation128_spill] sm:$0xff]  ;;  %v12270_v55 = vld [vmem:[#allocation195_spill] sm:$0xff] }
 0x1ae   : > { %v2219_v22 = vsel %vm2202_vm4, %v12260_v50, %v12258_v58  ;;  %v873_v40 = vsel %vm804_vm0, %v12262_v30, %v12261_v28  ;;  %v12264_v51 = vrot.slane %v12176_v34, 5  ;;  %v12265_v50 = vrot.slane %v9288_v24, 2  ;;  %v1187_v30 = vpop.permute.xlu0 %1186  ;;  %p7105_p3 = pnand %p7104_p2, %p7098_p13 }
 0x1af   : > { %v2322_v38 = vadd.f32 %v2219_v22, %v2092_v52  ;;  %v950_v26 = vadd.f32 %v873_v40, %v8736_v42  ;;  %v12266_v36 = vrot.slane %v8698_v6, 2  ;;  %v2742_v52 = vsel %vm804_vm0, %v9016_v46, %v2741_v54  ;;  %v12272_v6 = vld [vmem:[#allocation12_spill] sm:$0xff] }
 0x1b0   : > { %v2217_v58 = vsel %vm2202_vm4, %v12264_v51, %v12263_v32  ;;  %v2744_v42 = vsel %vm804_vm0, %v2741_v54, %v9525_v1  ;;  %v12268_v40 = vrot.slane %v12267_v60, 6  ;;  %v12269_v34 = vrot.slane %v9418_v62, 2  ;;  %v12275_v60 = vld [vmem:[#allocation197_spill] sm:$0xff] }
 0x1b1   : > { %v1103_v28 = vsel %vm1034_vm1, %v12266_v36, %v12265_v50  ;;  %v12271_v51 = vrot.slane %v12270_v55, 2  ;;  %v12273_v22 = vmax.f32 %v12272_v6, 0.0  ;;  %v9577_v50 = vmax.f32 %v2648_v47, %v2744_v42  ;;  %v12283_v6 = vld [vmem:[#allocation20_spill] sm:$0xff] }
 0x1b2   : > { %v2449_v12 = vsel %vm2432_vm5, %v2446_v63, %v12268_v40  ;;  %v2091_v46 = vadd.f32 %v1987_v23, %v1852_v48  ;;  %v1180_v2 = vadd.f32 %v1103_v28, %v950_v26  ;;  %v12274_v54 = vrot.slane %v9422_v53, 3 }
 0x1b3   : > { %v1342_v21 = vsel %vm1034_vm1, %v12271_v51, %v12269_v34  ;;  %v9575_v32 = vmax.f32 %v12273_v22, %v2742_v52  ;;  %v2552_v36 = vadd.f32 %v2449_v12, %v2322_v38  ;;  %v12276_v25 = vrot.slane %v12275_v60, 3 }
 0x1b4   : > { %v12277_v62 = vrot.slane %v9445_v13, 4  ;;  %v12278_v55 = vrot.slane %v9143_v4, 4  ;;  %v9590_v52 = vmul.f32 %v7365_v3, %v1187_v30  ;;  %v11707_v23 = vrot.slane %v9577_v50, 2  ;;  %v12281_v3 = vld [vmem:[#allocation21_spill] sm:$0xff] }
 0x1b5   : > { %v1572_v40 = vsel %vm1503_vm2, %v12276_v25, %v12274_v54  ;;  %v2919_v47 = vrot.slane %v9575_v32, 2  ;;  %v2321_v38 = vadd.f32 %v2217_v58, %v2091_v46  ;;  %v9595_v26 = vadd.f32 %v8985_v43, %v2552_v36  ;;  %v1891_v36 = vpop.permute.xlu1 %1890 }
 0x1b6   : > { %v1802_v34 = vsel %vm1733_vm3, %v12278_v55, %v12277_v62  ;;  %v12279_v48 = vrot.slane %v12178_v33, 6  ;;  %v1419_v28 = vadd.f32 %v1342_v21, %v1180_v2  ;;  %v9601_v42 = vmul.f32 %v7379_v7, %v1187_v30  ;;  %v12284_v2 = vld [vmem:[#allocation15_spill] sm:$0xff] }
 0x1b7   : > { %v9604_v62 = vmul.f32 %v7342_v57, %v1187_v30  ;;  %v12282_v12 = vrot.slane %v12281_v3, 2  ;;  %v2922_v58 = vsel %vm1034_vm1, %v2919_v47, %v11707_v23  ;;  %v11705_v33 = vmax.f32 %v9595_v26, 0.0 }
 0x1b8   : > { %v2447_v25 = vsel %vm2432_vm5, %v12279_v48, %v2446_v63  ;;  %v3004_v21 = vmax.f32 %v12284_v2, %v2922_v58  ;;  %v1649_v22 = vadd.f32 %v1572_v40, %v1419_v28  ;;  %v9618_v48 = vmul.f32 %v7389_v10, %v1187_v30 }
 0x1b9   : > { %12280 = vst [vmem:[#allocation72_spill] sm:$0xff] %v9604_v62  ;;  %v2920_v55 = vsel %vm1034_vm1, %v12282_v12, %v2919_v47  ;;  %v2551_v51 = vadd.f32 %v2447_v25, %v2321_v38  ;;  %v11706_v46 = vrot.slane %v9604_v62, 4  ;;  %v9621_v12 = vmul.f32 %v7344_v59, %v1187_v30 }
 0x1ba   : > { %v3003_v63 = vmax.f32 %v12283_v6, %v2920_v55  ;;  %v9624_v47 = vmul.f32 %v9530_v8, %v1187_v30  ;;  %v9628_v25 = vrot.slane %v11705_v33, 1  ;;  %v1879_v40 = vadd.f32 %v1802_v34, %v1649_v22 }
 0x1bb   : > { %v2595_v54 = vadd.f32 %v8985_v43, %v2551_v51  ;;  %12285 = vst [vmem:[#allocation68_spill] sm:$0xff] %v9621_v12  ;;  %v12287_v28 = vrot.slane %v9369_v27, 4  ;;  %v11710_v51 = vrot.slane %v9621_v12, 5  ;;  %v9638_v30 = vmul.f32 %v7342_v57, %v1891_v36  ;;  %v3020_v12 = vld [vmem:[%s11400_s9 + $0x8] sm:$0xff] }
 0x1bc   : > { %12286 = vst [vmem:[#allocation101_spill] sm:$0xff] %v9624_v47  ;;  %v6858_v38 = vpack.c.bf16 %v3004_v21, %v3003_v63  ;;  %v11711_v2 = vrot.slane %v9624_v47, 6  ;;  %v9643_v22 = vmul.f32 %v7344_v59, %v1891_v36  ;;  %v9652_v23 = vmul.f32 %v9530_v8, %v1891_v36  ;;  %v12290_v63 = vld [vmem:[#allocation87_spill] sm:$0xff]  ;;  %3168 = vmatprep.mubr.f32.mxu0 %v3020_v12 }
 0x1bd   : > { %v2041_v55 = vsel %vm1733_vm3, %v12287_v28, %v11706_v46  ;;  %v2632_v58 = vmax.f32 %v2595_v54, 0.0  ;;  %v12288_v54 = vrot.slane %v9375_v41, 5  ;;  %v12291_v28 = vld [vmem:[#allocation88_spill] sm:$0xff] }
 0x1be   : > { %6859 = vmatprep.subr.bf16.mxu0 %v6858_v38  ;;  %v2118_v34 = vadd.f32 %v2041_v55, %v1879_v40  ;;  %v12289_v40 = vrot.slane %v9379_v37, 6  ;;  %v1171_v62 = vadd.f32 %v12291_v28, %v12290_v63  ;;  %v12296_v63 = vmax.f32 %v9278_v35, 0.0 }
 0x1bf   : > { %v2709_v33 = vrot.slane %v2632_v58, 1  ;;  %v2271_v46 = vsel %vm2202_vm4, %v12288_v54, %v11710_v51  ;;  %v12292_v54 = vld [vmem:[#allocation113_spill] sm:$0xff] }
 0x1c0   : > { %v2348_v38 = vadd.f32 %v2271_v46, %v2118_v34  ;;  %v2501_v55 = vsel %vm2432_vm5, %v12289_v40, %v11711_v2  ;;  %v12293_v51 = vrot.slane %v12292_v54, 2  ;;  %v12294_v40 = vld [vmem:[#allocation73_spill] sm:$0xff]  ;;  %v12300_v34 = vld [vmem:[#allocation79_spill] sm:$0xff] }
 0x1c1   : > { %v2710_v36 = vsel %vm804_vm0, %v9293_v11, %v2709_v33  ;;  %v2712_v46 = vsel %vm804_vm0, %v2709_v33, %v9628_v25  ;;  %v12295_v2 = vrot.slane %v12294_v40, 2  ;;  %v12298_v33 = vld [vmem:[#allocation114_spill] sm:$0xff]  ;;  %v12301_v27 = vrot.slane %v12300_v34, 3  ;;  %v12302_v40 = vld [vmem:[#allocation115_spill] sm:$0xff] }
 0x1c2   : > { %v9677_v28 = vmax.f32 %v12296_v63, %v2710_v36  ;;  %v9679_v47 = vmax.f32 %v2632_v58, %v2712_v46  ;;  %v2578_v6 = vadd.f32 %v2501_v55, %v2348_v38  ;;  %v12299_v41 = vrot.slane %v12298_v33, 3  ;;  %v12307_v36 = vld [vmem:[#allocation120_spill] sm:$0xff]  ;;  %v12311_v63 = vld [vmem:[#allocation141_spill] sm:$0xff] }
 0x1c3   : > { %v1324_v21 = vsel %vm1034_vm1, %v12295_v2, %v12293_v51  ;;  %v12303_v4 = vrot.slane %v12302_v40, 4  ;;  %v12304_v51 = vld [vmem:[#allocation80_spill] sm:$0xff]  ;;  %v12306_v2 = vld [vmem:[#allocation126_spill] sm:$0xff]  ;;  %v12312_v33 = vrot.slane %v12311_v63, 4 }
 0x1c4   : > { %12297 = vst [vmem:[#allocation93_spill] sm:$0xff] %v9677_v28  ;;  %v1410_v11 = vadd.f32 %v1324_v21, %v1171_v62  ;;  %v1554_v54 = vsel %vm1503_vm2, %v12301_v27, %v12299_v41  ;;  %v12305_v12 = vrot.slane %v12304_v51, 4  ;;  %v1871_v58 = vadd.f32 %v12307_v36, %v12306_v2  ;;  %v12308_v46 = vld [vmem:[#allocation148_spill] sm:$0xff]  ;;  %v12314_v51 = vld [vmem:[#allocation149_spill] sm:$0xff]  ;;  %v12317_v36 = vld [vmem:[#allocation139_spill] sm:$0xff] }
 0x1c5   : > { %v2887_v38 = vrot.slane %v9677_v28, 2  ;;  %v11719_v62 = vrot.slane %v9679_v47, 2  ;;  %v9697_v21 = vadd.f32 %v8985_v43, %v2578_v6  ;;  %v12309_v34 = vrot.slane %v12308_v46, 4  ;;  %v12322_v28 = vld [vmem:[#allocation82_spill] sm:$0xff] }
 0x1c6   : > { %v1784_v35 = vsel %vm1733_vm3, %v12305_v12, %v12303_v4  ;;  %v1640_v55 = vadd.f32 %v1554_v54, %v1410_v11  ;;  %v12310_v41 = vrot.slane %v12205_v14, 4  ;;  %v12315_v12 = vrot.slane %v12314_v51, 5 }
 0x1c7   : > { %v12313_v4 = vmov %v12309_v34  ;;  %v12316_v2 = vrot.slane %v12222_v31, 5  ;;  %v2381_v11 = vmul.f32 %v9530_v8, %v12317_v36  ;;  %v12318_v54 = vrot.slane %v9314_v49, 2 }
 0x1c8   : > { %v2023_v27 = vsel %vm1733_vm3, %v12310_v41, %v12309_v34  ;;  %v2025_v40 = vsel %vm1733_vm3, %v12313_v4, %v12312_v33  ;;  %v2890_v34 = vsel %vm1034_vm1, %v2887_v38, %v11719_v62  ;;  %v1870_v46 = vadd.f32 %v1784_v35, %v1640_v55  ;;  %v12319_v41 = vld [vmem:[#allocation143_spill] sm:$0xff] }
 0x1c9   : > { %v2253_v6 = vsel %vm2202_vm4, %v12316_v2, %v12315_v12  ;;  %v2888_v14 = vsel %vm1034_vm1, %v12318_v54, %v2887_v38  ;;  %v12320_v33 = vrot.slane %v12319_v41, 5  ;;  %v12321_v4 = vmov %v12315_v12  ;;  %v12323_v38 = vld [vmem:[#allocation199_spill] sm:$0xff] }
 0x1ca   : > { %v2987_v12 = vmax.f32 %v9310_v19, %v2888_v14  ;;  %v2988_v2 = vmax.f32 %v9312_v9, %v2890_v34  ;;  %v2110_v36 = vadd.f32 %v2025_v40, %v1871_v58  ;;  %v2482_v37 = vrot.slane %v2381_v11, 6  ;;  %v12325_v58 = vld [vmem:[#allocation144_spill] sm:$0xff] }
 0x1cb   : > { %v2255_v31 = vsel %vm2202_vm4, %v12321_v4, %v12320_v33  ;;  %v2659_v60 = vmax.f32 %v9697_v21, 0.0  ;;  %v2109_v54 = vadd.f32 %v2023_v27, %v1870_v46  ;;  %v680_v49 = vmul.f32 %v7346_v61, %v12322_v28  ;;  %v3024_v21 = vld [vmem:[%s11400_s9 + $0x28] sm:$0xff] }
 0x1cc   : > { %v874_v35 = vrot.slane %v12323_v38, 1  ;;  %v6860_v55 = vpack.c.bf16 %v2988_v2, %v2987_v12  ;;  %v2340_v62 = vadd.f32 %v2255_v31, %v2110_v36  ;;  %v12324_v51 = vrot.slane %v12225_v0, 6 }
 0x1cd   : > { %v681_v19 = vmul.f32 %v7346_v61, %v9393_v18  ;;  %v2339_v9 = vadd.f32 %v2253_v6, %v2109_v54  ;;  %v12326_v40 = vrot.slane %v12325_v58, 6  ;;  %v876_v27 = vrot.slane %v9441_v39, 1 }
 0x1ce   : > { %v2483_v33 = vsel %vm2432_vm5, %v12324_v51, %v2482_v37  ;;  %v993_v14 = vmul.f32 %v7340_v56, %v12322_v28  ;;  %6861 = vmatpush3.bf16.msra.mxu0 %v6860_v55  ;;  %v12327_v46 = vrot.slane %v9271_v45, 1  ;;  %v994_v61 = vmul.f32 %v7340_v56, %v9393_v18 }
 0x1cf   : > { %v2485_v11 = vsel %vm2432_vm5, %v2482_v37, %v12326_v40  ;;  %v12328_v6 = vrot.slane %v9590_v52, 2  ;;  %v12329_v4 = vrot.slane %v9358_v17, 2  ;;  %v2569_v39 = vadd.f32 %v2483_v33, %v2339_v9  ;;  %v1886_v9 = vpop.permute.xlu0 %1885  ;;  %v12334_v40 = vld [vmem:[#allocation70_spill] sm:$0xff] }
 0x1d0   : > { %v2570_v34 = vadd.f32 %v2485_v11, %v2340_v62  ;;  %v9747_v0 = vsel %vm804_vm0, %v12327_v46, %v874_v35  ;;  %v877_v31 = vsel %vm804_vm0, %v874_v35, %v876_v27  ;;  %v12330_v12 = vrot.slane %v9346_v16, 1 }
 0x1d1   : > { %v1346_v37 = vsel %vm1034_vm1, %v12329_v4, %v12328_v6  ;;  %v1104_v45 = vrot.slane %v993_v14, 2  ;;  %v952_v36 = vadd.f32 %v877_v31, %v680_v49  ;;  %v1106_v56 = vrot.slane %v994_v61, 2 }
 0x1d2   : > { %v879_v62 = vsel %vm804_vm0, %v876_v27, %v12330_v12  ;;  %v9761_v2 = vadd.f32 %v8985_v43, %v2570_v34  ;;  %v2613_v18 = vadd.f32 %v8985_v43, %v2569_v39  ;;  %v12331_v38 = vrot.slane %v9288_v24, 2 }
 0x1d3   : > { %v953_v54 = vadd.f32 %v879_v62, %v681_v19  ;;  %v12332_v35 = vrot.slane %v9465_v5, 2  ;;  %v12333_v16 = vmov %v12328_v6  ;;  %v1462_v33 = vmul.f32 %v7379_v7, %v9320_v29 }
 0x1d4   : > { %v9767_v55 = vsel %vm1034_vm1, %v12331_v38, %v1104_v45  ;;  %v2651_v49 = vmax.f32 %v9761_v2, 0.0  ;;  %v1107_v19 = vsel %vm1034_vm1, %v1104_v45, %v1106_v56  ;;  %v12335_v11 = vrot.slane %v12334_v40, 2 }
 0x1d5   : > { %v1348_v51 = vsel %vm1034_vm1, %v12333_v16, %v12332_v35  ;;  %v1692_v27 = vmul.f32 %v7389_v10, %v9320_v29  ;;  %v2650_v5 = vmax.f32 %v2613_v18, 0.0  ;;  %v1182_v14 = vadd.f32 %v1107_v19, %v952_v36 }
 0x1d6   : > { %v1109_v24 = vsel %vm1034_vm1, %v1106_v56, %v12335_v11  ;;  %v1573_v34 = vrot.slane %v1462_v33, 3  ;;  %v9785_v46 = vrot.slane %v2651_v49, 1  ;;  %v12336_v7 = vrot.slane %v9468_v44, 3  ;;  %v12344_v33 = vld [vmem:[#allocation23_spill] sm:$0xff] }
 0x1d7   : > { %v1183_v52 = vadd.f32 %v1109_v24, %v953_v54  ;;  %v12337_v61 = vrot.slane %v9601_v42, 3  ;;  %v1803_v4 = vrot.slane %v1692_v27, 4  ;;  %v1933_v39 = vmul.f32 %v7342_v57, %v1886_v9 }
 0x1d8   : > { %v2745_v31 = vrot.slane %v2650_v5, 1  ;;  %v1421_v12 = vadd.f32 %v1346_v37, %v1182_v14  ;;  %v12338_v29 = vrot.slane %v9471_v15, 4  ;;  %v12339_v62 = vrot.slane %v9618_v48, 4 }
 0x1d9   : > { %v1578_v6 = vsel %vm1503_vm2, %v12337_v61, %v12336_v7  ;;  %v1422_v10 = vadd.f32 %v1348_v51, %v1183_v52  ;;  %v12340_v36 = vrot.slane %v9422_v53, 3  ;;  %v12341_v54 = vmov %v12337_v61  ;;  %v12349_v61 = vld [vmem:[#allocation129_spill] sm:$0xff] }
 0x1da   : > { %v1808_v45 = vsel %vm1733_vm3, %v12339_v62, %v12338_v29  ;;  %v1576_v56 = vsel %vm1503_vm2, %v1573_v34, %v12341_v54  ;;  %v12342_v57 = vmov %v12339_v62  ;;  %v2044_v18 = vrot.slane %v1933_v39, 4  ;;  %v12351_v39 = vld [vmem:[#allocation89_spill] sm:$0xff]  ;;  %v12354_v54 = vld [vmem:[#allocation130_spill] sm:$0xff] }
 0x1db   : > { %v9801_v44 = vsel %vm1503_vm2, %v12340_v36, %v1573_v34  ;;  %v1806_v37 = vsel %vm1733_vm3, %v1803_v4, %v12342_v57  ;;  %v2746_v15 = vsel %vm804_vm0, %v9525_v1, %v2745_v31  ;;  %v2748_v38 = vsel %vm804_vm0, %v2745_v31, %v9785_v46  ;;  %v12348_v34 = vld [vmem:[#allocation102_spill] sm:$0xff] }
 0x1dc   : > { %v1651_v35 = vadd.f32 %v1576_v56, %v1421_v12  ;;  %v1652_v53 = vadd.f32 %v1578_v6, %v1422_v10  ;;  %v12343_v16 = vmax.f32 %v9480_v20, 0.0  ;;  %v9817_v42 = vmax.f32 %v2650_v5, %v2748_v38  ;;  %v12347_v5 = vld [vmem:[#allocation103_spill] sm:$0xff]  ;;  %v12356_v57 = vld [vmem:[#allocation90_spill] sm:$0xff] }
 0x1dd   : > { %v12345_v19 = vrot.slane %v12344_v33, 4  ;;  %v12346_v40 = vrot.slane %v9638_v30, 4  ;;  %v2162_v27 = vmul.f32 %v7344_v59, %v1886_v9  ;;  %v2392_v14 = vmul.f32 %v9530_v8, %v1886_v9 }
 0x1de   : > { %v9815_v51 = vmax.f32 %v12343_v16, %v2746_v15  ;;  %v1881_v1 = vadd.f32 %v1806_v37, %v1651_v35  ;;  %v1882_v24 = vadd.f32 %v1808_v45, %v1652_v53  ;;  %v2925_v52 = vrot.slane %v9817_v42, 2  ;;  %v12358_v35 = vld [vmem:[#allocation26_spill] sm:$0xff] }
 0x1df   : > { %v2045_v48 = vsel %vm1733_vm3, %v12345_v19, %v2044_v18  ;;  %v2047_v11 = vsel %vm1733_vm3, %v2044_v18, %v12346_v40  ;;  %v1155_v7 = vadd.f32 %v12348_v34, %v12347_v5  ;;  %v12350_v6 = vrot.slane %v12349_v61, 2  ;;  %v12364_v5 = vld [vmem:[#allocation131_spill] sm:$0xff] }
 0x1e0   : > { %v2923_v20 = vrot.slane %v9815_v51, 2  ;;  %v12352_v31 = vrot.slane %v12351_v39, 2  ;;  %v2120_v12 = vadd.f32 %v2045_v48, %v1881_v1  ;;  %v2121_v10 = vadd.f32 %v2047_v11, %v1882_v24  ;;  %v12361_v1 = vld [vmem:[#allocation30_spill] sm:$0xff]  ;;  %v12369_v39 = vld [vmem:[#allocation136_spill] sm:$0xff] }
 0x1e1   : > { %v2274_v29 = vrot.slane %v2162_v27, 5  ;;  %v2504_v62 = vrot.slane %v2392_v14, 6  ;;  %v12353_v59 = vrot.slane %v9577_v50, 2  ;;  %v12355_v56 = vrot.slane %v12354_v54, 3 }
 0x1e2   : > { %v1292_v30 = vsel %vm1034_vm1, %v12352_v31, %v12350_v6  ;;  %v2926_v45 = vsel %vm1034_vm1, %v2923_v20, %v2925_v52  ;;  %v12357_v37 = vrot.slane %v12356_v57, 3  ;;  %v12359_v53 = vrot.slane %v12358_v35, 5  ;;  %v12368_v6 = vld [vmem:[#allocation142_spill] sm:$0xff] }
 0x1e3   : > { %v2924_v9 = vsel %vm1034_vm1, %v12353_v59, %v2923_v20  ;;  %v1394_v36 = vadd.f32 %v1292_v30, %v1155_v7  ;;  %v3006_v38 = vmax.f32 %v9575_v32, %v2926_v45  ;;  %v12360_v19 = vrot.slane %v9643_v22, 5  ;;  %v12366_v7 = vld [vmem:[#allocation91_spill] sm:$0xff]  ;;  %v12372_v59 = vld [vmem:[#allocation125_spill] sm:$0xff] }
 0x1e4   : > { %v1522_v18 = vsel %vm1503_vm2, %v12357_v37, %v12355_v56  ;;  %v3005_v15 = vmax.f32 %v12281_v3, %v2924_v9  ;;  %v2275_v16 = vsel %vm2202_vm4, %v12359_v53, %v2274_v29  ;;  %v12362_v24 = vrot.slane %v12361_v1, 6  ;;  %v12380_v53 = vld [vmem:[#allocation127_spill] sm:$0xff] }
 0x1e5   : > { %v2277_v48 = vsel %vm2202_vm4, %v2274_v29, %v12360_v19  ;;  %v2350_v40 = vadd.f32 %v2275_v16, %v2120_v12  ;;  %v12363_v14 = vrot.slane %v9652_v23, 6  ;;  %v1624_v32 = vadd.f32 %v1522_v18, %v1394_v36 }
 0x1e6   : > { %v2351_v11 = vadd.f32 %v2277_v48, %v2121_v10  ;;  %v2505_v27 = vsel %vm2432_vm5, %v12362_v24, %v2504_v62  ;;  %v6862_v20 = vpack.c.bf16 %v3006_v38, %v3005_v15  ;;  %v12365_v34 = vrot.slane %v12364_v5, 4  ;;  %v12370_v10 = vld [vmem:[#allocation164_spill] sm:$0xff]  ;;  %v12378_v15 = vld [vmem:[#allocation165_spill] sm:$0xff] }
 0x1e7   : > { %v2507_v3 = vsel %vm2432_vm5, %v2504_v62, %v12363_v14  ;;  %v12367_v61 = vrot.slane %v12366_v7, 4  ;;  %v1855_v31 = vadd.f32 %v12369_v39, %v12368_v6  ;;  %v2580_v30 = vadd.f32 %v2505_v27, %v2350_v40  ;;  %v12374_v62 = vld [vmem:[#allocation157_spill] sm:$0xff]  ;;  %v12382_v40 = vld [vmem:[#allocation159_spill] sm:$0xff]  ;;  %v12386_v14 = vld [vmem:[#allocation118_spill] sm:$0xff] }
 0x1e8   : > { %v2581_v12 = vadd.f32 %v2507_v3, %v2351_v11  ;;  %v12371_v29 = vrot.slane %v12370_v10, 4  ;;  %v12373_v9 = vrot.slane %v12372_v59, 4  ;;  %v12375_v45 = vrot.slane %v12374_v62, 4  ;;  %6863 = vmatprep.subr.bf16.mxu0 %v6862_v20  ;;  %v12385_v27 = vld [vmem:[#allocation155_spill] sm:$0xff]  ;;  %v12388_v7 = vld [vmem:[#allocation145_spill] sm:$0xff] }
 0x1e9   : > { %v1752_v22 = vsel %vm1733_vm3, %v12367_v61, %v12365_v34  ;;  %v12377_v56 = vrot.slane %v9445_v13, 4  ;;  %v12379_v38 = vrot.slane %v12378_v15, 5  ;;  %v12381_v16 = vrot.slane %v12380_v53, 5  ;;  %v12387_v3 = vld [vmem:[#allocation119_spill] sm:$0xff]  ;;  %v12400_v15 = vld [vmem:[#allocation158_spill] sm:$0xff] }
 0x1ea   : > { %v1991_v23 = vsel %vm1733_vm3, %v12373_v9, %v12371_v29  ;;  %v12376_v36 = vmov %v12371_v29  ;;  %v1854_v37 = vadd.f32 %v1752_v22, %v1624_v32  ;;  %v9889_v48 = vadd.f32 %v8985_v43, %v2580_v30  ;;  %v9903_v32 = vld [vmem:[%s11393_s2] ss:$0 sm:$0xff]  ;;  %v12392_v29 = vld [vmem:[#allocation146_spill] sm:$0xff]  ;;  %v12394_v9 = vld [vmem:[#allocation105_spill] sm:$0xff] }
 0x1eb   : > { %v1993_v54 = vsel %vm1733_vm3, %v12376_v36, %v12375_v45  ;;  %v9881_v57 = vsel %vm1733_vm3, %v12377_v56, %v1803_v4  ;;  %v2221_v19 = vsel %vm2202_vm4, %v12381_v16, %v12379_v38  ;;  %v12383_v11 = vrot.slane %v12382_v40, 5  ;;  %v12390_v22 = vld [vmem:[#allocation104_spill] sm:$0xff]  ;;  %v12398_v56 = vld [vmem:[#allocation106_spill] sm:$0xff]  ;;  %v12402_v16 = vld [vmem:[#allocation173_spill] sm:$0xff] }
 0x1ec   : > { %v2094_v18 = vadd.f32 %v1993_v54, %v1855_v31  ;;  %v12384_v24 = vmov %v12379_v38  ;;  %v2365_v4 = vmul.f32 %v9530_v8, %v12385_v27  ;;  %v1173_v20 = vadd.f32 %v12387_v3, %v12386_v14  ;;  %v12396_v54 = vld [vmem:[#allocation147_spill] sm:$0xff]  ;;  %v12401_v38 = vld [vmem:[#allocation152_spill] sm:$0xff] }
 0x1ed   : > { %v2223_v13 = vsel %vm2202_vm4, %v12384_v24, %v12383_v11  ;;  %v9906_v43 = vadd.f32 %v9903_v32, %v2581_v12  ;;  %v2093_v5 = vadd.f32 %v1991_v23, %v1854_v37  ;;  %v12389_v61 = vrot.slane %v12388_v7, 2  ;;  %v12404_v24 = vld [vmem:[#allocation180_spill] sm:$0xff] }
 0x1ee   : > { %v2324_v34 = vadd.f32 %v2223_v13, %v2094_v18  ;;  %v12391_v6 = vrot.slane %v12390_v22, 2  ;;  %v2661_v31 = vmax.f32 %v9889_v48, 0.0  ;;  %v2450_v30 = vrot.slane %v2365_v4, 6  ;;  %v12406_v4 = vld [vmem:[#allocation128_spill] sm:$0xff] }
 0x1ef   : > { %v12393_v59 = vrot.slane %v12392_v29, 3  ;;  %v12395_v45 = vrot.slane %v12394_v9, 3  ;;  %v2323_v12 = vadd.f32 %v2221_v19, %v2093_v5  ;;  %v12397_v23 = vrot.slane %v12396_v54, 4  ;;  %v12408_v19 = vld [vmem:[#allocation160_spill] sm:$0xff]  ;;  %v12412_v9 = vld [vmem:[#allocation181_spill] sm:$0xff] }
 0x1f0   : > { %v1328_v39 = vsel %vm1034_vm1, %v12391_v6, %v12389_v61  ;;  %v12399_v37 = vrot.slane %v12398_v56, 4  ;;  %v1873_v53 = vadd.f32 %v12401_v38, %v12400_v15  ;;  %v12403_v11 = vrot.slane %v12402_v16, 4  ;;  %v12419_v38 = vld [vmem:[#allocation134_spill] sm:$0xff] }
 0x1f1   : > { %v1412_v10 = vadd.f32 %v1328_v39, %v1173_v20  ;;  %v1558_v36 = vsel %vm1503_vm2, %v12395_v45, %v12393_v59  ;;  %v12405_v13 = vrot.slane %v12404_v24, 4  ;;  %v12407_v14 = vrot.slane %v12406_v4, 6  ;;  %v12421_v24 = vld [vmem:[#allocation161_spill] sm:$0xff] }
 0x1f2   : > { %v1788_v18 = vsel %vm1733_vm3, %v12399_v37, %v12397_v23  ;;  %v12409_v20 = vrot.slane %v12408_v19, 6  ;;  %v12411_v22 = vrot.slane %v12311_v63, 4  ;;  %v12413_v45 = vrot.slane %v12412_v9, 5  ;;  %v12415_v37 = vld [vmem:[#allocation175_spill] sm:$0xff] }
 0x1f3   : > { %v2029_v27 = vsel %vm1733_vm3, %v12405_v13, %v12403_v11  ;;  %v2451_v3 = vsel %vm2432_vm5, %v12407_v14, %v2450_v30  ;;  %v1642_v7 = vadd.f32 %v1558_v36, %v1412_v10  ;;  %v12410_v61 = vmov %v12405_v13  ;;  %v12418_v36 = vld [vmem:[#allocation171_spill] sm:$0xff]  ;;  %v12423_v13 = vld [vmem:[#allocation121_spill] sm:$0xff] }
 0x1f4   : > { %v2453_v5 = vsel %vm2432_vm5, %v2450_v30, %v12409_v20  ;;  %v2027_v6 = vsel %vm1733_vm3, %v12411_v22, %v12410_v61  ;;  %v2553_v39 = vadd.f32 %v2451_v3, %v2323_v12  ;;  %v2112_v59 = vadd.f32 %v2029_v27, %v1873_v53  ;;  %v12420_v12 = vld [vmem:[#allocation135_spill] sm:$0xff]  ;;  %v12427_v61 = vld [vmem:[#allocation122_spill] sm:$0xff] }
 0x1f5   : > { %v2554_v29 = vadd.f32 %v2453_v5, %v2324_v34  ;;  %v12414_v54 = vrot.slane %v12319_v41, 5  ;;  %v1872_v56 = vadd.f32 %v1788_v18, %v1642_v7  ;;  %v12416_v15 = vrot.slane %v12415_v37, 5  ;;  %v12425_v5 = vld [vmem:[#allocation162_spill] sm:$0xff] }
 0x1f6   : > { %v12417_v30 = vmov %v12413_v45  ;;  %v2383_v63 = vmul.f32 %v9530_v8, %v12418_v36  ;;  %v1157_v34 = vadd.f32 %v12420_v12, %v12419_v38  ;;  %v2597_v53 = vadd.f32 %v9903_v32, %v2553_v39  ;;  %v12434_v36 = vld [vmem:[#allocation168_spill] sm:$0xff] }
 0x1f7   : > { %v2257_v23 = vsel %vm2202_vm4, %v12414_v54, %v12413_v45  ;;  %v2259_v10 = vsel %vm2202_vm4, %v12417_v30, %v12416_v15  ;;  %v9958_v11 = vadd.f32 %v9903_v32, %v2554_v29  ;;  %v12422_v18 = vrot.slane %v12421_v24, 2  ;;  %v12429_v45 = vld [vmem:[#allocation163_spill] sm:$0xff]  ;;  %v12431_v54 = vld [vmem:[#allocation124_spill] sm:$0xff] }
 0x1f8   : > { %v2342_v41 = vadd.f32 %v2259_v10, %v2112_v59  ;;  %v12424_v27 = vrot.slane %v12423_v13, 2  ;;  %v2111_v14 = vadd.f32 %v2027_v6, %v1872_v56  ;;  %v2486_v3 = vrot.slane %v2383_v63, 6  ;;  %v12433_v10 = vld [vmem:[#allocation174_spill] sm:$0xff]  ;;  %v12436_v12 = vld [vmem:[#allocation176_spill] sm:$0xff] }
 0x1f9   : > { %v12426_v7 = vrot.slane %v12425_v5, 3  ;;  %v12428_v22 = vrot.slane %v12427_v61, 3  ;;  %v2634_v39 = vmax.f32 %v2597_v53, 0.0  ;;  %v2635_v29 = vmax.f32 %v9958_v11, 0.0  ;;  %v12441_v61 = vld [vmem:[#allocation44_spill] sm:$0xff]  ;;  %v12497_v11 = vld [vmem:[#allocation54_spill] sm:$0xff] }
 0x1fa   : > { %v1296_v4 = vsel %vm1034_vm1, %v12424_v27, %v12422_v18  ;;  %v12430_v59 = vrot.slane %v12429_v45, 4  ;;  %v12432_v15 = vrot.slane %v12431_v54, 4  ;;  %v1857_v6 = vadd.f32 %v12434_v36, %v12433_v10 }
 0x1fb   : > { %v1396_v20 = vadd.f32 %v1296_v4, %v1157_v34  ;;  %v1526_v9 = vsel %vm1503_vm2, %v12428_v22, %v12426_v7  ;;  %v2341_v56 = vadd.f32 %v2257_v23, %v2111_v14  ;;  %v12435_v63 = vrot.slane %v12325_v58, 6  ;;  %v12438_v4 = vld [vmem:[#allocation74_spill] sm:$0xff] }
 0x1fc   : > { %v1756_v30 = vsel %vm1733_vm3, %v12432_v15, %v12430_v59  ;;  %v12437_v34 = vrot.slane %v12436_v12, 6  ;;  %v2713_v18 = vrot.slane %v2634_v39, 1  ;;  %v9986_v13 = vrot.slane %v2635_v29, 1 }
 0x1fd   : > { %v2487_v38 = vsel %vm2432_vm5, %v12435_v63, %v2486_v3  ;;  %v1626_v24 = vadd.f32 %v1526_v9, %v1396_v20  ;;  %v12439_v5 = vrot.slane %v12438_v4, 4  ;;  %v12440_v7 = vrot.slane %v12374_v62, 4  ;;  %v12444_v20 = vld [vmem:[#allocation81_spill] sm:$0xff] }
 0x1fe   : > { %v2489_v53 = vsel %vm2432_vm5, %v2486_v3, %v12437_v34  ;;  %v2571_v58 = vadd.f32 %v2487_v38, %v2341_v56  ;;  %v12442_v22 = vrot.slane %v12441_v61, 4  ;;  %v12445_v9 = vrot.slane %v12444_v20, 5  ;;  %v12448_v34 = vld [vmem:[#allocation45_spill] sm:$0xff] }
 0x1ff   : > { %v2572_v27 = vadd.f32 %v2489_v53, %v2342_v41  ;;  %v1995_v23 = vsel %vm1733_vm3, %v12440_v7, %v12439_v5  ;;  %v1856_v14 = vadd.f32 %v1756_v30, %v1626_v24  ;;  %v12443_v45 = vmov %v12439_v5  ;;  %v12456_v20 = vld [vmem:[#allocation137_spill] sm:$0xff] }
 0x200   : > { %v1997_v3 = vsel %vm1733_vm3, %v12443_v45, %v12442_v22  ;;  %v12446_v59 = vrot.slane %v12382_v40, 5  ;;  %v2714_v54 = vsel %vm804_vm0, %v9628_v25, %v2713_v18  ;;  %v2716_v62 = vsel %vm804_vm0, %v2713_v18, %v9986_v13  ;;  %v12451_v18 = vld [vmem:[#allocation6_spill] sm:$0xff]  ;;  %v12454_v45 = vld [vmem:[#allocation177_spill] sm:$0xff] }
 0x201   : > { %v10008_v15 = vadd.f32 %v9903_v32, %v2572_v27  ;;  %v2096_v30 = vadd.f32 %v1997_v3, %v1857_v6  ;;  %v12447_v10 = vmax.f32 %v9595_v26, 0.0  ;;  %v10014_v56 = vmax.f32 %v2634_v39, %v2716_v62  ;;  %v12452_v27 = vld [vmem:[#allocation150_spill] sm:$0xff]  ;;  %v12453_v26 = vld [vmem:[#allocation151_spill] sm:$0xff] }
 0x202   : > { %v2225_v41 = vsel %vm2202_vm4, %v12446_v59, %v12445_v9  ;;  %v2615_v40 = vadd.f32 %v9903_v32, %v2571_v58  ;;  %v2095_v63 = vadd.f32 %v1995_v23, %v1856_v14  ;;  %v12449_v25 = vrot.slane %v12448_v34, 5 }
 0x203   : > { %v10012_v36 = vmax.f32 %v12447_v10, %v2714_v54  ;;  %v2653_v38 = vmax.f32 %v10008_v15, 0.0  ;;  %v12450_v53 = vmov %v12445_v9  ;;  %v2367_v6 = vmul.f32 %v9530_v8, %v12451_v18 }
 0x204   : > { %v2227_v24 = vsel %vm2202_vm4, %v12450_v53, %v12449_v25  ;;  %v1175_v4 = vadd.f32 %v12453_v26, %v12452_v27  ;;  %v2893_v5 = vrot.slane %v10014_v56, 2  ;;  %v2652_v7 = vmax.f32 %v2615_v40, 0.0 }
 0x205   : > { %v2891_v39 = vrot.slane %v10012_v36, 2  ;;  %v2325_v23 = vadd.f32 %v2225_v41, %v2095_v63  ;;  %v10031_v58 = vrot.slane %v2653_v38, 1  ;;  %v2326_v14 = vadd.f32 %v2227_v24, %v2096_v30  ;;  %v12459_v63 = vld [vmem:[#allocation32_spill] sm:$0xff]  ;;  %v12460_v30 = vld [vmem:[#allocation93_spill] sm:$0xff] }
 0x206   : > { %v2454_v22 = vrot.slane %v2367_v6, 6  ;;  %v12455_v3 = vrot.slane %v12454_v45, 2  ;;  %v12457_v9 = vrot.slane %v12456_v20, 2  ;;  %v12458_v54 = vrot.slane %v9679_v47, 2  ;;  %v12462_v6 = vld [vmem:[#allocation46_spill] sm:$0xff] }
 0x207   : > { %v2894_v41 = vsel %vm1034_vm1, %v2891_v39, %v2893_v5  ;;  %v2749_v10 = vrot.slane %v2652_v7, 1  ;;  %v12461_v24 = vrot.slane %v12408_v19, 6  ;;  %v12463_v27 = vrot.slane %v12462_v6, 6 }
 0x208   : > { %v1332_v59 = vsel %vm1034_vm1, %v12457_v9, %v12455_v3  ;;  %v2892_v62 = vsel %vm1034_vm1, %v12458_v54, %v2891_v39  ;;  %v2990_v53 = vmax.f32 %v12460_v30, %v2894_v41 }
 0x209   : > { %v1414_v40 = vadd.f32 %v1332_v59, %v1175_v4  ;;  %v2989_v25 = vmax.f32 %v12459_v63, %v2892_v62  ;;  %v2455_v18 = vsel %vm2432_vm5, %v12461_v24, %v2454_v22  ;;  %v2457_v26 = vsel %vm2432_vm5, %v2454_v22, %v12463_v27  ;;  %v12464_v59 = vld [vmem:[#allocation178_spill] sm:$0xff]  ;;  %v12473_v24 = vld [vmem:[#allocation188_spill] sm:$0xff]  ;;  %v12474_v27 = vld [vmem:[#allocation189_spill] sm:$0xff] }
 0x20a   : > { %v2750_v45 = vsel %vm804_vm0, %v9785_v46, %v2749_v10  ;;  %v2752_v39 = vsel %vm804_vm0, %v2749_v10, %v10031_v58  ;;  %v2555_v3 = vadd.f32 %v2455_v18, %v2325_v23  ;;  %v2556_v4 = vadd.f32 %v2457_v26, %v2326_v14  ;;  %v12466_v62 = vld [vmem:[#allocation138_spill] sm:$0xff]  ;;  %v12468_v14 = vld [vmem:[#allocation179_spill] sm:$0xff] }
 0x20b   : > { %v6864_v20 = vpack.c.bf16 %v2990_v53, %v2989_v25  ;;  %v10058_v9 = vmax.f32 %v2651_v49, %v2750_v45  ;;  %v10060_v19 = vmax.f32 %v2652_v7, %v2752_v39  ;;  %v12465_v54 = vrot.slane %v12464_v59, 3  ;;  %v12470_v25 = vld [vmem:[#allocation140_spill] sm:$0xff]  ;;  %v12472_v53 = vld [vmem:[#allocation190_spill] sm:$0xff] }
 0x20c   : > { %v12467_v41 = vrot.slane %v12466_v62, 3  ;;  %v2599_v46 = vadd.f32 %v9903_v32, %v2555_v3  ;;  %v10069_v63 = vadd.f32 %v9903_v32, %v2556_v4  ;;  %v12469_v10 = vrot.slane %v12468_v14, 4  ;;  %v12477_v59 = vld [vmem:[#allocation52_spill] sm:$0xff]  ;;  %v12480_v14 = vld [vmem:[#allocation191_spill] sm:$0xff] }
 0x20d   : > { %v12471_v2 = vrot.slane %v12470_v25, 4  ;;  %6865 = vmatpush3.bf16.msra.mxu0 %v6864_v20  ;;  %v2927_v7 = vrot.slane %v10058_v9, 2  ;;  %v2929_v30 = vrot.slane %v10060_v19, 2  ;;  %v1875_v18 = vadd.f32 %v12473_v24, %v12472_v53  ;;  %v12483_v24 = vld [vmem:[#allocation69_spill] sm:$0xff] }
 0x20e   : > { %v1562_v22 = vsel %vm1503_vm2, %v12467_v41, %v12465_v54  ;;  %v12475_v26 = vrot.slane %v12474_v27, 4  ;;  %v12476_v45 = vrot.slane %v12402_v16, 4  ;;  %v2636_v39 = vmax.f32 %v2599_v46, 0.0 }
 0x20f   : > { %v1644_v23 = vadd.f32 %v1562_v22, %v1414_v40  ;;  %v1792_v49 = vsel %vm1733_vm3, %v12471_v2, %v12469_v10  ;;  %v2637_v3 = vmax.f32 %v10069_v63, 0.0  ;;  %v12478_v54 = vrot.slane %v12477_v59, 4 }
 0x210   : > { %v2031_v40 = vsel %vm1733_vm3, %v12476_v45, %v12475_v26  ;;  %v12479_v20 = vmov %v12475_v26  ;;  %v2928_v41 = vsel %vm1034_vm1, %v2925_v52, %v2927_v7  ;;  %v2930_v16 = vsel %vm1034_vm1, %v2927_v7, %v2929_v30  ;;  %v12486_v26 = vld [vmem:[#allocation182_spill] sm:$0xff] }
 0x211   : > { %v1874_v4 = vadd.f32 %v1792_v49, %v1644_v23  ;;  %v2033_v62 = vsel %vm1733_vm3, %v12479_v20, %v12478_v54  ;;  %v12481_v46 = vrot.slane %v12480_v14, 5  ;;  %v12482_v10 = vrot.slane %v12415_v37, 5  ;;  %v12487_v45 = vld [vmem:[#allocation166_spill] sm:$0xff]  ;;  %v12488_v54 = vld [vmem:[#allocation167_spill] sm:$0xff] }
 0x212   : > { %v2114_v22 = vadd.f32 %v2033_v62, %v1875_v18  ;;  %v3007_v25 = vmax.f32 %v9577_v50, %v2928_v41  ;;  %v3008_v2 = vmax.f32 %v9815_v51, %v2930_v16  ;;  %v2717_v49 = vrot.slane %v2636_v39, 1 }
 0x213   : > { %v2261_v23 = vsel %vm2202_vm4, %v12482_v10, %v12481_v46  ;;  %v10106_v53 = vrot.slane %v2637_v3, 1  ;;  %v2113_v52 = vadd.f32 %v2031_v40, %v1874_v4  ;;  %v12484_v27 = vrot.slane %v12483_v24, 5 }
 0x214   : > { %v12485_v7 = vmov %v12481_v46  ;;  %v2385_v37 = vmul.f32 %v9530_v8, %v12486_v26  ;;  %v1159_v50 = vadd.f32 %v12488_v54, %v12487_v45  ;;  %v6866_v20 = vpack.c.bf16 %v3008_v2, %v3007_v25  ;;  %v12489_v46 = vld [vmem:[#allocation11_spill] sm:$0xff]  ;;  %v12495_v26 = vld [vmem:[#allocation154_spill] sm:$0xff] }
 0x215   : > { %v2263_v18 = vsel %vm2202_vm4, %v12485_v7, %v12484_v27  ;;  %v2718_v51 = vsel %vm804_vm0, %v9986_v13, %v2717_v49  ;;  %v2720_v62 = vsel %vm804_vm0, %v2717_v49, %v10106_v53  ;;  %v2343_v16 = vadd.f32 %v2261_v23, %v2113_v52  ;;  %v12491_v27 = vld [vmem:[#allocation153_spill] sm:$0xff]  ;;  %v12501_v52 = vld [vmem:[#allocation198_spill] sm:$0xff] }
 0x216   : > { %v2344_v40 = vadd.f32 %v2263_v18, %v2114_v22  ;;  %v10123_v4 = vmax.f32 %v2635_v29, %v2718_v51  ;;  %v10125_v41 = vmax.f32 %v2636_v39, %v2720_v62  ;;  %v2490_v14 = vrot.slane %v2385_v37, 6  ;;  %6867 = vmatprep.subr.bf16.mxu0 %v6866_v20  ;;  %v12493_v13 = vld [vmem:[#allocation17_spill] sm:$0xff]  ;;  %v12499_v18 = vld [vmem:[#allocation156_spill] sm:$0xff] }
 0x217   : > { %v12490_v10 = vrot.slane %v12489_v46, 2  ;;  %v12492_v25 = vrot.slane %v12491_v27, 2  ;;  %v12494_v7 = vrot.slane %v12493_v13, 3  ;;  %v12496_v49 = vrot.slane %v12495_v26, 3  ;;  %v12502_v37 = vld [vmem:[#allocation196_spill] sm:$0xff]  ;;  %v12504_v46 = vld [vmem:[#allocation33_spill] sm:$0xff] }
 0x218   : > { %v12498_v29 = vrot.slane %v12497_v11, 4  ;;  %v12500_v39 = vrot.slane %v12499_v18, 4  ;;  %v1859_v45 = vadd.f32 %v12502_v37, %v12501_v52  ;;  %v2895_v54 = vrot.slane %v10123_v4, 2  ;;  %v12506_v26 = vld [vmem:[#allocation50_spill] sm:$0xff] }
 0x219   : > { %v1300_v2 = vsel %vm1034_vm1, %v12492_v25, %v12490_v10  ;;  %v1530_v22 = vsel %vm1503_vm2, %v12496_v49, %v12494_v7  ;;  %v2897_v20 = vrot.slane %v10125_v41, 2  ;;  %v12503_v51 = vrot.slane %v12436_v12, 6 }
 0x21a   : > { %v1760_v23 = vsel %vm1733_vm3, %v12500_v39, %v12498_v29  ;;  %v12505_v10 = vrot.slane %v12504_v46, 6  ;;  %v1398_v7 = vadd.f32 %v1300_v2, %v1159_v50  ;;  %v12507_v49 = vrot.slane %v12506_v26, 4  ;;  %v12509_v39 = vld [vmem:[#allocation8_spill] sm:$0xff] }
 0x21b   : > { %v2491_v62 = vsel %vm2432_vm5, %v12503_v51, %v2490_v14  ;;  %v12508_v11 = vrot.slane %v12441_v61, 4  ;;  %v2896_v18 = vsel %vm1034_vm1, %v2893_v5, %v2895_v54  ;;  %v2898_v12 = vsel %vm1034_vm1, %v2895_v54, %v2897_v20 }
 0x21c   : > { %v2493_v27 = vsel %vm2432_vm5, %v2490_v14, %v12505_v10  ;;  %v2573_v25 = vadd.f32 %v2491_v62, %v2343_v16  ;;  %v12510_v52 = vrot.slane %v12509_v39, 4  ;;  %v12511_v16 = vmov %v12507_v49 }
 0x21d   : > { %v2574_v13 = vadd.f32 %v2493_v27, %v2344_v40  ;;  %v1999_v29 = vsel %vm1733_vm3, %v12508_v11, %v12507_v49  ;;  %v12512_v40 = vld [vmem:[#allocation51_spill] sm:$0xff]  ;;  %v12514_v61 = vrot.slane %v12448_v34, 5  ;;  %v2991_v37 = vmax.f32 %v9679_v47, %v2896_v18  ;;  %v12515_v27 = vld [vmem:[#allocation9_spill] sm:$0xff] }
 0x21e   : > { %v2001_v50 = vsel %vm1733_vm3, %v12511_v16, %v12510_v52  ;;  %v12513_v14 = vrot.slane %v12512_v40, 5  ;;  %v2992_v5 = vmax.f32 %v10012_v36, %v2898_v12  ;;  %v2617_v51 = vadd.f32 %v9903_v32, %v2573_v25  ;;  %v12518_v34 = vld [vmem:[#allocation41_spill] sm:$0xff]  ;;  %v12519_v18 = vld [vmem:[#allocation183_spill] sm:$0xff]  ;;  %v12520_v25 = vld [vmem:[#allocation184_spill] sm:$0xff] }
 0x21f   : > { %v10177_v54 = vadd.f32 %v9903_v32, %v2574_v13  ;;  %v1628_v62 = vadd.f32 %v1530_v22, %v1398_v7  ;;  %v2098_v10 = vadd.f32 %v2001_v50, %v1859_v45  ;;  %v12516_v26 = vrot.slane %v12515_v27, 5  ;;  %v12521_v45 = vld [vmem:[#allocation185_spill] sm:$0xff] }
 0x220   : > { %v2229_v2 = vsel %vm2202_vm4, %v12514_v61, %v12513_v14  ;;  %v12517_v49 = vmov %v12513_v14  ;;  %v2369_v52 = vmul.f32 %v9530_v8, %v12518_v34  ;;  %v6868_v16 = vpack.c.bf16 %v2992_v5, %v2991_v37  ;;  %v12523_v50 = vld [vmem:[#allocation169_spill] sm:$0xff]  ;;  %v12527_v34 = vld [vmem:[#allocation170_spill] sm:$0xff] }
 0x221   : > { %v2231_v11 = vsel %vm2202_vm4, %v12517_v49, %v12516_v26  ;;  %v2654_v47 = vmax.f32 %v2617_v51, 0.0  ;;  %v2655_v36 = vmax.f32 %v10177_v54, 0.0  ;;  %v1177_v12 = vadd.f32 %v12520_v25, %v12519_v18  ;;  %v12525_v51 = vld [vmem:[#allocation186_spill] sm:$0xff] }
 0x222   : > { %v1858_v13 = vadd.f32 %v1760_v23, %v1628_v62  ;;  %v2328_v14 = vadd.f32 %v2231_v11, %v2098_v10  ;;  %v2458_v22 = vrot.slane %v2369_v52, 6  ;;  %v12522_v7 = vrot.slane %v12521_v45, 2  ;;  %6869 = vmatpush3.bf16.msra.mxu0 %v6868_v16  ;;  %v12530_v52 = vld [vmem:[#allocation10_spill] sm:$0xff]  ;;  %v12532_v45 = vld [vmem:[#allocation187_spill] sm:$0xff] }
 0x223   : > { %v12524_v61 = vrot.slane %v12523_v50, 2  ;;  %v2753_v26 = vrot.slane %v2654_v47, 1  ;;  %v10196_v37 = vrot.slane %v2655_v36, 1  ;;  %v12526_v49 = vrot.slane %v12525_v51, 3  ;;  %v12534_v50 = vld [vmem:[#allocation172_spill] sm:$0xff] }
 0x224   : > { %v12528_v18 = vrot.slane %v12527_v34, 3  ;;  %v2097_v62 = vadd.f32 %v1999_v29, %v1858_v13  ;;  %v12529_v10 = vrot.slane %v12462_v6, 6  ;;  %v12531_v25 = vrot.slane %v12530_v52, 6  ;;  %v12536_v34 = vld [vmem:[#allocation37_spill] sm:$0xff] }
 0x225   : > { %v1336_v40 = vsel %vm1034_vm1, %v12524_v61, %v12522_v7  ;;  %v12533_v7 = vrot.slane %v12532_v45, 4  ;;  %v12535_v61 = vrot.slane %v12534_v50, 4  ;;  %v2756_v29 = vsel %vm804_vm0, %v2753_v26, %v10196_v37 }
 0x226   : > { %v1416_v5 = vadd.f32 %v1336_v40, %v1177_v12  ;;  %v1566_v23 = vsel %vm1503_vm2, %v12528_v18, %v12526_v49  ;;  %v2459_v11 = vsel %vm2432_vm5, %v12529_v10, %v2458_v22  ;;  %v2461_v16 = vsel %vm2432_vm5, %v2458_v22, %v12531_v25  ;;  %v12537_v18 = vld [vmem:[#allocation78_spill] sm:$0xff] }
 0x227   : > { %v1796_v12 = vsel %vm1733_vm3, %v12535_v61, %v12533_v7  ;;  %v2754_v40 = vsel %vm804_vm0, %v10031_v58, %v2753_v26  ;;  %v2558_v13 = vadd.f32 %v2461_v16, %v2328_v14  ;;  %v10222_v49 = vmax.f32 %v2654_v47, %v2756_v29  ;;  %v12538_v58 = vld [vmem:[#allocation34_spill] sm:$0xff] }
 0x228   : > { %v1646_v6 = vadd.f32 %v1566_v23, %v1416_v5  ;;  %v10220_v51 = vmax.f32 %v2653_v38, %v2754_v40  ;;  %v2327_v22 = vadd.f32 %v2229_v2, %v2097_v62  ;;  %v1877_v10 = vadd.f32 %v12537_v18, %v12536_v34  ;;  %v12541_v5 = vld [vmem:[#allocation71_spill] sm:$0xff] }
 0x229   : > { %v10227_v25 = vadd.f32 %v9903_v32, %v2558_v13  ;;  %v12539_v7 = vrot.slane %v12538_v58, 4  ;;  %v12540_v26 = vrot.slane %v12477_v59, 4  ;;  %v12542_v15 = vrot.slane %v12541_v5, 4  ;;  %v12547_v34 = vld [vmem:[#allocation67_spill] sm:$0xff] }
 0x22a   : > { %v1876_v45 = vadd.f32 %v1796_v12, %v1646_v6  ;;  %v2931_v2 = vrot.slane %v10220_v51, 2  ;;  %v2933_v23 = vrot.slane %v10222_v49, 2  ;;  %v2557_v62 = vadd.f32 %v2459_v11, %v2327_v22  ;;  %v12544_v12 = vld [vmem:[#allocation31_spill] sm:$0xff] }
 0x22b   : > { %v2035_v14 = vsel %vm1733_vm3, %v12540_v26, %v12539_v7  ;;  %v12543_v38 = vmov %v12539_v7  ;;  %v10243_v50 = vrot.slane %v2661_v31, 1  ;;  %v2639_v59 = vmax.f32 %v10227_v25, 0.0 }
 0x22c   : > { %v2037_v47 = vsel %vm1733_vm3, %v12543_v38, %v12542_v15  ;;  %v2115_v61 = vadd.f32 %v2035_v14, %v1876_v45  ;;  %v12545_v40 = vrot.slane %v12544_v12, 5  ;;  %v12546_v29 = vrot.slane %v12483_v24, 5  ;;  %v12550_v38 = vld [vmem:[#allocation83_spill] sm:$0xff] }
 0x22d   : > { %v2116_v16 = vadd.f32 %v2037_v47, %v1877_v10  ;;  %v2932_v6 = vsel %vm1034_vm1, %v2929_v30, %v2931_v2  ;;  %v2934_v11 = vsel %vm1034_vm1, %v2931_v2, %v2933_v23  ;;  %v2601_v22 = vadd.f32 %v9903_v32, %v2557_v62  ;;  %v12551_v47 = vld [vmem:[#allocation194_spill] sm:$0xff]  ;;  %v12552_v12 = vld [vmem:[#allocation47_spill] sm:$0xff] }
 0x22e   : > { %v2265_v13 = vsel %vm2202_vm4, %v12546_v29, %v12545_v40  ;;  %v12548_v18 = vrot.slane %v12547_v34, 5  ;;  %v12549_v10 = vmov %v12545_v40  ;;  %v3009_v24 = vmax.f32 %v9817_v42, %v2932_v6  ;;  %v12554_v29 = vld [vmem:[#allocation39_spill] sm:$0xff]  ;;  %v12556_v6 = vld [vmem:[#allocation48_spill] sm:$0xff] }
 0x22f   : > { %v3010_v58 = vmax.f32 %v10058_v9, %v2934_v11  ;;  %v10267_v7 = vrot.slane %v2639_v59, 1  ;;  %v2638_v26 = vmax.f32 %v2601_v22, 0.0  ;;  %v2345_v14 = vadd.f32 %v2265_v13, %v2115_v61  ;;  %v12560_v61 = vld [vmem:[#allocation55_spill] sm:$0xff] }
 0x230   : > { %v2267_v45 = vsel %vm2202_vm4, %v12549_v10, %v12548_v18  ;;  %v2387_v15 = vmul.f32 %v9530_v8, %v12322_v28  ;;  %v1161_v2 = vadd.f32 %v12551_v47, %v12550_v38  ;;  %v12553_v40 = vrot.slane %v12552_v12, 2  ;;  %v12558_v18 = vld [vmem:[#allocation42_spill] sm:$0xff]  ;;  %v12561_v13 = vld [vmem:[#allocation7_spill] sm:$0xff]  ;;  %v12562_v38 = vld [vmem:[#allocation49_spill] sm:$0xff] }
 0x231   : > { %v2346_v30 = vadd.f32 %v2267_v45, %v2116_v16  ;;  %v6870_v62 = vpack.c.bf16 %v3010_v58, %v3009_v24  ;;  %v12555_v42 = vrot.slane %v12554_v29, 2  ;;  %v12557_v11 = vrot.slane %v12556_v6, 3  ;;  %v12564_v58 = vld [vmem:[#allocation43_spill] sm:$0xff] }
 0x232   : > { %v12559_v10 = vrot.slane %v12558_v18, 3  ;;  %v1631_v22 = vadd.f32 %v12561_v13, %v12560_v61  ;;  %v2721_v8 = vrot.slane %v2638_v26, 1  ;;  %v2494_v28 = vrot.slane %v2387_v15, 6  ;;  %v12574_v13 = vld [vmem:[#allocation192_spill] sm:$0xff] }
 0x233   : > { %v1304_v9 = vsel %vm1034_vm1, %v12555_v42, %v12553_v40  ;;  %v12563_v24 = vrot.slane %v12562_v38, 4  ;;  %v12565_v47 = vrot.slane %v12564_v58, 4  ;;  %6871 = vmatprep.subr.bf16.mxu0 %v6870_v62  ;;  %v12566_v40 = vld [vmem:[#allocation13_spill] sm:$0xff]  ;;  %v12567_v42 = vld [vmem:[#allocation18_spill] sm:$0xff]  ;;  %v12569_v18 = vrot.slane %v12509_v39, 4  ;;  %v12576_v58 = vld [vmem:[#allocation56_spill] sm:$0xff] }
 0x234   : > { %v1534_v16 = vsel %vm1503_vm2, %v12559_v10, %v12557_v11  ;;  %v1400_v45 = vadd.f32 %v1304_v9, %v1161_v2  ;;  %v1861_v29 = vadd.f32 %v12566_v40, %v1631_v22  ;;  %v12568_v6 = vrot.slane %v12567_v42, 4  ;;  %v12570_v10 = vld [vmem:[#allocation22_spill] sm:$0xff]  ;;  %v12573_v9 = vld [vmem:[#allocation193_spill] sm:$0xff] }
 0x235   : > { %v1764_v12 = vsel %vm1733_vm3, %v12565_v47, %v12563_v24  ;;  %v12571_v61 = vrot.slane %v12570_v10, 5  ;;  %v12572_v15 = vrot.slane %v12515_v27, 5  ;;  %v1179_v38 = vadd.f32 %v12574_v13, %v12573_v9  ;;  %v12578_v10 = vld [vmem:[#allocation19_spill] sm:$0xff] }
 0x236   : > { %v2003_v11 = vsel %vm1733_vm3, %v12569_v18, %v12568_v6  ;;  %v2722_v62 = vsel %vm804_vm0, %v10106_v53, %v2721_v8  ;;  %v2724_v22 = vsel %vm804_vm0, %v2721_v8, %v10267_v7  ;;  %v12575_v24 = vrot.slane %v12504_v46, 6  ;;  %v12579_v8 = vld [vmem:[#allocation24_spill] sm:$0xff]  ;;  %v12582_v13 = vld [vmem:[#allocation195_spill] sm:$0xff] }
 0x237   : > { %v2233_v2 = vsel %vm2202_vm4, %v12572_v15, %v12571_v61  ;;  %v12577_v47 = vrot.slane %v12576_v58, 6  ;;  %v10315_v27 = vmax.f32 %v2637_v3, %v2722_v62  ;;  %v10317_v42 = vmax.f32 %v2638_v26, %v2724_v22  ;;  %v12587_v62 = vld [vmem:[#allocation197_spill] sm:$0xff] }
 0x238   : > { %v2495_v39 = vsel %vm2432_vm5, %v12575_v24, %v2494_v28  ;;  %v1630_v53 = vadd.f32 %v1534_v16, %v1400_v45  ;;  %v2100_v61 = vadd.f32 %v12578_v10, %v1861_v29  ;;  %v12580_v15 = vrot.slane %v12579_v8, 6  ;;  %v12586_v45 = vld [vmem:[#allocation14_spill] sm:$0xff] }
 0x239   : > { %v2497_v40 = vsel %vm2432_vm5, %v2494_v28, %v12577_v47  ;;  %v2575_v6 = vadd.f32 %v2495_v39, %v2345_v14  ;;  %v12581_v46 = vrot.slane %v12530_v52, 6  ;;  %v12583_v24 = vrot.slane %v12582_v13, 2  ;;  %v12584_v28 = vld [vmem:[#allocation40_spill] sm:$0xff]  ;;  %v12589_v39 = vld [vmem:[#allocation29_spill] sm:$0xff] }
 0x23a   : > { %v2576_v18 = vadd.f32 %v2497_v40, %v2346_v30  ;;  %v12585_v47 = vrot.slane %v12584_v28, 2  ;;  %v2899_v3 = vrot.slane %v10315_v27, 2  ;;  %v2901_v26 = vrot.slane %v10317_v42, 2  ;;  %v12592_v28 = vld [vmem:[#allocation27_spill] sm:$0xff] }
 0x23b   : > { %v2463_v9 = vsel %vm2432_vm5, %v12581_v46, %v12580_v15  ;;  %v2619_v30 = vadd.f32 %v9903_v32, %v2575_v6  ;;  %v1860_v16 = vadd.f32 %v1764_v12, %v1630_v53  ;;  %v2330_v52 = vadd.f32 %v12586_v45, %v2100_v61  ;;  %v12591_v15 = vld [vmem:[#allocation28_spill] sm:$0xff] }
 0x23c   : > { %v1340_v63 = vsel %vm1034_vm1, %v12585_v47, %v12583_v24  ;;  %v10334_v14 = vadd.f32 %v9903_v32, %v2576_v18  ;;  %v12588_v22 = vrot.slane %v12587_v62, 3  ;;  %v12590_v40 = vrot.slane %v12589_v39, 3 }
 0x23d   : > { %v1418_v29 = vadd.f32 %v1340_v63, %v1179_v38  ;;  %v2900_v8 = vsel %vm1034_vm1, %v2897_v20, %v2899_v3  ;;  %v2902_v6 = vsel %vm1034_vm1, %v2899_v3, %v2901_v26  ;;  %v2656_v18 = vmax.f32 %v2619_v30, 0.0  ;;  %v12594_v63 = vld [vmem:[#allocation25_spill] sm:$0xff] }
 0x23e   : > { %v1570_v10 = vsel %vm1503_vm2, %v12590_v40, %v12588_v22  ;;  %v2657_v12 = vmax.f32 %v10334_v14, 0.0  ;;  %v2993_v53 = vmax.f32 %v10014_v56, %v2900_v8  ;;  %v2994_v38 = vmax.f32 %v10123_v4, %v2902_v6  ;;  %v12596_v4 = vld [vmem:[#allocation77_spill] sm:$0xff]  ;;  %v12599_v40 = vld [vmem:[#allocation35_spill] sm:$0xff] }
 0x23f   : > { %v2099_v61 = vadd.f32 %v2003_v11, %v1860_v16  ;;  %v2560_v46 = vadd.f32 %v12591_v15, %v2330_v52  ;;  %v2757_v13 = vrot.slane %v2656_v18, 1  ;;  %v1648_v20 = vadd.f32 %v1570_v10, %v1418_v29 }
 0x240   : > { %v10354_v24 = vrot.slane %v2657_v12, 1  ;;  %v12593_v47 = vrot.slane %v12592_v28, 4  ;;  %v12595_v3 = vrot.slane %v12594_v63, 4  ;;  %v6872_v45 = vpack.c.bf16 %v2994_v38, %v2993_v53 }
 0x241   : > { %v2329_v62 = vadd.f32 %v2233_v2, %v2099_v61  ;;  %v2604_v56 = vadd.f32 %v9903_v32, %v2560_v46  ;;  %v12597_v11 = vrot.slane %v12596_v4, 4  ;;  %v12598_v16 = vrot.slane %v12541_v5, 4  ;;  %v12602_v61 = vld [vmem:[#allocation53_spill] sm:$0xff] }
 0x242   : > { %v1800_v30 = vsel %vm1733_vm3, %v12595_v3, %v12593_v47  ;;  %v2758_v22 = vsel %vm804_vm0, %v10196_v37, %v2757_v13  ;;  %v2760_v29 = vsel %vm804_vm0, %v2757_v13, %v10354_v24  ;;  %v12600_v10 = vrot.slane %v12599_v40, 5  ;;  %6873 = vmatpush3.bf16.msra.mxu0 %v6872_v45  ;;  %v12607_v47 = vld [vmem:[#allocation38_spill] sm:$0xff] }
 0x243   : > { %v2039_v52 = vsel %vm1733_vm3, %v12598_v16, %v12597_v11  ;;  %v1878_v39 = vadd.f32 %v1800_v30, %v1648_v20  ;;  %v12601_v8 = vrot.slane %v12547_v34, 5  ;;  %v10378_v6 = vmax.f32 %v2655_v36, %v2758_v22  ;;  %v12605_v20 = vld [vmem:[#allocation36_spill] sm:$0xff]  ;;  %v12613_v22 = vld [vmem:[#allocation5_spill] sm:$0xff] }
 0x244   : > { %v10380_v5 = vmax.f32 %v2656_v18, %v2760_v29  ;;  %v2559_v53 = vadd.f32 %v2463_v9, %v2329_v62  ;;  %v2641_v38 = vmax.f32 %v2604_v56, 0.0  ;;  %v12603_v15 = vrot.slane %v12602_v61, 6  ;;  %v12609_v62 = vld [vmem:[#allocation58_spill] sm:$0xff]  ;;  %v12611_v56 = vld [vmem:[#allocation16_spill] sm:$0xff] }
 0x245   : > { %v2269_v2 = vsel %vm2202_vm4, %v12601_v8, %v12600_v10  ;;  %v2117_v37 = vadd.f32 %v2039_v52, %v1878_v39  ;;  %v12604_v46 = vrot.slane %v12576_v58, 6  ;;  %v951_v34 = vadd.f32 %v9747_v0, %v12605_v20 }
 0x246   : > { %v12606_v28 = vrot.slane %v9358_v17, 2  ;;  %v12608_v54 = vrot.slane %v12607_v47, 2  ;;  %v2935_v18 = vrot.slane %v10378_v6, 2  ;;  %v2937_v9 = vrot.slane %v10380_v5, 2 }
 0x247   : > { %v2499_v13 = vsel %vm2432_vm5, %v12604_v46, %v12603_v15  ;;  %v2603_v63 = vadd.f32 %v9903_v32, %v2559_v53  ;;  %v2727_v3 = vrot.slane %v2641_v38, 1  ;;  %v2347_v30 = vadd.f32 %v2269_v2, %v2117_v37  ;;  %v12614_v2 = vld [vmem:[#allocation20_spill] sm:$0xff] }
 0x248   : > { %v1344_v36 = vsel %vm1034_vm1, %v12608_v54, %v12606_v28  ;;  %v1181_v58 = vadd.f32 %v9767_v55, %v951_v34  ;;  %v2662_v45 = vmax.f32 %v9906_v43, 0.0  ;;  %v12610_v0 = vrot.slane %v12609_v62, 2  ;;  %v3021_v28 = vld [vmem:[%s11400_s9 + $0x10] sm:$0xff] }
 0x249   : > { %v12612_v17 = vrot.slane %v12611_v56, 2  ;;  %v2936_v11 = vsel %vm1034_vm1, %v2933_v23, %v2935_v18  ;;  %v2938_v16 = vsel %vm1034_vm1, %v2935_v18, %v2937_v9  ;;  %v2640_v52 = vmax.f32 %v2603_v63, 0.0  ;;  %6513 = vmatprep.mubr.msk.f32.mxu1 %vm3061_vm6, %v3021_v28 }
 0x24a   : > { %v2730_v55 = vsel %vm804_vm0, %v2727_v3, %v12613_v22  ;;  %v3011_v43 = vmax.f32 %v10060_v19, %v2936_v11  ;;  %v3012_v29 = vmax.f32 %v10220_v51, %v2938_v16  ;;  %v2577_v39 = vadd.f32 %v2499_v13, %v2347_v30 }
 0x24b   : > { %v2912_v4 = vsel %vm1034_vm1, %v12612_v17, %v12610_v0  ;;  %v2816_v40 = vmax.f32 %v2641_v38, %v2730_v55  ;;  %v2725_v10 = vrot.slane %v2640_v52, 1  ;;  %v10416_v8 = vrot.slane %v2659_v60, 1 }
 0x24c   : > { %v1420_v23 = vadd.f32 %v1344_v36, %v1181_v58  ;;  %v12615_v53 = vrot.slane %v12614_v2, 2  ;;  %v12616_v37 = vmov %v12610_v0  ;;  %v6874_v15 = vpack.c.bf16 %v3012_v29, %v3011_v43  ;;  %v12622_v0 = vld [vmem:[#allocation68_spill] sm:$0xff] }
 0x24d   : > { %v2621_v46 = vadd.f32 %v9903_v32, %v2577_v39  ;;  %v2907_v19 = vrot.slane %v2816_v40, 2  ;;  %v2726_v51 = vsel %vm804_vm0, %v10267_v7, %v2725_v10  ;;  %v2728_v38 = vsel %vm804_vm0, %v2725_v10, %v2727_v3  ;;  %v12619_v3 = vld [vmem:[#allocation72_spill] sm:$0xff] }
 0x24e   : > { %v2914_v61 = vsel %vm1034_vm1, %v12616_v37, %v12615_v53  ;;  %v1650_v13 = vadd.f32 %v9801_v44, %v1420_v23  ;;  %v2839_v34 = vrot.slane %v2662_v45, 1  ;;  %6875 = vmatprep.subr.bf16.mxu0 %v6874_v15  ;;  %v2814_v47 = vmax.f32 %v2639_v59, %v2726_v51  ;;  %v12625_v23 = vld [vmem:[#allocation101_spill] sm:$0xff] }
 0x24f   : > { %v3000_v20 = vmax.f32 %v2816_v40, %v2914_v61  ;;  %v2815_v54 = vmax.f32 %v2640_v52, %v2728_v38  ;;  %v2658_v36 = vmax.f32 %v2621_v46, 0.0  ;;  %v12617_v18 = vmov %v12612_v17 }
 0x250   : > { %v2910_v63 = vsel %vm1034_vm1, %v2907_v19, %v12617_v18  ;;  %v12618_v7 = vrot.slane %v12344_v33, 4  ;;  %v12620_v30 = vrot.slane %v12619_v3, 4  ;;  %v1880_v58 = vadd.f32 %v9881_v57, %v1650_v13 }
 0x251   : > { %v12621_v62 = vrot.slane %v12358_v35, 5  ;;  %v12623_v25 = vrot.slane %v12622_v0, 5  ;;  %v2903_v17 = vrot.slane %v2814_v47, 2  ;;  %v2905_v11 = vrot.slane %v2815_v54, 2  ;;  %v3030_v0 = vld [vmem:[%s11400_s9 + $0x58] sm:$0xff] }
 0x252   : > { %v2043_v44 = vsel %vm1733_vm3, %v12620_v30, %v12618_v7  ;;  %v2761_v56 = vrot.slane %v2658_v36, 1  ;;  %v2998_v16 = vmax.f32 %v2814_v47, %v2910_v63  ;;  %v2840_v52 = vsel %vm804_vm0, %v10243_v50, %v2839_v34 }
 0x253   : > { %v2273_v59 = vsel %vm2202_vm4, %v12623_v25, %v12621_v62  ;;  %v2119_v33 = vadd.f32 %v2043_v44, %v1880_v58  ;;  %v2999_v22 = vmax.f32 %v2815_v54, %v2912_v4  ;;  %v2904_v57 = vsel %vm1034_vm1, %v2901_v26, %v2903_v17  ;;  %v3027_v58 = vld [vmem:[%s11400_s9 + $0x40] sm:$0xff]  ;;  %v3022_v62 = vld [vmem:[%s11400_s9 + $0x18] sm:$0xff] }
 0x254   : > { %v2906_v35 = vsel %vm1034_vm1, %v2903_v17, %v2905_v11  ;;  %v2762_v55 = vsel %vm804_vm0, %v10354_v24, %v2761_v56  ;;  %v2764_v43 = vsel %vm804_vm0, %v2761_v56, %v10416_v8  ;;  %v2995_v29 = vmax.f32 %v10125_v41, %v2904_v57  ;;  %v3026_v25 = vld [vmem:[%s11400_s9 + $0x38] sm:$0xff]  ;;  %v3025_v17 = vld [vmem:[%s11400_s9 + $0x30] sm:$0xff] }
 0x255   : > { %v2996_v39 = vmax.f32 %v10315_v27, %v2906_v35  ;;  %v2832_v40 = vmax.f32 %v2657_v12, %v2762_v55  ;;  %v2833_v4 = vmax.f32 %v2658_v36, %v2764_v43  ;;  %v12624_v10 = vrot.slane %v12361_v1, 6  ;;  %v3029_v56 = vld [vmem:[%s11400_s9 + $0x50] sm:$0xff]  ;;  %v3031_v35 = vld [vmem:[%s11400_s9 + $0x60] sm:$0xff]  ;;  %v3048_v55 = vld [vmem:[%s11400_s9 + $0xe8] sm:$0xff] }
 0x256   : > { %v12626_v26 = vrot.slane %v12625_v23, 6  ;;  %v2908_v53 = vsel %vm1034_vm1, %v2905_v11, %v2907_v19  ;;  %v2349_v24 = vadd.f32 %v2273_v59, %v2119_v33  ;;  %v6884_v37 = vpack.c.bf16 %v3000_v20, %v2999_v22  ;;  %v3033_v59 = vld [vmem:[%s11400_s9 + $0x70] sm:$0xff]  ;;  %v3036_v11 = vld [vmem:[%s11400_s9 + $0x88] sm:$0xff]  ;;  %v3035_v43 = vld [vmem:[%s11400_s9 + $0x80] sm:$0xff] }
 0x257   : > { %v6876_v61 = vpack.c.bf16 %v2996_v39, %v2995_v29  ;;  %v2939_v15 = vrot.slane %v2832_v40, 2  ;;  %v2941_v46 = vrot.slane %v2833_v4, 2  ;;  %v2997_v41 = vmax.f32 %v10317_v42, %v2908_v53  ;;  %v3028_v33 = vld [vmem:[%s11400_s9 + $0x48] sm:$0xff]  ;;  %v3045_v57 = vld [vmem:[%s11400_s9 + $0xd0] sm:$0xff]  ;;  %v3051_v29 = vld [vmem:[%s11400_s9 + $0x100] sm:$0xff] }
 0x258   : > { %v2503_v2 = vsel %vm2432_vm5, %v12626_v26, %v12624_v10  ;;  %v2845_v14 = vmax.f32 %v2661_v31, %v2840_v52  ;;  %v2846_v19 = vmax.f32 %v2662_v45, %v2839_v34  ;;  %v3042_v52 = vld [vmem:[%s11400_s9 + $0xb8] sm:$0xff]  ;;  %v3032_v22 = vld [vmem:[%s11400_s9 + $0x68] sm:$0xff]  ;;  %v3057_v10 = vld [vmem:[%s11400_s9 + $0x130] sm:$0xff] }
 0x259   : > { %v2579_v27 = vadd.f32 %v2503_v2, %v2349_v24  ;;  %6877 = vmatpush3.bf16.msra.mxu0 %v6876_v61  ;;  %v2940_v1 = vsel %vm1034_vm1, %v2937_v9, %v2939_v15  ;;  %v2942_v12 = vsel %vm1034_vm1, %v2939_v15, %v2941_v46  ;;  %v6880_v51 = vpack.c.bf16 %v2998_v16, %v2997_v41  ;;  %v3039_v16 = vld [vmem:[%s11400_s9 + $0xa0] sm:$0xff]  ;;  %v3034_v39 = vld [vmem:[%s11400_s9 + $0x78] sm:$0xff]  ;;  %v3037_v23 = vld [vmem:[%s11400_s9 + $0x90] sm:$0xff] }
 0x25a   : > { %v3013_v20 = vmax.f32 %v10222_v49, %v2940_v1  ;;  %v3014_v38 = vmax.f32 %v10378_v6, %v2942_v12  ;;  %v2947_v47 = vrot.slane %v2845_v14, 2  ;;  %v2949_v48 = vrot.slane %v2846_v19, 2  ;;  %v3060_v26 = vld [vmem:[%s11400_s9 + $0x148] sm:$0xff]  ;;  %v3041_v2 = vld [vmem:[%s11400_s9 + $0xb0] sm:$0xff]  ;;  %v3047_v61 = vld [vmem:[%s11400_s9 + $0xe0] sm:$0xff] }
 0x25b   : > { %v2623_v13 = vadd.f32 %v9903_v32, %v2579_v27  ;;  %v3040_v53 = vld [vmem:[%s11400_s9 + $0xa8] sm:$0xff]  ;;  %v3046_v15 = vld [vmem:[%s11400_s9 + $0xd8] sm:$0xff]  ;;  %v3049_v41 = vld [vmem:[%s11400_s9 + $0xf0] sm:$0xff] }
 0x25c   : > { %v6878_v42 = vpack.c.bf16 %v3014_v38, %v3013_v20  ;;  %v2950_v6 = vsel %vm1034_vm1, %v2947_v47, %v2949_v48  ;;  %v3044_v24 = vld [vmem:[%s11400_s9 + $0xc8] sm:$0xff]  ;;  %v3053_v27 = vld [vmem:[%s11400_s9 + $0x110] sm:$0xff]  ;;  %v3055_v12 = vld [vmem:[%s11400_s9 + $0x120] sm:$0xff] }
 0x25d   : > { %v2660_v28 = vmax.f32 %v2623_v13, 0.0  ;;  %v3052_v14 = vld [vmem:[%s11400_s9 + $0x108] sm:$0xff]  ;;  %v3058_v19 = vld [vmem:[%s11400_s9 + $0x138] sm:$0xff]  ;;  %v7036_v20 = vld [vmem:[%s11394_s3 + $0x10] sm:$0xff]  }
 0x25e   : > { %6879 = vmatprep.subr.bf16.mxu0 %v6878_v42  ;;  %v3056_v1 = vld [vmem:[%s11400_s9 + $0x128] sm:$0xff]  ;;  %v7037_v38 = vld [vmem:[%s11394_s3 + $0x18] sm:$0xff]   ;;  %v10631_v13 = vld [vmem:[%s11394_s3] sm:$0xff]  }
 0x25f   : > { %v2765_v31 = vrot.slane %v2660_v28, 1  ;;  %6881 = vmatpush3.bf16.msra.mxu0 %v6880_v51  ;;  %v3059_v51 = vld [vmem:[%s11400_s9 + $0x140] sm:$0xff] }
 0x261   : > { %v2766_v9 = vsel %vm804_vm0, %v10416_v8, %v2765_v31  ;;  %v2838_v54 = vsel %vm804_vm0, %v2765_v31, %v10243_v50 }
 0x262   : > { %v2834_v49 = vmax.f32 %v2659_v60, %v2766_v9  ;;  %v2844_v45 = vmax.f32 %v2660_v28, %v2838_v54  ;;  %v3019_v60 = vld [vmem:[%s11400_s9] sm:$0xff] }
 0x264   : > { %v2943_v32 = vrot.slane %v2834_v49, 2  ;;  %v2945_v34 = vrot.slane %v2844_v45, 2  ;;  %v3018_v36 = vmax.f32 %v2834_v49, %v2950_v6 }
 0x266   : > { %v2944_v18 = vsel %vm1034_vm1, %v2941_v46, %v2943_v32  ;;  %v2946_v63 = vsel %vm1034_vm1, %v2943_v32, %v2945_v34  ;;  %v2948_v7 = vsel %vm1034_vm1, %v2945_v34, %v2947_v47  ;;  %v3050_v46 = vld [vmem:[%s11400_s9 + $0xf8] sm:$0xff] }
 0x267   : > { %v3015_v8 = vmax.f32 %v10380_v5, %v2944_v18  ;;  %v3016_v3 = vmax.f32 %v2832_v40, %v2946_v63  ;;  %v3017_v30 = vmax.f32 %v2833_v4, %v2948_v7  ;;  %v3023_v5 = vld [vmem:[%s11400_s9 + $0x20] sm:$0xff]  ;;  %v3054_v40 = vld [vmem:[%s11400_s9 + $0x118] sm:$0xff] }
 0x268   : > { %v3038_v4 = vld [vmem:[%s11400_s9 + $0x98] sm:$0xff] }
 0x269   : > { %v6882_v50 = vpack.c.bf16 %v3016_v3, %v3015_v8  ;;  %v6886_v44 = vpack.c.bf16 %v3018_v36, %v3017_v30 }
 0x26b   : > { %6883 = vmatprep.subr.bf16.mxu0 %v6882_v50  ;;  %6887 = vmatprep.subr.bf16.mxu1 %v6886_v44 }
 0x26c   : > { %6885 = vmatpush3.bf16.msra.mxu0 %v6884_v37  ;;  %6889 = vmatpush3.bf16.msra.mxu1 %v6886_v44  ;;  %v3043_v37 = vld [vmem:[%s11400_s9 + $0xc0] sm:$0xff] }
 0x26d   : > { %6534 = vmatprep.subr.bf16.mxu1 %v7036_v20 }
 0x26f   : > { %3169 = vmatmul.mubr.f32.vlgmr.msra.gmra.mrb[0].mxu0 %v3019_v60  ;;  %6514 = vmatmul.mubr.msk.f32.vlgmr.msra.gmra.mrb[0].mxu1 %vm3061_vm6, %v3024_v21 }
 0x270   : > { %3173 = vmatprep.mubr.f32.mxu0 %v3023_v5  ;;  %6516 = vmatprep.mubr.msk.f32.mxu1 %vm3061_vm6, %v3027_v58 }
 0x271   : > { %6535 = vmatpush3.bf16.msra.mxu1 %v7036_v20 }
 0x272   : > { %6536 = vmatprep.subr.bf16.mxu1 %v7037_v38 }
 0x273   : > { %3174 = vmatmul.mubr.f32.gmra.mrb[2].mxu0 %v3022_v62  ;;  %6517 = vmatmul.mubr.msk.f32.gmra.mrb[2].mxu1 %vm3061_vm6, %v3030_v0 }
 0x274   : > { %3178 = vmatprep.mubr.f32.mxu0 %v3026_v25  ;;  %6519 = vmatprep.mubr.msk.f32.mxu1 %vm3061_vm6, %v3033_v59 }
 0x275   : > { %6537 = vmatpush3.bf16.msra.mxu1 %v7037_v38 }
 0x276   : > { %6550 = vmatprep.subr.bf16.mxu1 %v10631_v13 }
 0x277   : > { %3179 = vmatmul.mubr.f32.gmra.mrb[4].mxu0 %v3025_v17  ;;  %6520 = vmatmul.mubr.msk.f32.gmra.mrb[4].mxu1 %vm3061_vm6, %v3036_v11 }
 0x278   : > { %3183 = vmatprep.mubr.f32.mxu0 %v3029_v56  ;;  %6522 = vmatprep.mubr.msk.f32.mxu1 %vm3061_vm6, %v3039_v16 }
 0x27b   : > { %3184 = vmatmul.mubr.f32.gmra.mrb[6].mxu0 %v3028_v33  ;;  %6523 = vmatmul.mubr.msk.f32.gmra.mrb[6].mxu1 %vm3061_vm6, %v3042_v52 }
 0x27c   : > { %3188 = vmatprep.mubr.f32.mxu0 %v3032_v22  ;;  %6525 = vmatprep.mubr.msk.f32.mxu1 %vm3061_vm6, %v3045_v57 }
 0x27f   : > { %3189 = vmatmul.mubr.f32.gmra.mrb[8].mxu0 %v3031_v35  ;;  %6526 = vmatmul.mubr.msk.f32.gmra.mrb[8].mxu1 %vm3061_vm6, %v3048_v55 }
 0x280   : > { %3193 = vmatprep.mubr.f32.mxu0 %v3035_v43  ;;  %6528 = vmatprep.mubr.msk.f32.mxu1 %vm3061_vm6, %v3051_v29 }
 0x283   : > { %3194 = vmatmul.mubr.f32.gmra.mrb[10].mxu0 %v3034_v39  ;;  %6529 = vmatmul.mubr.msk.f32.gmra.mrb[10].mxu1 %vm3061_vm6, %v3054_v40 }
 0x284   : > { %3198 = vmatprep.mubr.f32.mxu0 %v3038_v4  ;;  %6531 = vmatprep.mubr.msk.f32.mxu1 %vm3061_vm6, %v3057_v10 }
 0x287   : > { %3199 = vmatmul.mubr.f32.gmra.mrb[12].mxu0 %v3037_v23  ;;  %6532 = vmatmul.mubr.msk.f32.gmra.mrb[12].mxu1 %vm3061_vm6, %v3060_v26 }
 0x288   : > { %3203 = vmatprep.mubr.f32.mxu0 %v3041_v2 }
 0x28b   : > { %3204 = vmatmul.mubr.f32.gmra.mrb[14].mxu0 %v3040_v53 }
 0x28c   : > { %3208 = vmatprep.mubr.f32.mxu0 %v3044_v24 }
 0x28f   : > { %3209 = vmatmul.mubr.f32.gmra.mrb[16].mxu0 %v3043_v37 }
 0x290   : > { %3213 = vmatprep.mubr.f32.mxu0 %v3047_v61 }
 0x293   : > { %3214 = vmatmul.mubr.f32.gmra.mrb[18].mxu0 %v3046_v15 }
 0x294   : > { %3218 = vmatprep.mubr.f32.mxu0 %v3050_v46 }
 0x297   : > { %3219 = vmatmul.mubr.f32.gmra.mrb[20].mxu0 %v3049_v41 }
 0x298   : > { %3223 = vmatprep.mubr.f32.mxu0 %v3053_v27 }
 0x29b   : > { %3224 = vmatmul.mubr.f32.gmra.mrb[22].mxu0 %v3052_v14 }
 0x29c   : > { %3228 = vmatprep.mubr.f32.mxu0 %v3056_v1 }
 0x29f   : > { %3229 = vmatmul.mubr.f32.gmra.mrb[24].mxu0 %v3055_v12 }
 0x2a0   : > { %3233 = vmatprep.mubr.f32.mxu0 %v3059_v51 }
 0x2a3   : > { %3234 = vmatmul.mubr.f32.gmra.mrb[26].mxu0 %v3058_v19 }
 0x342   : > { %v6294_v42 = vpop.f32.mrb[0].mxu0  ;;  %v6515_v28 = vpop.f32.mrb[0].mxu1 }
 0x343   : > { %v6295_v47 = vpop.f32.mrb[1].mxu0  ;;  %v3305_v48 = vpop.f32.mrb[1].mxu1 }
 0x344   : > { %v6296_v31 = vadd.f32 %v6295_v47, %v6294_v42 }
 0x346   : > { %v3306_v9 = vadd.f32 %v6296_v31, %v3305_v48  ;;  %v6297_v54 = vpop.f32.mrb[2].mxu0  ;;  %v6518_v49 = vpop.f32.mrb[2].mxu1 }
 0x347   : > { %v6298_v45 = vpop.f32.mrb[3].mxu0  ;;  %v3315_v6 = vpop.f32.mrb[3].mxu1 }
 0x348   : > { %v6299_v32 = vadd.f32 %v6298_v45, %v6297_v54 }
 0x34a   : > { %v3311_v34 = vadd.f32 %v6515_v28, %v6299_v32  ;;  %v6300_v36 = vpop.f32.mrb[4].mxu0  ;;  %v6521_v18 = vpop.f32.mrb[4].mxu1 }
 0x34b   : > { %v6301_v63 = vpop.f32.mrb[5].mxu0  ;;  %v3325_v7 = vpop.f32.mrb[5].mxu1 }
 0x34c   : > { %v10634_v8 = vpack.c.bf16 %v3311_v34, %v3306_v9  ;;  %v6302_v3 = vadd.f32 %v6301_v63, %v6300_v36 }
 0x34e   : > { %v3316_v30 = vadd.f32 %v6302_v3, %v3315_v6  ;;  %v6303_v50 = vpop.f32.mrb[6].mxu0  ;;  %v10636_v44 = vpop.f32.mrb[6].mxu1  ;;  %v3394_v21 = vshll.u32 %v10634_v8, 16  ;;  %v3392_v57 = vshrl.u32 %v10634_v8, 16  ;;  %v3666_v35 = vrot.slane %v10634_v8, 1 }
 0x34f   : > { %v6304_v60 = vpop.f32.mrb[7].mxu0  ;;  %v3335_v5 = vpop.f32.mrb[7].mxu1 }
 0x350   : > { %v3798_v58 = vpack.c.bf16 %v3316_v30, %v3311_v34  ;;  %v6305_v62 = vadd.f32 %v6304_v60, %v6303_v50  ;;  %v3396_v11 = vrot.slane %v3394_v21, 1 }
 0x352   : > { %v3321_v0 = vadd.f32 %v6518_v49, %v6305_v62  ;;  %v6306_v25 = vpop.f32.mrb[8].mxu0  ;;  %v10639_v59 = vpop.f32.mrb[8].mxu1  ;;  %v3954_v16 = vshrl.u32 %v3798_v58, 16  ;;  %v3957_v33 = vshll.u32 %v3798_v58, 16  ;;  %v3397_v23 = vor.u32 %v3396_v11, %v3392_v57 }
 0x353   : > { %v6307_v17 = vpop.f32.mrb[9].mxu0  ;;  %v10641_v56 = vpop.f32.mrb[9].mxu1  ;;  %v3815_v46 = vrot.slane %v3798_v58, 1  ;;  %v4133_v20 = vrot.slane %v3798_v58, 2 }
 0x354   : > { %v10643_v52 = vpack.c.bf16 %v3321_v0, %v3316_v30  ;;  %v6308_v22 = vadd.f32 %v6307_v17, %v6306_v25  ;;  %v3956_v2 = vrot.slane %v3954_v16, 1  ;;  %v3959_v53 = vrot.slane %v3957_v33, 2 }
 0x356   : > { %v3326_v55 = vadd.f32 %v6308_v22, %v3325_v7  ;;  %v6309_v43 = vpop.f32.mrb[10].mxu0  ;;  %v3399_v29 = vshll.u32 %v10643_v52, 16  ;;  %v3403_v39 = vshrl.u32 %v10643_v52, 16  ;;  %v10649_v40 = vpop.f32.mrb[10].mxu1  ;;  %v3667_v4 = vrot.slane %v10643_v52, 1 }
 0x357   : > { %v6310_v10 = vpop.f32.mrb[11].mxu0  ;;  %v10652_v26 = vpop.f32.mrb[11].mxu1  ;;  %v3960_v45 = vor.u32 %v3959_v53, %v3956_v2  ;;  %v4272_v36 = vrot.slane %v10643_v52, 2  ;;  %v4565_v53 = vrot.slane %v10643_v52, 3 }
 0x358   : > { %v10654_v24 = vpack.c.bf16 %v3326_v55, %v3321_v0  ;;  %v6311_v37 = vadd.f32 %v6310_v10, %v6309_v43  ;;  %v3401_v61 = vrot.slane %v3399_v29, 1  ;;  %v10657_v15 = vsel %vm804_vm0, %v3666_v35, %v3667_v4 }
 0x359   : > { %v10659_v41 = vrot.slane %v3403_v39, 2  ;;  %v4411_v27 = vrot.slane %v3399_v29, 3 }
 0x35a   : > { %v3331_v14 = vadd.f32 %v6521_v18, %v6311_v37  ;;  %v6312_v1 = vpop.f32.mrb[12].mxu0  ;;  %v3402_v12 = vsel %vm3390_vm7, %v3397_v23, %v3401_v61  ;;  %v10662_v51 = vpop.f32.mrb[12].mxu1  ;;  %v3816_v19 = vrot.slane %v10654_v24, 1  ;;  %v3962_v28 = vshrl.u32 %v10654_v24, 16 }
 0x35b   : > { %v6313_v38 = vpop.f32.mrb[13].mxu0  ;;  %6538 = vmatprep.mubr.msk.bf16.mxu1 %vm3450_vm8, %v3402_v12  ;;  %v10666_v42 = vpop.f32.mrb[13].mxu1  ;;  %v3965_v47 = vshll.u32 %v10654_v24, 16  ;;  %v4134_v48 = vrot.slane %v10654_v24, 2  ;;  %v4412_v31 = vor.u32 %v4411_v27, %v10659_v41  ;;  %v3405_v50 = vor.u32 %v3403_v39, %v3401_v61  ;;  %v7039_v39 = vld [vmem:[%s11394_s3 + $0x8] sm:$0xff]  }
 0x35c   : > { %v10672_v9 = vpack.c.bf16 %v3331_v14, %v3326_v55  ;;  %v6314_v54 = vadd.f32 %v6313_v38, %v6312_v1  ;;  %v10675_v49 = vsel %vm804_vm0, %v3815_v46, %v3816_v19  ;;  %v3964_v6 = vrot.slane %v3962_v28, 1 }
 0x35d   : > { %v3967_v32 = vrot.slane %v3965_v47, 2  ;;  %v10678_v34 = vsel %vm1034_vm1, %v4133_v20, %v4134_v48 }
 0x35e   : > { %v3336_v18 = vadd.f32 %v6314_v54, %v3335_v5  ;;  %v6315_v63 = vpop.f32.mrb[14].mxu0  ;;  %v3407_v7 = vshll.u32 %v10672_v9, 16  ;;  %v3411_v3 = vshrl.u32 %v10672_v9, 16  ;;  %v3669_v30 = vrot.slane %v10672_v9, 1 }
 0x35f   : > { %v6316_v60 = vpop.f32.mrb[15].mxu0  ;;  %v3968_v21 = vor.u32 %v3967_v32, %v3964_v6  ;;  %v4273_v58 = vrot.slane %v10672_v9, 2  ;;  %v4566_v62 = vrot.slane %v10672_v9, 3 }
 0x360   : > { %v10686_v0 = vpack.c.bf16 %v3336_v18, %v3331_v14  ;;  %v6317_v25 = vadd.f32 %v6316_v60, %v6315_v63  ;;  %v3409_v17 = vrot.slane %v3407_v7, 1  ;;  %v10689_v5 = vsel %vm804_vm0, %v3667_v4, %v3669_v30 }
 0x361   : > { %v10692_v11 = vsel %vm3952_vm9, %v3960_v45, %v3968_v21  ;;  %v10695_v16 = vsel %vm1034_vm1, %v4272_v36, %v4273_v58  ;;  %v4413_v33 = vrot.slane %v3411_v3, 2  ;;  %v4414_v22 = vrot.slane %v3407_v7, 3 }
 0x362   : > { %v3818_v57 = vrot.slane %v10686_v0, 1  ;;  %v3971_v35 = vshrl.u32 %v10686_v0, 16  ;;  %v3974_v55 = vshll.u32 %v10686_v0, 16  ;;  %v4136_v43 = vrot.slane %v10686_v0, 2  ;;  %v6318_v29 = vpop.f32.mrb[16].mxu0 }
 0x363   : > { %v3341_v4 = vadd.f32 %v10636_v44, %v6317_v25  ;;  %v6319_v10 = vpop.f32.mrb[17].mxu0  ;;  %v3410_v23 = vsel %vm3390_vm7, %v3405_v50, %v3409_v17  ;;  %v4415_v2 = vor.u32 %v4414_v22, %v4413_v33  ;;  %v10723_v14 = vsel %vm1503_vm2, %v4565_v53, %v4566_v62 }
 0x364   : > { %v3973_v24 = vrot.slane %v3971_v35, 1  ;;  %v3976_v37 = vrot.slane %v3974_v55, 2  ;;  %v6320_v61 = vadd.f32 %v6319_v10, %v6318_v29  ;;  %6539 = vmatmul.mubr.msk.bf16.vlgmr.msra.gmra.mrb[16].mxu1 %vm3450_vm8, %v3410_v23  ;;  %v10709_v46 = vsel %vm804_vm0, %v3816_v19, %v3818_v57 }
 0x365   : > { %v10711_v41 = vpack.c.bf16 %v3341_v4, %v3336_v18  ;;  %6551 = vmatpush3.bf16.msra.mxu1 %v10631_v13  ;;  %v10715_v44 = vsel %vm1034_vm1, %v4134_v48, %v4136_v43  ;;  %v10718_v27 = vsel %vm4409_vm10, %v4412_v31, %v4415_v2  ;;  %v3413_v19 = vor.u32 %v3411_v3, %v3409_v17  ;;  %v10729_v13 = vld [vmem:[%s11394_s3 + $0x20] sm:$0xff]  }
 0x366   : > { %v3346_v1 = vadd.f32 %v6320_v61, %v10641_v56  ;;  %v6321_v12 = vpop.f32.mrb[18].mxu0  ;;  %6552 = vmatprep.subr.bf16.mxu1 %v7039_v39  ;;  %v3977_v20 = vor.u32 %v3976_v37, %v3973_v24 }
 0x367   : > { %v6322_v38 = vpop.f32.mrb[19].mxu0  ;;  %v3415_v28 = vshll.u32 %v10711_v41, 16  ;;  %v3419_v47 = vshrl.u32 %v10711_v41, 16  ;;  %v3671_v48 = vrot.slane %v10711_v41, 1  ;;  %v4275_v31 = vrot.slane %v10711_v41, 2 }
 0x368   : > { %v10735_v54 = vpack.c.bf16 %v3346_v1, %v3341_v4  ;;  %v6323_v56 = vadd.f32 %v6322_v38, %v6321_v12  ;;  %v10738_v45 = vsel %vm3952_vm9, %v3968_v21, %v3977_v20  ;;  %v4568_v6 = vrot.slane %v10711_v41, 3 }
 0x369   : > { %v3417_v32 = vrot.slane %v3415_v28, 1  ;;  %v4418_v36 = vrot.slane %v3415_v28, 3  ;;  %v4417_v18 = vrot.slane %v3419_v47, 2  ;;  %6553 = vmatpush3.bf16.msra.mxu1 %v7039_v39  ;;  %v10742_v63 = vsel %vm804_vm0, %v3669_v30, %v3671_v48 }
 0x36a   : > { %v3351_v7 = vadd.f32 %v10639_v59, %v6323_v56  ;;  %v6324_v3 = vpop.f32.mrb[20].mxu0  ;;  %6566 = vmatprep.subr.bf16.mxu1 %v10729_v13  ;;  %v3820_v50 = vrot.slane %v10735_v54, 1  ;;  %v3980_v60 = vshrl.u32 %v10735_v54, 16  ;;  %v3983_v21 = vshll.u32 %v10735_v54, 16 }
 0x36b   : > { %v6325_v0 = vpop.f32.mrb[21].mxu0  ;;  %v3418_v25 = vsel %vm3390_vm7, %v3413_v19, %v3417_v32  ;;  %v4138_v17 = vrot.slane %v10735_v54, 2  ;;  %v10752_v33 = vsel %vm1034_vm1, %v4273_v58, %v4275_v31  ;;  %v4419_v39 = vor.u32 %v4418_v36, %v4417_v18 }
 0x36c   : > { %v10754_v30 = vpack.c.bf16 %v3351_v7, %v3346_v1  ;;  %v6326_v59 = vadd.f32 %v6325_v0, %v6324_v3  ;;  %6542 = vmatprep.mubr.msk.bf16.mxu1 %vm3450_vm8, %v3418_v25  ;;  %v10758_v22 = vsel %vm804_vm0, %v3818_v57, %v3820_v50  ;;  %v3982_v35 = vrot.slane %v3980_v60, 1 }
 0x36d   : > { %v3985_v55 = vrot.slane %v3983_v21, 2  ;;  %v10761_v29 = vsel %vm1034_vm1, %v4136_v43, %v4138_v17  ;;  %v10766_v4 = vsel %vm1503_vm2, %v4566_v62, %v4568_v6  ;;  %v3421_v37 = vor.u32 %v3419_v47, %v3417_v32 }
 0x36e   : > { %v10769_v58 = vadd.f32 %v6326_v59, %v10652_v26  ;;  %v6327_v10 = vpop.f32.mrb[22].mxu0  ;;  %v3423_v23 = vshll.u32 %v10754_v30, 16  ;;  %v3427_v57 = vshrl.u32 %v10754_v30, 16  ;;  %v3673_v53 = vrot.slane %v10754_v30, 1 }
 0x36f   : > { %v6328_v24 = vpop.f32.mrb[23].mxu0  ;;  %v3986_v43 = vor.u32 %v3985_v55, %v3982_v35  ;;  %v4277_v61 = vrot.slane %v10754_v30, 2  ;;  %v10776_v1 = vsel %vm4409_vm10, %v4415_v2, %v4419_v39  ;;  %v4570_v19 = vrot.slane %v10754_v30, 3 }
 0x370   : > { %v10779_v62 = vpack.c.bf16 %v10769_v58, %v3351_v7  ;;  %v6329_v26 = vadd.f32 %v6328_v24, %v6327_v10  ;;  %v3425_v12 = vrot.slane %v3423_v23, 1  ;;  %v10783_v38 = vsel %vm804_vm0, %v3671_v48, %v3673_v53 }
 0x371   : > { %v10786_v28 = vsel %vm3952_vm9, %v3977_v20, %v3986_v43  ;;  %v10789_v47 = vsel %vm1034_vm1, %v4275_v31, %v4277_v61  ;;  %v4421_v54 = vrot.slane %v3427_v57, 2  ;;  %v4422_v31 = vrot.slane %v3423_v23, 3 }
 0x372   : > { %v3361_v2 = vadd.f32 %v10649_v40, %v6329_v26  ;;  %v6330_v56 = vpop.f32.mrb[24].mxu0  ;;  %v3426_v32 = vsel %vm3390_vm7, %v3421_v37, %v3425_v12  ;;  %v3429_v36 = vor.u32 %v3427_v57, %v3425_v12  ;;  %v3822_v18 = vrot.slane %v10779_v62, 1 }
 0x373   : > { %v6331_v7 = vpop.f32.mrb[25].mxu0  ;;  %6543 = vmatmul.mubr.msk.bf16.gmra.mrb[20].mxu1 %vm3450_vm8, %v3426_v32  ;;  %v3989_v48 = vshrl.u32 %v10779_v62, 16  ;;  %v3992_v20 = vshll.u32 %v10779_v62, 16  ;;  %v4140_v3 = vrot.slane %v10779_v62, 2  ;;  %v10805_v0 = vsel %vm1503_vm2, %v4568_v6, %v4570_v19 }
 0x374   : > { %v10799_v60 = vpack.c.bf16 %v3361_v2, %v10769_v58  ;;  %v6332_v40 = vadd.f32 %v6331_v7, %v6330_v56  ;;  %v10802_v21 = vsel %vm804_vm0, %v3820_v50, %v3822_v18  ;;  %v4423_v55 = vor.u32 %v4422_v31, %v4421_v54 }
 0x375   : > { %v3991_v25 = vrot.slane %v3989_v48, 1  ;;  %v3994_v59 = vrot.slane %v3992_v20, 2  ;;  %v10808_v35 = vsel %vm1034_vm1, %v4138_v17, %v4140_v3 }
 0x376   : > { %v3366_v10 = vadd.f32 %v6332_v40, %v10666_v42  ;;  %v6333_v57 = vpop.f32.mrb[26].mxu0  ;;  %v3431_v23 = vshll.u32 %v10799_v60, 16  ;;  %v3435_v24 = vshrl.u32 %v10799_v60, 16  ;;  %v3675_v37 = vrot.slane %v10799_v60, 1 }
 0x377   : > { %v6334_v50 = vpop.f32.mrb[27].mxu0  ;;  %v3995_v62 = vor.u32 %v3994_v59, %v3991_v25  ;;  %v4279_v6 = vrot.slane %v10799_v60, 2  ;;  %v10816_v26 = vsel %vm4409_vm10, %v4419_v39, %v4423_v55  ;;  %v4572_v17 = vrot.slane %v10799_v60, 3 }
 0x378   : > { %v10819_v12 = vpack.c.bf16 %v3366_v10, %v3361_v2  ;;  %v6335_v54 = vadd.f32 %v6334_v50, %v6333_v57  ;;  %v3433_v42 = vrot.slane %v3431_v23, 1  ;;  %v3676_v56 = vsel %vm804_vm0, %v3673_v53, %v3675_v37 }
 0x379   : > { %v10825_v32 = vsel %vm3952_vm9, %v3986_v43, %v3995_v62  ;;  %v10828_v7 = vsel %vm1034_vm1, %v4277_v61, %v4279_v6  ;;  %v4425_v48 = vrot.slane %v3435_v24, 2  ;;  %v4426_v20 = vrot.slane %v3431_v23, 3 }
 0x37a   : > { %v3371_v39 = vadd.f32 %v10662_v51, %v6335_v54  ;;  %v3434_v31 = vsel %vm3390_vm7, %v3429_v36, %v3433_v42  ;;  %v3437_v2 = vor.u32 %v3435_v24, %v3433_v42  ;;  %v3824_v40 = vrot.slane %v10819_v12, 1 }
 0x37b   : > { %6546 = vmatprep.mubr.msk.bf16.mxu1 %vm3450_vm8, %v3434_v31  ;;  %v3998_v25 = vshrl.u32 %v10819_v12, 16  ;;  %v4001_v53 = vshll.u32 %v10819_v12, 16  ;;  %v4142_v43 = vrot.slane %v10819_v12, 2  ;;  %v4427_v59 = vor.u32 %v4426_v20, %v4425_v48 }
 0x37c   : > { %v10837_v61 = vpack.c.bf16 %v3371_v39, %v3366_v10  ;;  %6547 = vmatmul.mubr.msk.bf16.gmra.mrb[24].mxu1 %vm3450_vm8, %v3437_v2  ;;  %v3825_v51 = vsel %vm804_vm0, %v3822_v18, %v3824_v40  ;;  %v10842_v36 = vsel %vm1503_vm2, %v4570_v19, %v4572_v17  ;;  %v7041_v39 = vld [vmem:[%s11394_s3 + $0x28] sm:$0xff]   ;;  %v7160_v2 = vmov 0.0|0.0  }
 0x37d   : > { %6554 = vmatprep.mubr.msk.bf16.mxu1 %vm3450_vm8, %v10634_v8  ;;  %v4000_v57 = vrot.slane %v3998_v25, 1  ;;  %v4003_v23 = vrot.slane %v4001_v53, 2  ;;  %v10849_v24 = vsel %vm1034_vm1, %v4140_v3, %v4142_v43  ;;  %v10852_v10 = vsel %vm4409_vm10, %v4423_v55, %v4427_v59  ;;  %6890 = vmatprep.subr.bf16.mxu0 %v7160_v2 }
 0x37e   : > { %v4281_v50 = vrot.slane %v10837_v61, 2  ;;  %v4430_v18 = vshrl.u32 %v10837_v61, 16  ;;  %v4433_v19 = vshll.u32 %v10837_v61, 16  ;;  %v4574_v54 = vrot.slane %v10837_v61, 3 }
 0x37f   : > { %v4004_v42 = vor.u32 %v4003_v23, %v4000_v57 }
 0x380   : > { %v10861_v8 = vsel %vm1034_vm1, %v4279_v6, %v4281_v50  ;;  %v4432_v48 = vrot.slane %v4430_v18, 2  ;;  %v4435_v3 = vrot.slane %v4433_v19, 3  ;;  %v10866_v55 = vsel %vm1503_vm2, %v4572_v17, %v4574_v54 }
 0x381   : > { %v4005_v20 = vsel %vm3952_vm9, %v3995_v62, %v4004_v42  ;;  %v7042_v62 = vld [vmem:[%s11394_s3 + $0x30] sm:$0xff]  }
 0x382   : > { %v10872_v31 = vor.u32 %v4435_v3, %v4432_v48 }
 0x384   : > { %6555 = vmatmul.mubr.msk.bf16.vlgmr.msra.gmra.mrb[16].mxu1 %vm3450_vm8, %v10643_v52  ;;  %v10878_v6 = vsel %vm4409_vm10, %v4427_v59, %v10872_v31  ;;  %v3379_v52 = vpack.c.bf16 %v10769_v58, %v10769_v58 }
 0x385   : > { %6558 = vmatprep.mubr.msk.bf16.mxu1 %vm3450_vm8, %v10672_v9  ;;  %6567 = vmatpush3.bf16.msra.mxu1 %v10729_v13  ;;  %v7043_v9 = vld [vmem:[%s11394_s3 + $0x38] sm:$0xff]   ;;  %v7050_v13 = vld [vmem:[%s11394_s3 + $0x70] sm:$0xff]  }
 0x386   : > { %6568 = vmatprep.subr.bf16.mxu1 %v7041_v39 }
 0x389   : > { %6569 = vmatpush3.bf16.msra.mxu1 %v7041_v39 }
 0x38a   : > { %6582 = vmatprep.subr.bf16.mxu1 %v7042_v62 }
 0x38c   : > { %6559 = vmatmul.mubr.msk.bf16.gmra.mrb[20].mxu1 %vm3450_vm8, %v10711_v41  ;;  %v7044_v41 = vld [vmem:[%s11394_s3 + $0x40] sm:$0xff]  }
 0x38d   : > { %6562 = vmatprep.mubr.msk.bf16.mxu1 %vm3450_vm8, %v10754_v30 }
 0x394   : > { %6563 = vmatmul.mubr.msk.bf16.gmra.mrb[28].mxu1 %vm3450_vm8, %v3379_v52 }
 0x395   : > { %6570 = vmatprep.mubr.msk.bf16.mxu1 %vm3450_vm8, %v10657_v15  ;;  %v7045_v15 = vld [vmem:[%s11394_s3 + $0x48] sm:$0xff]  }
 0x39c   : > { %6571 = vmatmul.mubr.msk.bf16.vlgmr.msra.gmra.mrb[16].mxu1 %vm3450_vm8, %v10689_v5  ;;  %v7046_v5 = vld [vmem:[%s11394_s3 + $0x50] sm:$0xff]  }
 0x39d   : > { %6574 = vmatprep.mubr.msk.bf16.mxu1 %vm3450_vm8, %v10742_v63  ;;  %6583 = vmatpush3.bf16.msra.mxu1 %v7042_v62 }
 0x39e   : > { %6584 = vmatprep.subr.bf16.mxu1 %v7043_v9 }
 0x3a1   : > { %6585 = vmatpush3.bf16.msra.mxu1 %v7043_v9 }
 0x3a2   : > { %6598 = vmatprep.subr.bf16.mxu1 %v7044_v41 }
 0x3a4   : > { %6575 = vmatmul.mubr.msk.bf16.gmra.mrb[20].mxu1 %vm3450_vm8, %v10783_v38 }
 0x3a5   : > { %6578 = vmatprep.mubr.msk.bf16.mxu1 %vm3450_vm8, %v3676_v56 }
 0x3ac   : > { %6579 = vmatmul.mubr.msk.bf16.gmra.mrb[32].mxu1 %vm3450_vm8, %v3675_v37 }
 0x3ad   : > { %6586 = vmatprep.mubr.msk.bf16.mxu1 %vm3450_vm8, %v10675_v49  ;;  %v7047_v49 = vld [vmem:[%s11394_s3 + $0x58] sm:$0xff]  }
 0x3b4   : > { %6587 = vmatmul.mubr.msk.bf16.vlgmr.msra.gmra.mrb[16].mxu1 %vm3450_vm8, %v10709_v46  ;;  %v7048_v46 = vld [vmem:[%s11394_s3 + $0x60] sm:$0xff]  }
 0x3b5   : > { %6590 = vmatprep.mubr.msk.bf16.mxu1 %vm3450_vm8, %v10758_v22  ;;  %6599 = vmatpush3.bf16.msra.mxu1 %v7044_v41 }
 0x3b6   : > { %6600 = vmatprep.subr.bf16.mxu1 %v7045_v15 }
 0x3b9   : > { %6601 = vmatpush3.bf16.msra.mxu1 %v7045_v15  ;;  %v11018_v15 = vld [vmem:[%s11395_s4] ss:$0 sm:$0xff] }
 0x3ba   : > { %6614 = vmatprep.subr.bf16.mxu1 %v7046_v5 }
 0x3bc   : > { %6591 = vmatmul.mubr.msk.bf16.gmra.mrb[20].mxu1 %vm3450_vm8, %v10802_v21 }
 0x3bd   : > { %6594 = vmatprep.mubr.msk.bf16.mxu1 %vm3450_vm8, %v3825_v51 }
 0x3c4   : > { %6595 = vmatmul.mubr.msk.bf16.gmra.mrb[36].mxu1 %vm3450_vm8, %v3824_v40  ;;  %v7162_v40 = vmov 0.0  }
 0x3c5   : > { %6602 = vmatprep.mubr.msk.bf16.mxu1 %vm3450_vm8, %v10692_v11  ;;  %v7049_v11 = vld [vmem:[%s11394_s3 + $0x68] sm:$0xff]   ;;  %6696 = vmatprep.mubr.msk.f32.mxu0 %vm7161_vm11, %v7162_v40 }
 0x3cc   : > { %6603 = vmatmul.mubr.msk.bf16.vlgmr.msra.gmra.mrb[16].mxu1 %vm3450_vm8, %v10738_v45 }
 0x3cd   : > { %6606 = vmatprep.mubr.msk.bf16.mxu1 %vm3450_vm8, %v10786_v28  ;;  %6615 = vmatpush3.bf16.msra.mxu1 %v7046_v5 }
 0x3ce   : > { %6616 = vmatprep.subr.bf16.mxu1 %v7047_v49 }
 0x3d1   : > { %6617 = vmatpush3.bf16.msra.mxu1 %v7047_v49 }
 0x3d2   : > { %6630 = vmatprep.subr.bf16.mxu1 %v7048_v46 }
 0x3d4   : > { %6607 = vmatmul.mubr.msk.bf16.gmra.mrb[20].mxu1 %vm3450_vm8, %v10825_v32 }
 0x3d5   : > { %6610 = vmatprep.mubr.msk.bf16.mxu1 %vm3450_vm8, %v4005_v20 }
 0x3dc   : > { %6611 = vmatmul.mubr.msk.bf16.gmra.mrb[40].mxu1 %vm3450_vm8, %v4004_v42 }
 0x3dd   : > { %6618 = vmatprep.mubr.msk.bf16.mxu1 %vm3450_vm8, %v10678_v34  ;;  %v7051_v34 = vld [vmem:[%s11394_s3 + $0x78] sm:$0xff]  }
 0x3e4   : > { %6619 = vmatmul.mubr.msk.bf16.vlgmr.msra.gmra.mrb[16].mxu1 %vm3450_vm8, %v10715_v44  ;;  %v7052_v44 = vld [vmem:[%s11394_s3 + $0x80] sm:$0xff]  }
 0x3e5   : > { %6622 = vmatprep.mubr.msk.bf16.mxu1 %vm3450_vm8, %v10761_v29  ;;  %6631 = vmatpush3.bf16.msra.mxu1 %v7048_v46 }
 0x3e6   : > { %6632 = vmatprep.subr.bf16.mxu1 %v7049_v11 }
 0x3e9   : > { %6633 = vmatpush3.bf16.msra.mxu1 %v7049_v11 }
 0x3ea   : > { %6646 = vmatprep.subr.bf16.mxu1 %v7050_v13 }
 0x3ec   : > { %6623 = vmatmul.mubr.msk.bf16.gmra.mrb[20].mxu1 %vm3450_vm8, %v10808_v35 }
 0x3ed   : > { %6626 = vmatprep.mubr.msk.bf16.mxu1 %vm3450_vm8, %v10849_v24 }
 0x3f4   : > { %6627 = vmatmul.mubr.msk.bf16.gmra.mrb[44].mxu1 %vm3450_vm8, %v4142_v43 }
 0x3f5   : > { %6634 = vmatprep.mubr.msk.bf16.mxu1 %vm3450_vm8, %v10695_v16  ;;  %v7053_v16 = vld [vmem:[%s11394_s3 + $0x88] sm:$0xff]  }
 0x3fc   : > { %6635 = vmatmul.mubr.msk.bf16.vlgmr.msra.gmra.mrb[16].mxu1 %vm3450_vm8, %v10752_v33 }
 0x3fd   : > { %6638 = vmatprep.mubr.msk.bf16.mxu1 %vm3450_vm8, %v10789_v47  ;;  %6647 = vmatpush3.bf16.msra.mxu1 %v7050_v13 }
 0x3fe   : > { %6648 = vmatprep.subr.bf16.mxu1 %v7051_v34 }
 0x401   : > { %6649 = vmatpush3.bf16.msra.mxu1 %v7051_v34 }
 0x402   : > { %6662 = vmatprep.subr.bf16.mxu1 %v7052_v44 }
 0x404   : > { %6639 = vmatmul.mubr.msk.bf16.gmra.mrb[20].mxu1 %vm3450_vm8, %v10828_v7 }
 0x405   : > { %6642 = vmatprep.mubr.msk.bf16.mxu1 %vm3450_vm8, %v10861_v8 }
 0x40c   : > { %6643 = vmatmul.mubr.msk.bf16.gmra.mrb[48].mxu1 %vm3450_vm8, %v4281_v50 }
 0x40d   : > { %6650 = vmatprep.mubr.msk.bf16.mxu1 %vm3450_vm8, %v10718_v27 }
 0x414   : > { %6651 = vmatmul.mubr.msk.bf16.vlgmr.msra.gmra.mrb[16].mxu1 %vm3450_vm8, %v10776_v1 }
 0x415   : > { %6654 = vmatprep.mubr.msk.bf16.mxu1 %vm3450_vm8, %v10816_v26  ;;  %6663 = vmatpush3.bf16.msra.mxu1 %v7052_v44 }
 0x416   : > { %6664 = vmatprep.subr.bf16.mxu1 %v7053_v16 }
 0x419   : > { %6665 = vmatpush3.bf16.msra.mxu1 %v7053_v16 }
 0x41a   : > { %6902 = vmatprep.subr.bf16.mxu1 %v7160_v2 }
 0x41c   : > { %6655 = vmatmul.mubr.msk.bf16.gmra.mrb[20].mxu1 %vm3450_vm8, %v10852_v10 }
 0x41d   : > { %6658 = vmatprep.mubr.msk.bf16.mxu1 %vm3450_vm8, %v10878_v6 }
 0x424   : > { %6659 = vmatmul.mubr.msk.bf16.gmra.mrb[52].mxu1 %vm3450_vm8, %v10872_v31 }
 0x425   : > { %6666 = vmatprep.mubr.msk.bf16.mxu1 %vm3450_vm8, %v10723_v14 }
 0x42c   : > { %6667 = vmatmul.mubr.msk.bf16.vlgmr.msra.gmra.mrb[16].mxu1 %vm3450_vm8, %v10766_v4 }
 0x42d   : > { %6670 = vmatprep.mubr.msk.bf16.mxu1 %vm3450_vm8, %v10805_v0 }
 0x434   : > { %6671 = vmatmul.mubr.msk.bf16.gmra.mrb[20].mxu1 %vm3450_vm8, %v10842_v36 }
 0x435   : > { %6674 = vmatprep.mubr.msk.bf16.mxu1 %vm3450_vm8, %v10866_v55 }
 0x43c   : > { %6675 = vmatmul.mubr.msk.bf16.gmra.mrb[56].mxu1 %vm3450_vm8, %v4574_v54 }
 0x43d   : > { %6851 = vmatprep.mubr.msk.f32.mxu1 %vm7161_vm11, %v7162_v40 }
 0x44f   : > { %v6548_v27 = vpop.f32.mrb[24].mxu1 }
 0x450   : > { %v3535_v45 = vpop.f32.mrb[25].mxu1 }
 0x451   : > { %v6549_v63 = vpop.f32.mrb[26].mxu1 }
 0x452   : > { %v3538_v14 = vpop.f32.mrb[27].mxu1 }
 0x467   : > { %v6564_v33 = vpop.f32.mrb[28].mxu1 }
 0x468   : > { %v3649_v30 = vadd.f32 %v6564_v33, %v6548_v27  ;;  %v3640_v22 = vpop.f32.mrb[29].mxu1 }
 0x469   : > { %v3641_v29 = vadd.f32 %v3640_v22, %v3535_v45  ;;  %v6565_v4 = vpop.f32.mrb[30].mxu1 }
 0x46a   : > { %v3643_v58 = vpop.f32.mrb[31].mxu1 }
 0x46b   : > { %v3644_v1 = vadd.f32 %v3643_v58, %v3538_v14 }
 0x47f   : > { %v6580_v38 = vpop.f32.mrb[32].mxu1 }
 0x480   : > { %v3797_v28 = vadd.f32 %v6580_v38, %v3649_v30  ;;  %v3773_v47 = vpop.f32.mrb[33].mxu1 }
 0x481   : > { %v3795_v60 = vadd.f32 %v3773_v47, %v3641_v29  ;;  %v6581_v21 = vpop.f32.mrb[34].mxu1 }
 0x482   : > { %v3776_v0 = vpop.f32.mrb[35].mxu1 }
 0x483   : > { %v3796_v35 = vadd.f32 %v3776_v0, %v3644_v1 }
 0x497   : > { %v6596_v37 = vpop.f32.mrb[36].mxu1 }
 0x498   : > { %v3946_v26 = vadd.f32 %v6596_v37, %v3797_v28  ;;  %v3922_v17 = vpop.f32.mrb[37].mxu1 }
 0x499   : > { %v3944_v12 = vadd.f32 %v3922_v17, %v3795_v60  ;;  %v6597_v56 = vpop.f32.mrb[38].mxu1 }
 0x49a   : > { %v3925_v32 = vpop.f32.mrb[39].mxu1 }
 0x49b   : > { %v3945_v7 = vadd.f32 %v3925_v32, %v3796_v35 }
 0x4af   : > { %v6612_v25 = vpop.f32.mrb[40].mxu1 }
 0x4b0   : > { %v4126_v53 = vadd.f32 %v6612_v25, %v3946_v26  ;;  %v4102_v43 = vpop.f32.mrb[41].mxu1 }
 0x4b1   : > { %v4124_v59 = vadd.f32 %v4102_v43, %v3944_v12  ;;  %v6613_v61 = vpop.f32.mrb[42].mxu1 }
 0x4b2   : > { %v4105_v51 = vpop.f32.mrb[43].mxu1 }
 0x4b3   : > { %v4125_v36 = vadd.f32 %v4105_v51, %v3945_v7 }
 0x4c7   : > { %v6628_v57 = vpop.f32.mrb[44].mxu1 }
 0x4c8   : > { %v4264_v23 = vadd.f32 %v6628_v57, %v4126_v53  ;;  %v4240_v24 = vpop.f32.mrb[45].mxu1 }
 0x4c9   : > { %v4262_v10 = vadd.f32 %v4240_v24, %v4124_v59  ;;  %v6629_v50 = vpop.f32.mrb[46].mxu1 }
 0x4ca   : > { %v4243_v18 = vpop.f32.mrb[47].mxu1 }
 0x4cb   : > { %v4263_v19 = vadd.f32 %v4243_v18, %v4125_v36 }
 0x4df   : > { %v6644_v54 = vpop.f32.mrb[48].mxu1 }
 0x4e0   : > { %v4403_v42 = vadd.f32 %v6644_v54, %v4264_v23  ;;  %v4379_v8 = vpop.f32.mrb[49].mxu1 }
 0x4e1   : > { %v4401_v48 = vadd.f32 %v4379_v8, %v4262_v10  ;;  %v6645_v3 = vpop.f32.mrb[50].mxu1 }
 0x4e2   : > { %v4382_v55 = vpop.f32.mrb[51].mxu1 }
 0x4e3   : > { %v4402_v20 = vadd.f32 %v4382_v55, %v4263_v19 }
 0x4f7   : > { %v6660_v39 = vpop.f32.mrb[52].mxu1 }
 0x4f8   : > { %v4558_v31 = vadd.f32 %v6660_v39, %v4403_v42  ;;  %v4534_v6 = vpop.f32.mrb[53].mxu1 }
 0x4f9   : > { %v4556_v62 = vadd.f32 %v4534_v6, %v4401_v48  ;;  %v6661_v52 = vpop.f32.mrb[54].mxu1 }
 0x4fa   : > { %v4537_v9 = vpop.f32.mrb[55].mxu1 }
 0x4fb   : > { %v4557_v41 = vadd.f32 %v4537_v9, %v4402_v20 }
 0x4ff   : > { %v6668_v5 = vpop.f32.mrb[16].mxu1 }
 0x500   : > { %v4706_v49 = vadd.f32 %v6668_v5, %v11018_v15  ;;  %v4640_v46 = vpop.f32.mrb[17].mxu1 }
 0x501   : > { %v4704_v11 = vadd.f32 %v11018_v15, %v4640_v46  ;;  %v6669_v13 = vpop.f32.mrb[18].mxu1 }
 0x502   : > { %v4717_v34 = vmax.f32 %v4706_v49, 0.0  ;;  %v4707_v44 = vadd.f32 %v6669_v13, %v11018_v15  ;;  %v4643_v16 = vpop.f32.mrb[19].mxu1 }
 0x503   : > { %v4715_v27 = vmax.f32 %v4704_v11, 0.0  ;;  %v4705_v45 = vadd.f32 %v11018_v15, %v4643_v16 }
 0x504   : > { %v4718_v63 = vmax.f32 %v4707_v44, 0.0  ;;  %v4739_v33 = vrot.slane %v4717_v34, 1 }
 0x505   : > { %v4716_v14 = vmax.f32 %v4705_v45, 0.0  ;;  %v4736_v22 = vrot.slane %v4715_v27, 1 }
 0x506   : > { %v4741_v30 = vrot.slane %v4718_v63, 1 }
 0x507   : > { %v4737_v29 = vrot.slane %v4716_v14, 1  ;;  %v6672_v4 = vpop.f32.mrb[20].mxu1 }
 0x508   : > { %v4742_v58 = vsel %vm804_vm0, %v4739_v33, %v4741_v30  ;;  %v4710_v1 = vadd.f32 %v6672_v4, %v11018_v15  ;;  %v4656_v38 = vpop.f32.mrb[21].mxu1 }
 0x509   : > { %v11026_v28 = vmax.f32 %v4717_v34, %v4742_v58  ;;  %v4738_v47 = vsel %vm804_vm0, %v4736_v22, %v4737_v29  ;;  %v4740_v60 = vsel %vm804_vm0, %v4737_v29, %v4739_v33  ;;  %v4708_v21 = vadd.f32 %v11018_v15, %v4656_v38  ;;  %v6673_v0 = vpop.f32.mrb[22].mxu1 }
 0x50a   : > { %v4764_v35 = vmax.f32 %v4715_v27, %v4738_v47  ;;  %v4765_v37 = vmax.f32 %v4716_v14, %v4740_v60  ;;  %v4721_v26 = vmax.f32 %v4710_v1, 0.0  ;;  %v4711_v17 = vadd.f32 %v6673_v0, %v11018_v15  ;;  %v4659_v12 = vpop.f32.mrb[23].mxu1 }
 0x50b   : > { %v4791_v56 = vrot.slane %v11026_v28, 2  ;;  %v4719_v32 = vmax.f32 %v4708_v21, 0.0  ;;  %v4709_v7 = vadd.f32 %v11018_v15, %v4659_v12 }
 0x50c   : > { %v4790_v25 = vrot.slane %v4765_v37, 2  ;;  %v4722_v53 = vmax.f32 %v4711_v17, 0.0  ;;  %v4747_v51 = vrot.slane %v4721_v26, 1 }
 0x50d   : > { %v4743_v43 = vrot.slane %v4719_v32, 1  ;;  %v4720_v59 = vmax.f32 %v4709_v7, 0.0 }
 0x50e   : > { %v4792_v61 = vsel %vm1034_vm1, %v4790_v25, %v4791_v56  ;;  %v4749_v36 = vrot.slane %v4722_v53, 1 }
 0x50f   : > { %v4744_v57 = vsel %vm804_vm0, %v4741_v30, %v4743_v43  ;;  %v4745_v23 = vrot.slane %v4720_v59, 1  ;;  %v6676_v24 = vpop.f32.mrb[56].mxu1  ;;  %v4818_v10 = vmax.f32 %v4764_v35, %v4792_v61 }
 0x510   : > { %v4767_v50 = vmax.f32 %v4718_v63, %v4744_v57  ;;  %v4750_v18 = vsel %vm804_vm0, %v4747_v51, %v4749_v36  ;;  %v4696_v19 = vadd.f32 %v6676_v24, %v4558_v31  ;;  %v4672_v54 = vpop.f32.mrb[57].mxu1  ;;  %v4827_v57 = vld [vmem:[%s11401_s10] sm:$0xff]  ;;  %v4829_v24 = vld [vmem:[%s11401_s10 + $0x10] sm:$0xff] }
 0x511   : > { %v4770_v42 = vmax.f32 %v4721_v26, %v4750_v18  ;;  %v4746_v8 = vsel %vm804_vm0, %v4743_v43, %v4745_v23  ;;  %v4748_v48 = vsel %vm804_vm0, %v4745_v23, %v4747_v51  ;;  %v4694_v3 = vadd.f32 %v4672_v54, %v4556_v62  ;;  %v6677_v55 = vpop.f32.mrb[58].mxu1  ;;  %v4828_v23 = vld [vmem:[%s11401_s10 + $0x8] sm:$0xff]  ;;  %v7058_v54 = vld [vmem:[%s11396_s5] sm:$0xff]  }
 0x512   : > { %v4793_v20 = vrot.slane %v4767_v50, 2  ;;  %v4768_v39 = vmax.f32 %v4719_v32, %v4746_v8  ;;  %v4769_v6 = vmax.f32 %v4720_v59, %v4748_v48  ;;  %v4714_v52 = vadd.f32 %v11018_v15, %v4696_v19  ;;  %v4675_v9 = vpop.f32.mrb[59].mxu1  ;;  %v7055_v18 = vld [vmem:[%s11396_s5 + $0x28] sm:$0xff]   ;;  %v7056_v19 = vld [vmem:[%s11396_s5 + $0x30] sm:$0xff]  }
 0x513   : > { %v4799_v5 = vrot.slane %v4770_v42, 2  ;;  %v4712_v49 = vadd.f32 %v11018_v15, %v4694_v3  ;;  %v4695_v46 = vadd.f32 %v4675_v9, %v4557_v41 }
 0x514   : > { %v4795_v11 = vrot.slane %v4768_v39, 2  ;;  %v4797_v31 = vrot.slane %v4769_v6, 2  ;;  %v4725_v13 = vmax.f32 %v4714_v52, 0.0  ;;  %v4794_v34 = vsel %vm1034_vm1, %v4791_v56, %v4793_v20 }
 0x515   : > { %v4723_v44 = vmax.f32 %v4712_v49, 0.0  ;;  %v4713_v16 = vadd.f32 %v11018_v15, %v4695_v46  ;;  %v4819_v62 = vmax.f32 %v4765_v37, %v4794_v34 }
 0x516   : > { %v4798_v27 = vsel %vm1034_vm1, %v4795_v11, %v4797_v31  ;;  %v4800_v45 = vsel %vm1034_vm1, %v4797_v31, %v4799_v5  ;;  %v4774_v63 = vrot.slane %v4725_v13, 1  ;;  %v4796_v14 = vsel %vm1034_vm1, %v4793_v20, %v4795_v11 }
 0x517   : > { %v4751_v33 = vrot.slane %v4723_v44, 1  ;;  %v4724_v30 = vmax.f32 %v4713_v16, 0.0  ;;  %v6891_v22 = vpack.c.bf16 %v4819_v62, %v4818_v10  ;;  %v4820_v41 = vmax.f32 %v11026_v28, %v4796_v14  ;;  %v4830_v10 = vld [vmem:[%s11401_s10 + $0x18] sm:$0xff] }
 0x518   : > { %v4821_v29 = vmax.f32 %v4767_v50, %v4798_v27  ;;  %v4822_v4 = vmax.f32 %v4768_v39, %v4800_v45  ;;  %v4779_v15 = vmax.f32 %v4725_v13, %v4774_v63  ;;  %v4831_v50 = vld [vmem:[%s11401_s10 + $0x20] sm:$0xff] }
 0x519   : > { %v4752_v58 = vsel %vm804_vm0, %v4749_v36, %v4751_v33  ;;  %v4753_v1 = vrot.slane %v4724_v30, 1  ;;  %6892 = vmatpush3.bf16.msra.mxu0 %v6891_v22  ;;  %v7054_v36 = vld [vmem:[%s11396_s5 + $0x20] sm:$0xff]  }
 0x51a   : > { %v4771_v38 = vmax.f32 %v4722_v53, %v4752_v58  ;;  %6893 = vmatprep.subr.bf16.mxu0 %v7160_v2  ;;  %v6894_v47 = vpack.c.bf16 %v4821_v29, %v4820_v41  ;;  %v4807_v28 = vrot.slane %v4779_v15, 2 }
 0x51b   : > { %v4754_v60 = vsel %vm804_vm0, %v4751_v33, %v4753_v1  ;;  %v4775_v21 = vsel %vm804_vm0, %v4753_v1, %v4774_v63 }
 0x51c   : > { %v4801_v0 = vrot.slane %v4771_v38, 2  ;;  %v4772_v35 = vmax.f32 %v4723_v44, %v4754_v60  ;;  %v4778_v37 = vmax.f32 %v4724_v30, %v4775_v21 }
 0x51d   : > { %6895 = vmatpush3.bf16.msra.mxu0 %v6894_v47 }
 0x51e   : > { %v4803_v26 = vrot.slane %v4772_v35, 2  ;;  %v4805_v17 = vrot.slane %v4778_v37, 2  ;;  %6896 = vmatprep.subr.bf16.mxu0 %v7160_v2  ;;  %v4802_v12 = vsel %vm1034_vm1, %v4799_v5, %v4801_v0  ;;  %v7059_v37 = vld [vmem:[%s11396_s5 + $0x8] sm:$0xff]  }
 0x51f   : > { %v4823_v56 = vmax.f32 %v4769_v6, %v4802_v12 }
 0x520   : > { %v4806_v32 = vsel %vm1034_vm1, %v4803_v26, %v4805_v17  ;;  %v4804_v7 = vsel %vm1034_vm1, %v4801_v0, %v4803_v26  ;;  %v4808_v25 = vsel %vm1034_vm1, %v4805_v17, %v4807_v28 }
 0x521   : > { %v6897_v53 = vpack.c.bf16 %v4823_v56, %v4822_v4  ;;  %v4824_v43 = vmax.f32 %v4770_v42, %v4804_v7  ;;  %v4825_v59 = vmax.f32 %v4771_v38, %v4806_v32  ;;  %v4826_v61 = vmax.f32 %v4772_v35, %v4808_v25 }
 0x523   : > { %6898 = vmatpush3.bf16.msra.mxu0 %v6897_v53  ;;  %v6900_v51 = vpack.c.bf16 %v4825_v59, %v4824_v43 }
 0x524   : > { %6899 = vmatprep.subr.bf16.mxu0 %v7160_v2 }
 0x527   : > { %6901 = vmatpush3.bf16.msra.mxu0 %v6900_v51 }
 0x528   : > { %6694 = vmatprep.subr.mxu0 %v7162_v40 }
 0x52b   : > { %6695 = vmatpush3.msra.mxu0 %v4826_v61  ;;  %v7060_v61 = vld [vmem:[%s11396_s5 + $0x10] sm:$0xff]  }
 0x52c   : > { %6697 = vmatmul.mubr.msk.f32.vlgmr.msra.gmra.mrb[28].mxu0 %vm4832_vm12, %v4827_v57  ;;  %6711 = vmatprep.subr.bf16.mxu0 %v7054_v36 }
 0x52d   : > { %6699 = vmatprep.mubr.msk.f32.mxu0 %vm7161_vm11, %v7162_v40  ;;  %6712 = vmatpush3.bf16.msra.mxu0 %v7054_v36 }
 0x52e   : > { %6713 = vmatprep.subr.bf16.mxu0 %v7055_v18 }
 0x530   : > { %6700 = vmatmul.mubr.msk.f32.gmra.mrb[30].mxu0 %vm4832_vm12, %v4828_v23  ;;  %v7061_v23 = vld [vmem:[%s11396_s5 + $0x18] sm:$0xff]  }
 0x531   : > { %6702 = vmatprep.mubr.msk.f32.mxu0 %vm7161_vm11, %v7162_v40  ;;  %6714 = vmatpush3.bf16.msra.mxu0 %v7055_v18  ;;  %v7064_v18 = vld [vmem:[%s11396_s5 + $0x50] sm:$0xff]  }
 0x532   : > { %6715 = vmatprep.subr.bf16.mxu0 %v7056_v19 }
 0x534   : > { %6703 = vmatmul.mubr.msk.f32.gmra.mrb[32].mxu0 %vm4832_vm12, %v4829_v24  ;;  %v7062_v24 = vld [vmem:[%s11396_s5 + $0x40] sm:$0xff]  }
 0x535   : > { %6705 = vmatprep.mubr.msk.f32.mxu0 %vm7161_vm11, %v7162_v40  ;;  %6716 = vmatpush3.bf16.msra.mxu0 %v7056_v19  ;;  %v7065_v19 = vld [vmem:[%s11396_s5 + $0x58] sm:$0xff]  }
 0x538   : > { %6706 = vmatmul.mubr.msk.f32.gmra.mrb[34].mxu0 %vm4832_vm12, %v4830_v10 }
 0x539   : > { %6708 = vmatprep.mubr.msk.f32.mxu0 %vm7161_vm11, %v7162_v40  ;;  %v7057_v40 = vld [vmem:[%s11396_s5 + $0x38] sm:$0xff]  }
 0x53a   : > { %6717 = vmatprep.subr.bf16.mxu0 %v7057_v40 }
 0x53b   : > { %6718 = vmatpush3.bf16.msra.mxu0 %v7057_v40  ;;  %v7066_v40 = vld [vmem:[%s11396_s5 + $0x60] sm:$0xff]  }
 0x53c   : > { %6709 = vmatmul.mubr.msk.f32.gmra.mrb[36].mxu0 %vm4832_vm12, %v4831_v50  ;;  %6723 = vmatprep.subr.bf16.mxu0 %v7058_v54  ;;  %v7063_v50 = vld [vmem:[%s11396_s5 + $0x48] sm:$0xff]  }
 0x5ff   : > { %v4914_v42 = vpop.f32.mrb[28].mxu0 }
 0x600   : > { %v6698_v8 = vpop.f32.mrb[29].mxu0 }
 0x601   : > { %v7069_v8 = vld [vmem:[%s11396_s5 + $0x78] sm:$0xff]  }
 0x603   : > { %v4919_v48 = vpop.f32.mrb[30].mxu0 }
 0x604   : > { %v4938_v3 = vpack.c.bf16 %v4919_v48, %v4914_v42  ;;  %v6701_v55 = vpop.f32.mrb[31].mxu0  ;;  %v7068_v42 = vld [vmem:[%s11396_s5 + $0x70] sm:$0xff]  }
 0x605   : > { %v7072_v55 = vld [vmem:[%s11396_s5 + $0x90] sm:$0xff]  }
 0x606   : > { %v4959_v39 = vshrl.u32 %v4938_v3, 16  ;;  %v4961_v6 = vshll.u32 %v4938_v3, 16  ;;  %v5140_v34 = vrot.slane %v4938_v3, 1  ;;  %v5233_v44 = vrot.slane %v4938_v3, 3 }
 0x607   : > { %v11101_v20 = vpop.f32.mrb[32].mxu0 }
 0x608   : > { %v11104_v52 = vpack.c.bf16 %v11101_v20, %v4919_v48  ;;  %v6704_v9 = vpop.f32.mrb[33].mxu0  ;;  %v4963_v49 = vrot.slane %v4961_v6, 1  ;;  %v5327_v46 = vrot.slane %v4959_v39, 3  ;;  %v5328_v11 = vrot.slane %v4961_v6, 4  ;;  %v7070_v48 = vld [vmem:[%s11396_s5 + $0x80] sm:$0xff]   ;;  %v7075_v6 = vld [vmem:[%s11396_s5 + $0xa8] sm:$0xff]  }
 0x609   : > { %v4939_v10 = vpack.c.bf16 %v11101_v20, %v11101_v20  ;;  %v7076_v9 = vld [vmem:[%s11396_s5 + $0xb0] sm:$0xff]  }
 0x60a   : > { %v5612_v16 = vshrl.u32 %v11104_v52, 16  ;;  %v5615_v62 = vshll.u32 %v11104_v52, 16  ;;  %v4964_v33 = vor.u32 %v4963_v49, %v4959_v39  ;;  %v5329_v22 = vor.u32 %v5328_v11, %v5327_v46  ;;  %v7074_v39 = vld [vmem:[%s11396_s5 + $0xa0] sm:$0xff]   ;;  %v7077_v49 = vld [vmem:[%s11396_s5 + $0xb8] sm:$0xff]   ;;  %v7079_v11 = vld [vmem:[%s11396_s5 + $0xc8] sm:$0xff]  }
 0x60b   : > { %v11106_v5 = vpop.f32.mrb[34].mxu0  ;;  %v5519_v41 = vrot.slane %v11104_v52, 2  ;;  %v5718_v56 = vrot.slane %v11104_v52, 3  ;;  %v7078_v46 = vld [vmem:[%s11396_s5 + $0xc0] sm:$0xff]  }
 0x60c   : > { %v11110_v31 = vpack.c.bf16 %v11106_v5, %v11101_v20  ;;  %v6707_v13 = vpop.f32.mrb[35].mxu0  ;;  %v5614_v60 = vrot.slane %v5612_v16, 2  ;;  %v5617_v21 = vrot.slane %v5615_v62, 3  ;;  %v7073_v20 = vld [vmem:[%s11396_s5 + $0x98] sm:$0xff]   ;;  %v7086_v62 = vld [vmem:[%s11396_s5 + $0x100] sm:$0xff]  }
 0x60d   : > { %v7082_v13 = vld [vmem:[%s11396_s5 + $0xe0] sm:$0xff]   ;;  %v7085_v16 = vld [vmem:[%s11396_s5 + $0xf8] sm:$0xff]  }
 0x60e   : > { %v4970_v27 = vshrl.u32 %v11110_v31, 16  ;;  %v4966_v45 = vshll.u32 %v11110_v31, 16  ;;  %v5141_v63 = vrot.slane %v11110_v31, 1  ;;  %v5234_v14 = vrot.slane %v11110_v31, 3  ;;  %v7080_v31 = vld [vmem:[%s11396_s5 + $0xd0] sm:$0xff]  }
 0x60f   : > { %v4934_v30 = vpop.f32.mrb[36].mxu0  ;;  %v5618_v51 = vor.u32 %v5617_v21, %v5614_v60 }
 0x610   : > { %v4968_v29 = vrot.slane %v4966_v45, 1  ;;  %v11120_v4 = vpack.c.bf16 %v4934_v30, %v11106_v5  ;;  %v5142_v58 = vsel %vm804_vm0, %v5140_v34, %v5141_v63  ;;  %v5235_v1 = vsel %vm1503_vm2, %v5233_v44, %v5234_v14  ;;  %v6710_v15 = vpop.f32.mrb[37].mxu0  ;;  %v7083_v34 = vld [vmem:[%s11396_s5 + $0xe8] sm:$0xff]   ;;  %v7084_v44 = vld [vmem:[%s11396_s5 + $0xf0] sm:$0xff]  }
 0x611   : > { %v5330_v38 = vrot.slane %v4970_v27, 3  ;;  %v5331_v47 = vrot.slane %v4966_v45, 4  ;;  %v7088_v45 = vld [vmem:[%s11396_s5 + $0x110] sm:$0xff]  }
 0x612   : > { %v4969_v0 = vsel %vm3390_vm7, %v4964_v33, %v4968_v29  ;;  %v4972_v35 = vor.u32 %v4970_v27, %v4968_v29  ;;  %v5620_v28 = vshrl.u32 %v11120_v4, 16  ;;  %v5623_v26 = vshll.u32 %v11120_v4, 16  ;;  %v7087_v27 = vld [vmem:[%s11396_s5 + $0x108] sm:$0xff]  }
 0x613   : > { %6719 = vmatprep.mubr.msk.bf16.mxu0 %vm4997_vm13, %v4969_v0  ;;  %v11135_v17 = vor.u32 %v5331_v47, %v5330_v38  ;;  %v5520_v12 = vrot.slane %v11120_v4, 2  ;;  %v5719_v32 = vrot.slane %v11120_v4, 3  ;;  %v5846_v33 = vld [vmem:[%s11398_s7 + $0x8] sm:$0xff]  ;;  %v5847_v0 = vld [vmem:[%s11398_s7 + $0x10] sm:$0xff] }
 0x614   : > { %6720 = vmatmul.mubr.msk.bf16.vlgmr.msra.gmra.mrb[40].mxu0 %vm4997_vm13, %v4972_v35  ;;  %v5622_v7 = vrot.slane %v5620_v28, 2  ;;  %v5625_v25 = vrot.slane %v5623_v26, 3  ;;  %v5848_v35 = vld [vmem:[%s11398_s7 + $0x18] sm:$0xff]  ;;  %v5850_v26 = vld [vmem:[%s11398_s7 + $0x28] sm:$0xff] }
 0x615   : > { %6724 = vmatpush3.bf16.msra.mxu0 %v7058_v54  ;;  %6731 = vmatprep.mubr.msk.bf16.mxu0 %vm4997_vm13, %v4938_v3  ;;  %v5333_v53 = vsel %vm5326_vm14, %v5329_v22, %v11135_v17  ;;  %v11147_v43 = vsel %vm1034_vm1, %v5519_v41, %v5520_v12  ;;  %v11152_v59 = vsel %vm1503_vm2, %v5718_v56, %v5719_v32  ;;  %v7067_v54 = vld [vmem:[%s11396_s5 + $0x68] sm:$0xff]   ;;  %v5852_v56 = vld [vmem:[%s11398_s7 + $0x38] sm:$0xff] }
 0x616   : > { %6725 = vmatprep.subr.bf16.mxu0 %v7059_v37  ;;  %v11157_v36 = vor.u32 %v5625_v25, %v5622_v7  ;;  %v7071_v3 = vld [vmem:[%s11396_s5 + $0x88] sm:$0xff]   ;;  %v6906_v28 = vpack.c.bf16 %v5848_v35, %v5847_v0  ;;  %v5853_v7 = vld [vmem:[%s11398_s7 + $0x40] sm:$0xff] }
 0x617   : > { %v5854_v25 = vld [vmem:[%s11398_s7 + $0x48] sm:$0xff]  ;;  %v6258_v35 = vld [vmem:[%s11397_s6] ss:$0 sm:$0xff] }
 0x618   : > { %v11161_v57 = vsel %vm4409_vm10, %v5618_v51, %v11157_v36 }
 0x619   : > { %6726 = vmatpush3.bf16.msra.mxu0 %v7059_v37  ;;  %v5849_v37 = vld [vmem:[%s11398_s7 + $0x20] sm:$0xff] }
 0x61a   : > { %6727 = vmatprep.subr.bf16.mxu0 %v7060_v61 }
 0x61d   : > { %6728 = vmatpush3.bf16.msra.mxu0 %v7060_v61  ;;  %v6915_v61 = vpack.c.bf16 %v5854_v25, %v5853_v7  ;;  %v5821_v7 = vpop.permute.xlu0 %5820 }
 0x61e   : > { %6729 = vmatprep.subr.bf16.mxu0 %v7061_v23 }
 0x621   : > { %6730 = vmatpush3.bf16.msra.mxu0 %v7061_v23  ;;  %v5856_v23 = vld [vmem:[%s11398_s7 + $0x58] sm:$0xff] }
 0x622   : > { %6735 = vmatprep.subr.bf16.mxu0 %v7062_v24 }
 0x624   : > { %6732 = vmatmul.mubr.msk.bf16.vlgmr.msra.gmra.mrb[44].mxu0 %vm4997_vm13, %v4939_v10 }
 0x625   : > { %6736 = vmatpush3.bf16.msra.mxu0 %v7062_v24  ;;  %6743 = vmatprep.mubr.msk.bf16.mxu0 %vm4997_vm13, %v5142_v58 }
 0x626   : > { %6737 = vmatprep.subr.bf16.mxu0 %v7063_v50 }
 0x629   : > { %6738 = vmatpush3.bf16.msra.mxu0 %v7063_v50 }
 0x62a   : > { %6739 = vmatprep.subr.bf16.mxu0 %v7064_v18 }
 0x62d   : > { %6740 = vmatpush3.bf16.msra.mxu0 %v7064_v18  ;;  %v5857_v18 = vld [vmem:[%s11398_s7 + $0x60] sm:$0xff] }
 0x62e   : > { %6741 = vmatprep.subr.bf16.mxu0 %v7065_v19 }
 0x631   : > { %6742 = vmatpush3.bf16.msra.mxu0 %v7065_v19  ;;  %v5858_v19 = vld [vmem:[%s11398_s7 + $0x68] sm:$0xff] }
 0x632   : > { %6747 = vmatprep.subr.bf16.mxu0 %v7066_v40 }
 0x634   : > { %6744 = vmatmul.mubr.msk.bf16.vlgmr.msra.gmra.mrb[48].mxu0 %vm4997_vm13, %v5141_v63  ;;  %v7089_v63 = vld [vmem:[%s11396_s5 + $0x118] sm:$0xff]  }
 0x635   : > { %6748 = vmatpush3.bf16.msra.mxu0 %v7066_v40  ;;  %6755 = vmatprep.mubr.msk.bf16.mxu0 %vm4997_vm13, %v5235_v1  ;;  %v6921_v40 = vpack.c.bf16 %v5858_v19, %v5857_v18 }
 0x636   : > { %6749 = vmatprep.subr.bf16.mxu0 %v7067_v54 }
 0x639   : > { %6750 = vmatpush3.bf16.msra.mxu0 %v7067_v54  ;;  %v5859_v54 = vld [vmem:[%s11398_s7 + $0x70] sm:$0xff] }
 0x63a   : > { %6751 = vmatprep.subr.bf16.mxu0 %v7068_v42 }
 0x63d   : > { %6752 = vmatpush3.bf16.msra.mxu0 %v7068_v42  ;;  %v5860_v42 = vld [vmem:[%s11398_s7 + $0x78] sm:$0xff] }
 0x63e   : > { %6753 = vmatprep.subr.bf16.mxu0 %v7069_v8 }
 0x641   : > { %6754 = vmatpush3.bf16.msra.mxu0 %v7069_v8  ;;  %v6924_v8 = vpack.c.bf16 %v5860_v42, %v5859_v54 }
 0x642   : > { %6759 = vmatprep.subr.bf16.mxu0 %v7070_v48 }
 0x644   : > { %6756 = vmatmul.mubr.msk.bf16.vlgmr.msra.gmra.mrb[52].mxu0 %vm4997_vm13, %v5234_v14  ;;  %v5845_v14 = vld [vmem:[%s11398_s7] sm:$0xff] }
 0x645   : > { %6760 = vmatpush3.bf16.msra.mxu0 %v7070_v48  ;;  %6767 = vmatprep.mubr.msk.bf16.mxu0 %vm4997_vm13, %v5333_v53  ;;  %v6903_v30 = vpack.c.bf16 %v5846_v33, %v5845_v14 }
 0x646   : > { %6761 = vmatprep.subr.bf16.mxu0 %v7071_v3 }
 0x647   : > { %6904 = vmatpush3.bf16.msra.mxu1 %v6903_v30 }
 0x648   : > { %6905 = vmatprep.subr.bf16.mxu1 %v7160_v2 }
 0x649   : > { %6762 = vmatpush3.bf16.msra.mxu0 %v7071_v3 }
 0x64a   : > { %6763 = vmatprep.subr.bf16.mxu0 %v7072_v55 }
 0x64b   : > { %6907 = vmatpush3.bf16.msra.mxu1 %v6906_v28 }
 0x64c   : > { %6908 = vmatprep.subr.bf16.mxu1 %v7160_v2 }
 0x64d   : > { %6764 = vmatpush3.bf16.msra.mxu0 %v7072_v55 }
 0x64e   : > { %6765 = vmatprep.subr.bf16.mxu0 %v7073_v20 }
 0x651   : > { %6766 = vmatpush3.bf16.msra.mxu0 %v7073_v20 }
 0x652   : > { %6771 = vmatprep.subr.bf16.mxu0 %v7074_v39 }
 0x654   : > { %6768 = vmatmul.mubr.msk.bf16.vlgmr.msra.gmra.mrb[56].mxu0 %vm4997_vm13, %v11135_v17  ;;  %v6909_v17 = vpack.c.bf16 %v5850_v26, %v5849_v37 }
 0x655   : > { %6772 = vmatpush3.bf16.msra.mxu0 %v7074_v39  ;;  %6779 = vmatprep.mubr.msk.bf16.mxu0 %vm4997_vm13, %v11104_v52  ;;  %v5416_v52 = vpack.c.bf16 %v11106_v5, %v11106_v5  ;;  %v7081_v5 = vld [vmem:[%s11396_s5 + $0xd8] sm:$0xff]  }
 0x656   : > { %6773 = vmatprep.subr.bf16.mxu0 %v7075_v6  ;;  %6910 = vmatpush3.bf16.msra.mxu1 %v6909_v17 }
 0x657   : > { %6911 = vmatprep.subr.bf16.mxu1 %v7160_v2 }
 0x659   : > { %6774 = vmatpush3.bf16.msra.mxu0 %v7075_v6 }
 0x65a   : > { %6775 = vmatprep.subr.bf16.mxu0 %v7076_v9 }
 0x65d   : > { %6776 = vmatpush3.bf16.msra.mxu0 %v7076_v9 }
 0x65e   : > { %6777 = vmatprep.subr.bf16.mxu0 %v7077_v49 }
 0x661   : > { %6778 = vmatpush3.bf16.msra.mxu0 %v7077_v49 }
 0x662   : > { %6783 = vmatprep.subr.bf16.mxu0 %v7078_v46 }
 0x664   : > { %6780 = vmatmul.mubr.msk.bf16.vlgmr.msra.gmra.mrb[60].mxu0 %vm4997_vm13, %v5416_v52 }
 0x665   : > { %6784 = vmatpush3.bf16.msra.mxu0 %v7078_v46  ;;  %6791 = vmatprep.mubr.msk.bf16.mxu0 %vm4997_vm13, %v11147_v43 }
 0x666   : > { %6785 = vmatprep.subr.bf16.mxu0 %v7079_v11 }
 0x669   : > { %6786 = vmatpush3.bf16.msra.mxu0 %v7079_v11 }
 0x66a   : > { %6787 = vmatprep.subr.bf16.mxu0 %v7080_v31 }
 0x66d   : > { %6788 = vmatpush3.bf16.msra.mxu0 %v7080_v31 }
 0x66e   : > { %6789 = vmatprep.subr.bf16.mxu0 %v7081_v5 }
 0x671   : > { %6790 = vmatpush3.bf16.msra.mxu0 %v7081_v5 }
 0x672   : > { %6795 = vmatprep.subr.bf16.mxu0 %v7082_v13 }
 0x674   : > { %6792 = vmatmul.mubr.msk.bf16.vlgmr.msra.gmra.mrb[64].mxu0 %vm4997_vm13, %v5520_v12  ;;  %v5851_v12 = vld [vmem:[%s11398_s7 + $0x30] sm:$0xff] }
 0x675   : > { %6796 = vmatpush3.bf16.msra.mxu0 %v7082_v13  ;;  %6803 = vmatprep.mubr.msk.bf16.mxu0 %vm4997_vm13, %v11161_v57  ;;  %v5855_v57 = vld [vmem:[%s11398_s7 + $0x50] sm:$0xff] }
 0x676   : > { %6797 = vmatprep.subr.bf16.mxu0 %v7083_v34  ;;  %v6918_v50 = vpack.c.bf16 %v5856_v23, %v5855_v57  ;;  %v5831_v57 = vpop.permute.xlu0 %5830 }
 0x679   : > { %6798 = vmatpush3.bf16.msra.mxu0 %v7083_v34 }
 0x67a   : > { %6799 = vmatprep.subr.bf16.mxu0 %v7084_v44 }
 0x67d   : > { %6800 = vmatpush3.bf16.msra.mxu0 %v7084_v44 }
 0x67e   : > { %6801 = vmatprep.subr.bf16.mxu0 %v7085_v16 }
 0x681   : > { %6802 = vmatpush3.bf16.msra.mxu0 %v7085_v16 }
 0x682   : > { %6807 = vmatprep.subr.bf16.mxu0 %v7086_v62 }
 0x684   : > { %6804 = vmatmul.mubr.msk.bf16.vlgmr.msra.gmra.mrb[68].mxu0 %vm4997_vm13, %v11157_v36 }
 0x685   : > { %6808 = vmatpush3.bf16.msra.mxu0 %v7086_v62  ;;  %6815 = vmatprep.mubr.msk.bf16.mxu0 %vm4997_vm13, %v11152_v59 }
 0x686   : > { %6809 = vmatprep.subr.bf16.mxu0 %v7087_v27 }
 0x689   : > { %6810 = vmatpush3.bf16.msra.mxu0 %v7087_v27 }
 0x68a   : > { %6811 = vmatprep.subr.bf16.mxu0 %v7088_v45 }
 0x68d   : > { %6812 = vmatpush3.bf16.msra.mxu0 %v7088_v45 }
 0x68e   : > { %6813 = vmatprep.subr.bf16.mxu0 %v7089_v63 }
 0x691   : > { %6814 = vmatpush3.bf16.msra.mxu0 %v7089_v63 }
 0x694   : > { %6816 = vmatmul.mubr.msk.bf16.vlgmr.msra.gmra.mrb[72].mxu0 %vm4997_vm13, %v5719_v32  ;;  %v6912_v32 = vpack.c.bf16 %v5852_v56, %v5851_v12 }
 0x696   : > { %6913 = vmatpush3.bf16.msra.mxu1 %v6912_v32 }
 0x697   : > { %6914 = vmatprep.subr.bf16.mxu1 %v7160_v2 }
 0x69a   : > { %6916 = vmatpush3.bf16.msra.mxu1 %v6915_v61  ;;  %v5826_v61 = vpop.permute.xlu1 %5825 }
 0x69b   : > { %6917 = vmatprep.subr.bf16.mxu1 %v7160_v2 }
 0x69e   : > { %6919 = vmatpush3.bf16.msra.mxu1 %v6918_v50 }
 0x69f   : > { %6920 = vmatprep.subr.bf16.mxu1 %v7160_v2 }
 0x6a2   : > { %6922 = vmatpush3.bf16.msra.mxu1 %v6921_v40 }
 0x6a3   : > { %6923 = vmatprep.subr.bf16.mxu1 %v7160_v2 }
 0x6a6   : > { %6925 = vmatpush3.bf16.msra.mxu1 %v6924_v8 }
 0x6e7   : > { %v6721_v22 = vpop.f32.mrb[40].mxu0 }
 0x6e8   : > { %v5038_v41 = vpop.f32.mrb[41].mxu0 }
 0x6e9   : > { %v6722_v29 = vpop.f32.mrb[42].mxu0 }
 0x6ea   : > { %v5041_v58 = vpop.f32.mrb[43].mxu0 }
 0x6f7   : > { %v6733_v1 = vpop.f32.mrb[44].mxu0 }
 0x6f8   : > { %v5124_v4 = vadd.f32 %v6733_v1, %v6721_v22  ;;  %v5115_v15 = vpop.f32.mrb[45].mxu0 }
 0x6f9   : > { %v5116_v38 = vadd.f32 %v5115_v15, %v5038_v41  ;;  %v6734_v47 = vpop.f32.mrb[46].mxu0 }
 0x6fa   : > { %v5118_v60 = vpop.f32.mrb[47].mxu0 }
 0x6fb   : > { %v5119_v21 = vadd.f32 %v5118_v60, %v5041_v58 }
 0x707   : > { %v6745_v53 = vpop.f32.mrb[48].mxu0 }
 0x708   : > { %v5223_v43 = vadd.f32 %v6745_v53, %v5124_v4  ;;  %v5207_v59 = vpop.f32.mrb[49].mxu0 }
 0x709   : > { %v5221_v51 = vadd.f32 %v5207_v59, %v5116_v38  ;;  %v6746_v36 = vpop.f32.mrb[50].mxu0 }
 0x70a   : > { %v5210_v24 = vpop.f32.mrb[51].mxu0 }
 0x70b   : > { %v5222_v10 = vadd.f32 %v5210_v24, %v5119_v21 }
 0x717   : > { %v6757_v48 = vpop.f32.mrb[52].mxu0 }
 0x718   : > { %v5316_v3 = vadd.f32 %v6757_v48, %v5223_v43  ;;  %v5300_v55 = vpop.f32.mrb[53].mxu0  ;;  %v5861_v48 = vld [vmem:[%s11399_s8] sm:$0x1] }
 0x719   : > { %v5314_v20 = vadd.f32 %v5300_v55, %v5221_v51  ;;  %v6758_v39 = vpop.f32.mrb[54].mxu0 }
 0x71a   : > { %v5303_v6 = vpop.f32.mrb[55].mxu0 }
 0x71b   : > { %v5315_v9 = vadd.f32 %v5303_v6, %v5222_v10 }
 0x727   : > { %v6769_v49 = vpop.f32.mrb[56].mxu0 }
 0x728   : > { %v5414_v46 = vadd.f32 %v6769_v49, %v5316_v3  ;;  %v5398_v52 = vpop.f32.mrb[57].mxu0 }
 0x729   : > { %v5412_v11 = vadd.f32 %v5398_v52, %v5314_v20  ;;  %v6770_v31 = vpop.f32.mrb[58].mxu0 }
 0x72a   : > { %v5401_v5 = vpop.f32.mrb[59].mxu0 }
 0x72b   : > { %v5413_v13 = vadd.f32 %v5401_v5, %v5315_v9 }
 0x737   : > { %v6781_v34 = vpop.f32.mrb[60].mxu0 }
 0x738   : > { %v5506_v44 = vadd.f32 %v6781_v34, %v5414_v46  ;;  %v5490_v16 = vpop.f32.mrb[61].mxu0 }
 0x739   : > { %v5504_v62 = vadd.f32 %v5490_v16, %v5412_v11  ;;  %v6782_v2 = vpop.f32.mrb[62].mxu0 }
 0x73a   : > { %v5493_v27 = vpop.f32.mrb[63].mxu0 }
 0x73b   : > { %v5505_v45 = vadd.f32 %v5493_v27, %v5413_v13 }
 0x747   : > { %v6793_v63 = vpop.f32.mrb[64].mxu0 }
 0x748   : > { %v5602_v14 = vadd.f32 %v6793_v63, %v5506_v44  ;;  %v5586_v33 = vpop.f32.mrb[65].mxu0 }
 0x749   : > { %v5600_v30 = vadd.f32 %v5586_v33, %v5504_v62  ;;  %v6794_v22 = vpop.f32.mrb[66].mxu0 }
 0x74a   : > { %v5589_v41 = vpop.f32.mrb[67].mxu0 }
 0x74b   : > { %v5601_v29 = vadd.f32 %v5589_v41, %v5505_v45 }
 0x757   : > { %v6805_v58 = vpop.f32.mrb[68].mxu0 }
 0x758   : > { %v5708_v1 = vadd.f32 %v6805_v58, %v5602_v14  ;;  %v5692_v4 = vpop.f32.mrb[69].mxu0 }
 0x759   : > { %v5706_v15 = vadd.f32 %v5692_v4, %v5600_v30  ;;  %v6806_v38 = vpop.f32.mrb[70].mxu0 }
 0x75a   : > { %v5695_v47 = vpop.f32.mrb[71].mxu0 }
 0x75b   : > { %v5707_v60 = vadd.f32 %v5695_v47, %v5601_v29 }
 0x767   : > { %v6817_v21 = vpop.f32.mrb[72].mxu0 }
 0x768   : > { %v5801_v0 = vadd.f32 %v6817_v21, %v5708_v1  ;;  %v5785_v37 = vpop.f32.mrb[73].mxu0 }
 0x769   : > { %v5799_v28 = vadd.f32 %v5785_v37, %v5706_v15  ;;  %v6818_v26 = vpop.f32.mrb[74].mxu0 }
 0x76a   : > { %v5788_v17 = vpop.f32.mrb[75].mxu0  ;;  %v5811_v12 = vadd.f32 %v6258_v35, %v5801_v0 }
 0x76b   : > { %v5809_v56 = vadd.f32 %v6258_v35, %v5799_v28  ;;  %v5800_v32 = vadd.f32 %v5788_v17, %v5707_v60 }
 0x76c   : > { %v5814_v43 = vmax.f32 %v5811_v12, 0.0 }
 0x76d   : > { %v5812_v25 = vmax.f32 %v5809_v56, 0.0  ;;  %v5810_v53 = vadd.f32 %v6258_v35, %v5800_v32 }
 0x76e   : > { %v5835_v23 = vmul.f32 %v5831_v57, %v5814_v43 }
 0x76f   : > { %v5813_v59 = vmax.f32 %v5810_v53, 0.0  ;;  %v5833_v51 = vmul.f32 %v5821_v7, %v5812_v25 }
 0x771   : > { %v5834_v36 = vmul.f32 %v5826_v61, %v5813_v59 }
 0x773   : > { %v5836_v24 = vadd.f32 %v5834_v36, %v5833_v51 }
 0x775   : > { %v5837_v10 = vadd.f32 %v5836_v24, %v5835_v23 }
 0x777   : > { %v5838_v50 = vrot.slane %v5837_v10, 4 }
 0x779   : > { %v5839_v18 = vadd.f32 %v5838_v50, %v5837_v10 }
 0x77b   : > { %v5840_v19 = vrot.slane %v5839_v18, 2 }
 0x77d   : > { %v5841_v40 = vadd.f32 %v5840_v19, %v5839_v18 }
 0x77f   : > { %v5842_v54 = vrot.slane %v5841_v40, 1 }
 0x781   : > { %v5843_v42 = vadd.f32 %v5842_v54, %v5841_v40 }
 0x783   : > { %v5844_v8 = vmul.f32 0.0625, %v5843_v42 }
 0x785   : > { %6852 = vmatmul.mubr.f32.vlgmr.msra.gmra.mrb[14].mxu1 %v5844_v8 }
 0x858   : > { %v5928_v3 = vpop.f32.mrb[14].mxu1 }
 0x859   : > { %v5929_v55 = vadd.f32 %v5928_v3, %v5861_v48  ;;  %v6853_v20 = vpop.f32.mrb[15].mxu1 }
 0x85b   : > { %v5932_v39 = vmul.f32 %v5929_v55, %v5929_v55 }
 0x85d   : > { %v5934_v6 = vsel %vm5933_vm15, %v5932_v39, 0.0 }
 0x85e   : > { %5935 = vadd.xlane.f32.xlu1 %v5934_v6 }
 0x8eb   : > { %v5936_v9 = vpop.xlane.xlu1 %5935 }
 0x8ec   : > { %v5937_v49 = vmax.f32 %v5936_v9, 1e-24 }
 0x8ee   : > { %7090 = vrsqrt.f32 %v5937_v49 }
 0x8f8   : > { %v7091_v46 = vpop.eup %7090 }
 0x8f9   : > { %v5939_v52 = vmul.f32 %v7091_v46, %v5929_v55 }
 0x8fb   : > { %5940 = vst.msk [vmem:[%s405_s28] sm:$0x1] %vm5933_vm15, %v5939_v52 }
 0x8fc   : > { %7108 = shalt.err (!%p7105_p3)
}
 0x8fd   : > { %s7109_s0 = scalar_lea.hbm %s11349_s17, 16  ;;  %s7113_s15 = scalar_lea.hbm %s11403_s12, 32 }
 0x8fe   : > { %p7110_p4 = scmp.ne.s32.totalorder %s11349_s17, %s7109_s0  ;;  %p7114_p9 = scmp.lt.u32.totalorder %s11349_s17, %s11403_s12 }
 0x8ff   : > { %p7115_p10 = scmp.lt.u32.totalorder %s7113_s15, %s7109_s0  ;;  %p7117_p12 = scmp.lt.u32.totalorder %s7109_s0, %s11349_s17 }
 0x900   : > { %p7111_p7 = pnand %p7110_p4, %p7267_p5 }
 0x901   : > { %p7116_p11 = por %p7115_p10, %p7114_p9 }
 0x902   : > { %p7112_p8 = pneg %p7111_p7 }
 0x903   : > { %p7118_p13 = por %p7117_p12, %p7116_p11 }
 0x905   : > { %p7119_p0 = pnand %p7118_p13, %p7112_p8 }
 0x907   : > { %7122 = shalt.err (!%p7119_p0)
}
 0x908   : > { %6991 = dma.vmem_to_hbm [thread:$0]  (%p7267_p5), %s11351_s29, 16, %s11349_s17, %s5942_s18  }
 0x909 PF: > { %p6997_p1 = scmp.ge.s32.totalorder %s7157_s24, 2  ;;  %s5966_s1 = sand.u32 1, %s7145_s21  }
 0x90a   : > { %s5967_s19 = scalar_lea.sflag [#allocation3], %s5966_s1 }
 0x90b   : > { %p6994_p2 = pnand %p6997_p1, %p7271_p6 }
 0x90d   : > { %7140 = dma.done.wait (!%p6994_p2), %s5967_s19, 16  }
 0x90e   : > { %7142 = vsyncadd (!%p6994_p2), %s5967_s19, 4294967280  ;;  %p22_p3 = scmp.ge.s32.totalorder %s7254_s27, 4   ;;  %s12627_s21 = smov %s7149_s22 }
 0x90f   : > { %s12628_s22 = smov %s7153_s23  ;;  %s12629_s23 = smov %s7265_s30 }
 0x910   : > { %s12630_s24 = smov %s7254_s27  ;;  %24 = sbr.rel (!%p22_p3) target bundleno = 6 (0x6), region = 119 }
 0x917   :  { %5971 = vsyncpa [#allocation3], 1 }
 0x918   :  { %5973 = vsyncpa [#allocation3 + $0x1], 1 }

</bundles_post_ra>
